<compile_context>
chip_gen: v6e
topology: v6e:2x2x1
jax: 0.10.0
libtpu: 0.0.40
codegen_flags: <defaults>
</compile_context>

<pallas_src>
import functools
import math

import jax
import jax.numpy as jnp
from jax.experimental import pallas as pl
from jax.experimental.pallas import tpu as pltpu

CONTEXT_LENGTH = 94
INST_LENGTH = 39
LANES = 128  # all channel-like dims are zero-padded to this


def _cnn3f_kernel(x_ref, w1_ref, b1_ref, w2_ref, b2_ref, w3_ref, b3_ref,
                  wf1_ref, bf1_ref, wf2_ref, bf2_ref,
                  o_ref,
                  a1_ref, a2_ref, a3_ref,
                  *, batch, l0p, l1, l2, l3, taps, pad2, pad3):
    """Fused forward pass. Activations are channels-last (rows, 128 lanes).

    x_ref  : (batch*l0p, 128) f32   zero-padded input (conv1 padding included)
    wN_ref : (ckN, 128, 128) bf16   per-tap weights [k, c_in, c_out]
    bN_ref : (1, 128) f32
    wf1_ref: (l3, 128, 128) bf16    fc1 weight regrouped as [t, c, f]
    wf2_ref: (128, 128) bf16
    o_ref  : (batch, 128) f32       lane-padded logits
    a1/a2  : conv1/conv2 outputs with zero pad rows for the next conv
    a3     : conv3 output, (batch*l3, 128)
    """
    (ck1, cs1), (ck2, cs2), (ck3, cs3) = taps
    l1p = l1 + 2 * pad2
    l2p = l2 + 2 * pad3
    f32 = jnp.float32
    bf16 = jnp.bfloat16

    # Zero scratch so the conv padding rows are zeros.
    a1_ref[...] = jnp.zeros_like(a1_ref)
    a2_ref[...] = jnp.zeros_like(a2_ref)

    def conv_relu(src_ref, row0, lout, ksize, stride, w_ref, b_ref):
        # Implicit im2col: one shifted (strided) slice + MXU matmul per tap.
        acc = None
        for k in range(ksize):
            if stride == 1:
                xs = src_ref[pl.ds(row0 + k, lout), :]
            else:
                xs = src_ref[pl.ds(row0 + k, lout, stride=stride), :]
            part = jnp.dot(xs.astype(bf16), w_ref[k], preferred_element_type=f32)
            acc = part if acc is None else acc + part
        return jnp.maximum(acc + b_ref[...], 0.0)

    for b in range(batch):
        y1 = conv_relu(x_ref, b * l0p, l1, ck1, cs1, w1_ref, b1_ref)
        a1_ref[pl.ds(b * l1p + pad2, l1), :] = y1
        y2 = conv_relu(a1_ref, b * l1p, l2, ck2, cs2, w2_ref, b2_ref)
        a2_ref[pl.ds(b * l2p + pad3, l2), :] = y2
        y3 = conv_relu(a2_ref, b * l2p, l3, ck3, cs3, w3_ref, b3_ref)
        a3_ref[pl.ds(b * l3, l3), :] = y3

    # fc1: the PyTorch flatten (channel-major, j = c*L3 + t) is folded into
    # wf1's packing, so fc1 is a sum over positions t of (batch,128)@(128,128).
    h = None
    for t in range(l3):
        if batch == 1:
            rows = a3_ref[pl.ds(t, 1), :]
        else:
            rows = a3_ref[pl.ds(t, batch, stride=l3), :]
        part = jnp.dot(rows.astype(bf16), wf1_ref[t], preferred_element_type=f32)
        h = part if h is None else h + part
    h = jnp.maximum(h + bf1_ref[...], 0.0)

    logits = jnp.dot(h.astype(bf16), wf2_ref[...], preferred_element_type=f32)
    o_ref[...] = (logits + bf2_ref[...]).astype(o_ref.dtype)


def _forward(params, x, *, cfg):
    w1, b1, w2, b2, w3, b3, wf1, bf1, wf2, bf2 = params
    x = x.reshape(-1, INST_LENGTH, CONTEXT_LENGTH).astype(jnp.float32)
    B = x.shape[0]
    L1, L2, L3 = cfg["L1"], cfg["L2"], cfg["L3"]
    cp1, cp2, cp3 = cfg["cp1"], cfg["cp2"], cfg["cp3"]
    L0p = CONTEXT_LENGTH + 2 * cp1
    L1p = L1 + 2 * cp2
    L2p = L2 + 2 * cp3

    # One-time layout plumbing: channels-last, conv1 zero padding, lane pad to
    # 128, flatten batch into rows -> (B*L0p, 128).
    xt = jnp.transpose(x, (0, 2, 1))
    xt = jnp.pad(xt, ((0, 0), (cp1, cp1), (0, LANES - INST_LENGTH)))
    x2d = xt.reshape(B * L0p, LANES)

    kernel = functools.partial(
        _cnn3f_kernel, batch=B, l0p=L0p, l1=L1, l2=L2, l3=L3,
        taps=((cfg["ck1"], cfg["cs1"]),
              (cfg["ck2"], cfg["cs2"]),
              (cfg["ck3"], cfg["cs3"])),
        pad2=cp2, pad3=cp3)

    def full(a):
        return pl.BlockSpec(a.shape, lambda i, n=a.ndim: (0,) * n)

    inputs = (x2d, w1, b1, w2, b2, w3, b3, wf1, bf1, wf2, bf2)
    out_pad = pl.pallas_call(
        kernel,
        out_shape=jax.ShapeDtypeStruct((B, LANES), jnp.float32),
        grid=(1,),
        in_specs=[full(a) for a in inputs],
        out_specs=pl.BlockSpec((B, LANES), lambda i: (0, 0)),
        scratch_shapes=[
            pltpu.VMEM((B * L1p, LANES), jnp.float32),
            pltpu.VMEM((B * L2p, LANES), jnp.float32),
            pltpu.VMEM((B * L3, LANES), jnp.float32),
        ],
        compiler_params=pltpu.CompilerParams(
            dimension_semantics=("arbitrary",)),
    )(*inputs)
    return out_pad[:, :cfg["out"]]


class CNN3F:
    """JAX/Pallas port of the PyTorch CNN3_F module (fully fused forward)."""

    def __init__(self, key, out, ck1, ch1, cs1, cp1, ck2, ch2, cs2, cp2,
                 ck3, ch3, cs3, cp3, f1):
        L1 = math.floor((CONTEXT_LENGTH + 2 * cp1 - ck1) / cs1 + 1)
        L2 = math.floor((L1 + 2 * cp2 - ck2) / cs2 + 1)
        L3 = math.floor((L2 + 2 * cp3 - ck3) / cs3 + 1)
        self.f1_input = int(L3 * ch3)
        assert max(INST_LENGTH, ch1, ch2, ch3, f1, out) <= LANES
        self.cfg = dict(out=out, ck1=ck1, cs1=cs1, cp1=cp1,
                        ck2=ck2, cs2=cs2, cp2=cp2,
                        ck3=ck3, cs3=cs3, cp3=cp3,
                        L1=L1, L2=L2, L3=L3)

        ks = jax.random.split(key, 10)

        def init(k, shape, fan_in):
            bound = 1.0 / math.sqrt(fan_in)
            return jax.random.uniform(k, shape, jnp.float32, -bound, bound)

        # Raw (PyTorch-layout) parameters, kept for the f32 reference path.
        self.w1 = init(ks[0], (ch1, INST_LENGTH, ck1), INST_LENGTH * ck1)
        self.b1 = init(ks[1], (ch1,), INST_LENGTH * ck1)
        self.w2 = init(ks[2], (ch2, ch1, ck2), ch1 * ck2)
        self.b2 = init(ks[3], (ch2,), ch1 * ck2)
        self.w3 = init(ks[4], (ch3, ch2, ck3), ch2 * ck3)
        self.b3 = init(ks[5], (ch3,), ch2 * ck3)
        self.wf1 = init(ks[6], (f1, self.f1_input), self.f1_input)
        self.bf1 = init(ks[7], (f1,), self.f1_input)
        self.wf2 = init(ks[8], (out, f1), f1)
        self.bf2 = init(ks[9], (out,), f1)

        # Pre-packed kernel parameters (done ONCE): tap-major, channels-last,
        # zero lane-padded to 128, weights in bf16 (f32 accumulation in-kernel).
        def pack_conv(w, b, c_in, c_out):
            k = w.shape[-1]
            wk = jnp.transpose(w, (2, 1, 0))  # (K, c_in, c_out)
            wp = (jnp.zeros((k, LANES, LANES), jnp.float32)
                  .at[:, :c_in, :c_out].set(wk))
            bp = jnp.zeros((1, LANES), jnp.float32).at[0, :c_out].set(b)
            return wp.astype(jnp.bfloat16), bp

        w1p, b1p = pack_conv(self.w1, self.b1, INST_LENGTH, ch1)
        w2p, b2p = pack_conv(self.w2, self.b2, ch1, ch2)
        w3p, b3p = pack_conv(self.w3, self.b3, ch2, ch3)

        # fc1 consumes the PyTorch flatten order (j = c*L3 + t); regroup it as
        # [t, c, f] so the kernel needs no in-kernel reshape/transpose.
        wf1_tcf = jnp.transpose(self.wf1.reshape(f1, ch3, L3), (2, 1, 0))
        wf1p = (jnp.zeros((L3, LANES, LANES), jnp.float32)
                .at[:, :ch3, :f1].set(wf1_tcf).astype(jnp.bfloat16))
        bf1p = jnp.zeros((1, LANES), jnp.float32).at[0, :f1].set(self.bf1)
        wf2p = (jnp.zeros((LANES, LANES), jnp.float32)
                .at[:f1, :out].set(self.wf2.T).astype(jnp.bfloat16))
        bf2p = jnp.zeros((1, LANES), jnp.float32).at[0, :out].set(self.bf2)

        self._packed = (w1p, b1p, w2p, b2p, w3p, b3p, wf1p, bf1p, wf2p, bf2p)
        self._fwd = jax.jit(functools.partial(_forward, cfg=self.cfg))

    def __call__(self, x):
        return self._fwd(self._packed, x)

    def reference(self, x):
        """Pure-JAX f32 reference of the PyTorch forward (for validation)."""
        c = self.cfg
        x = x.reshape(-1, INST_LENGTH, CONTEXT_LENGTH)

        def conv_relu(x, w, b, s, p):
            y = jax.lax.conv_general_dilated(
                x, w, window_strides=(s,), padding=[(p, p)],
                dimension_numbers=("NCH", "OIH", "NCH"))
            return jax.nn.relu(y + b[None, :, None])

        x = conv_relu(x, self.w1, self.b1, c["cs1"], c["cp1"])
        x = conv_relu(x, self.w2, self.b2, c["cs2"], c["cp2"])
        x = conv_relu(x, self.w3, self.b3, c["cs3"], c["cp3"])
        x = x.reshape(x.shape[0], -1)
        x = jax.nn.relu(x @ self.wf1.T + self.bf1)
        return x @ self.wf2.T + self.bf2


if __name__ == "__main__":
    key = jax.random.PRNGKey(0)
    k_param, k_in = jax.random.split(key)

    model = CNN3F(
        k_param,
        out=10,
        ck1=3, ch1=16, cs1=1, cp1=1,
        ck2=3, ch2=16, cs2=2, cp2=1,
        ck3=3, ch3=8, cs3=2, cp3=1,
        f1=32,
    )

    batch = 2
    x = jax.random.normal(k_in, (batch, INST_LENGTH, CONTEXT_LENGTH), jnp.float32)

    y = model(x)
    y_ref = model.reference(x)
    y, y_ref = jax.block_until_ready((y, y_ref))

    assert y.shape == (batch, 10), y.shape
    max_err = float(jnp.max(jnp.abs(y - y_ref)))
    assert max_err < 5e-2, f"mismatch vs f32 reference: max_abs_err={max_err}"
    print("KERNEL_OK")
</pallas_src>

<mosaic_0001>
module attributes {stable_mosaic.version = 11 : i64} {
  func.func @_cnn3f_kernel(%arg0: i32, %arg1: memref<192x128xf32, #tpu.memory_space<vmem>>, %arg2: memref<3x128x128xbf16, #tpu.memory_space<vmem>>, %arg3: memref<1x128xf32, #tpu.memory_space<vmem>>, %arg4: memref<3x128x128xbf16, #tpu.memory_space<vmem>>, %arg5: memref<1x128xf32, #tpu.memory_space<vmem>>, %arg6: memref<3x128x128xbf16, #tpu.memory_space<vmem>>, %arg7: memref<1x128xf32, #tpu.memory_space<vmem>>, %arg8: memref<24x128x128xbf16, #tpu.memory_space<vmem>>, %arg9: memref<1x128xf32, #tpu.memory_space<vmem>>, %arg10: memref<128x128xbf16, #tpu.memory_space<vmem>>, %arg11: memref<1x128xf32, #tpu.memory_space<vmem>>, %arg12: memref<2x128xf32, #tpu.memory_space<vmem>>, %arg13: memref<192x128xf32, #tpu.memory_space<vmem>>, %arg14: memref<98x128xf32, #tpu.memory_space<vmem>>, %arg15: memref<48x128xf32, #tpu.memory_space<vmem>>) attributes {dimension_semantics = [#tpu.dimension_semantics<arbitrary>], iteration_bounds = array<i64: 1>, scalar_prefetch = 0 : i64, scratch_operands = 3 : i64, tpu.core_type = #tpu.core_type<tc>, window_params = [{pipeline_mode = #tpu.pipeline_mode<synchronous>, transform_indices = @transform_0, window_bounds = array<i64: 192, 128>}, {pipeline_mode = #tpu.pipeline_mode<synchronous>, transform_indices = @transform_1, window_bounds = array<i64: 3, 128, 128>}, {pipeline_mode = #tpu.pipeline_mode<synchronous>, transform_indices = @transform_2, window_bounds = array<i64: 1, 128>}, {pipeline_mode = #tpu.pipeline_mode<synchronous>, transform_indices = @transform_3, window_bounds = array<i64: 3, 128, 128>}, {pipeline_mode = #tpu.pipeline_mode<synchronous>, transform_indices = @transform_4, window_bounds = array<i64: 1, 128>}, {pipeline_mode = #tpu.pipeline_mode<synchronous>, transform_indices = @transform_5, window_bounds = array<i64: 3, 128, 128>}, {pipeline_mode = #tpu.pipeline_mode<synchronous>, transform_indices = @transform_6, window_bounds = array<i64: 1, 128>}, {pipeline_mode = #tpu.pipeline_mode<synchronous>, transform_indices = @transform_7, window_bounds = array<i64: 24, 128, 128>}, {pipeline_mode = #tpu.pipeline_mode<synchronous>, transform_indices = @transform_8, window_bounds = array<i64: 1, 128>}, {pipeline_mode = #tpu.pipeline_mode<synchronous>, transform_indices = @transform_9, window_bounds = array<i64: 128, 128>}, {pipeline_mode = #tpu.pipeline_mode<synchronous>, transform_indices = @transform_10, window_bounds = array<i64: 1, 128>}, {pipeline_mode = #tpu.pipeline_mode<synchronous>, transform_indices = @transform_11, window_bounds = array<i64: 2, 128>}]} {
    %cst = arith.constant 0.000000e+00 : f32
    %0 = vector.broadcast %cst : f32 to vector<192x128xf32>
    %c0 = arith.constant 0 : index
    %c0_0 = arith.constant 0 : index
    %1 = vector.load %arg13[%c0, %c0_0] : memref<192x128xf32, #tpu.memory_space<vmem>>, vector<192x128xf32>
    tpu.vector_store %arg13[%c0, %c0_0], %0 {strides = array<i32>} : memref<192x128xf32, #tpu.memory_space<vmem>>, vector<192x128xf32>,
    %cst_1 = arith.constant 0.000000e+00 : f32
    %2 = vector.broadcast %cst_1 : f32 to vector<98x128xf32>
    %c0_2 = arith.constant 0 : index
    %c0_3 = arith.constant 0 : index
    %3 = vector.load %arg14[%c0_2, %c0_3] : memref<98x128xf32, #tpu.memory_space<vmem>>, vector<98x128xf32>
    tpu.vector_store %arg14[%c0_2, %c0_3], %2 {strides = array<i32>} : memref<98x128xf32, #tpu.memory_space<vmem>>, vector<98x128xf32>,
    %c0_4 = arith.constant 0 : index
    %c0_5 = arith.constant 0 : index
    %4 = vector.load %arg1[%c0_4, %c0_5] : memref<192x128xf32, #tpu.memory_space<vmem>>, vector<94x128xf32>
    %5 = arith.truncf %4 : vector<94x128xf32> to vector<94x128xbf16>
    %c0_6 = arith.constant 0 : index
    %c0_7 = arith.constant 0 : index
    %c0_8 = arith.constant 0 : index
    %6 = vector.load %arg2[%c0_6, %c0_7, %c0_8] : memref<3x128x128xbf16, #tpu.memory_space<vmem>>, vector<1x128x128xbf16>
    %7 = vector.shape_cast %6 : vector<1x128x128xbf16> to vector<128x128xbf16>
    %cst_9 = arith.constant dense<0.000000e+00> : vector<94x128xf32>
    %8 = tpu.matmul %5, %7, %cst_9 {dimension_numbers = #tpu.dot_dimension_numbers<[1], [0], [0], [1], [0, 0, 1, 1], [], []>} : vector<94x128xbf16>, vector<128x128xbf16>, vector<94x128xf32> -> vector<94x128xf32>
    %c1 = arith.constant 1 : index
    %c0_10 = arith.constant 0 : index
    %9 = vector.load %arg1[%c1, %c0_10] : memref<192x128xf32, #tpu.memory_space<vmem>>, vector<94x128xf32>
    %10 = arith.truncf %9 : vector<94x128xf32> to vector<94x128xbf16>
    %c1_11 = arith.constant 1 : index
    %c0_12 = arith.constant 0 : index
    %c0_13 = arith.constant 0 : index
    %11 = vector.load %arg2[%c1_11, %c0_12, %c0_13] : memref<3x128x128xbf16, #tpu.memory_space<vmem>>, vector<1x128x128xbf16>
    %12 = vector.shape_cast %11 : vector<1x128x128xbf16> to vector<128x128xbf16>
    %cst_14 = arith.constant dense<0.000000e+00> : vector<94x128xf32>
    %13 = tpu.matmul %10, %12, %cst_14 {dimension_numbers = #tpu.dot_dimension_numbers<[1], [0], [0], [1], [0, 0, 1, 1], [], []>} : vector<94x128xbf16>, vector<128x128xbf16>, vector<94x128xf32> -> vector<94x128xf32>
    %14 = arith.addf %8, %13 : vector<94x128xf32>
    %c2 = arith.constant 2 : index
    %c0_15 = arith.constant 0 : index
    %15 = vector.load %arg1[%c2, %c0_15] : memref<192x128xf32, #tpu.memory_space<vmem>>, vector<94x128xf32>
    %16 = arith.truncf %15 : vector<94x128xf32> to vector<94x128xbf16>
    %c2_16 = arith.constant 2 : index
    %c0_17 = arith.constant 0 : index
    %c0_18 = arith.constant 0 : index
    %17 = vector.load %arg2[%c2_16, %c0_17, %c0_18] : memref<3x128x128xbf16, #tpu.memory_space<vmem>>, vector<1x128x128xbf16>
    %18 = vector.shape_cast %17 : vector<1x128x128xbf16> to vector<128x128xbf16>
    %cst_19 = arith.constant dense<0.000000e+00> : vector<94x128xf32>
    %19 = tpu.matmul %16, %18, %cst_19 {dimension_numbers = #tpu.dot_dimension_numbers<[1], [0], [0], [1], [0, 0, 1, 1], [], []>} : vector<94x128xbf16>, vector<128x128xbf16>, vector<94x128xf32> -> vector<94x128xf32>
    %20 = arith.addf %14, %19 : vector<94x128xf32>
    %c0_20 = arith.constant 0 : index
    %c0_21 = arith.constant 0 : index
    %21 = vector.load %arg3[%c0_20, %c0_21] : memref<1x128xf32, #tpu.memory_space<vmem>>, vector<1x128xf32>
    %22 = vector.broadcast %21 : vector<1x128xf32> to vector<94x128xf32>
    %23 = arith.addf %20, %22 : vector<94x128xf32>
    %cst_22 = arith.constant 0.000000e+00 : f32
    %24 = vector.broadcast %cst_22 : f32 to vector<94x128xf32>
    %25 = arith.maximumf %23, %24 : vector<94x128xf32>
    %c1_23 = arith.constant 1 : index
    %c0_24 = arith.constant 0 : index
    %26 = vector.load %arg13[%c1_23, %c0_24] : memref<192x128xf32, #tpu.memory_space<vmem>>, vector<94x128xf32>
    tpu.vector_store %arg13[%c1_23, %c0_24], %25 {strides = array<i32>} : memref<192x128xf32, #tpu.memory_space<vmem>>, vector<94x128xf32>,
    %c0_25 = arith.constant 0 : index
    %c0_26 = arith.constant 0 : index
    %27 = tpu.strided_load %arg13[%c0_25, %c0_26] {strides = array<i32: 2, 1>} : memref<192x128xf32, #tpu.memory_space<vmem>>, vector<47x128xf32>
    %28 = arith.truncf %27 : vector<47x128xf32> to vector<47x128xbf16>
    %c0_27 = arith.constant 0 : index
    %c0_28 = arith.constant 0 : index
    %c0_29 = arith.constant 0 : index
    %29 = vector.load %arg4[%c0_27, %c0_28, %c0_29] : memref<3x128x128xbf16, #tpu.memory_space<vmem>>, vector<1x128x128xbf16>
    %30 = vector.shape_cast %29 : vector<1x128x128xbf16> to vector<128x128xbf16>
    %cst_30 = arith.constant dense<0.000000e+00> : vector<47x128xf32>
    %31 = tpu.matmul %28, %30, %cst_30 {dimension_numbers = #tpu.dot_dimension_numbers<[1], [0], [0], [1], [0, 0, 1, 1], [], []>} : vector<47x128xbf16>, vector<128x128xbf16>, vector<47x128xf32> -> vector<47x128xf32>
    %c1_31 = arith.constant 1 : index
    %c0_32 = arith.constant 0 : index
    %32 = tpu.strided_load %arg13[%c1_31, %c0_32] {strides = array<i32: 2, 1>} : memref<192x128xf32, #tpu.memory_space<vmem>>, vector<47x128xf32>
    %33 = arith.truncf %32 : vector<47x128xf32> to vector<47x128xbf16>
    %c1_33 = arith.constant 1 : index
    %c0_34 = arith.constant 0 : index
    %c0_35 = arith.constant 0 : index
    %34 = vector.load %arg4[%c1_33, %c0_34, %c0_35] : memref<3x128x128xbf16, #tpu.memory_space<vmem>>, vector<1x128x128xbf16>
    %35 = vector.shape_cast %34 : vector<1x128x128xbf16> to vector<128x128xbf16>
    %cst_36 = arith.constant dense<0.000000e+00> : vector<47x128xf32>
    %36 = tpu.matmul %33, %35, %cst_36 {dimension_numbers = #tpu.dot_dimension_numbers<[1], [0], [0], [1], [0, 0, 1, 1], [], []>} : vector<47x128xbf16>, vector<128x128xbf16>, vector<47x128xf32> -> vector<47x128xf32>
    %37 = arith.addf %31, %36 : vector<47x128xf32>
    %c2_37 = arith.constant 2 : index
    %c0_38 = arith.constant 0 : index
    %38 = tpu.strided_load %arg13[%c2_37, %c0_38] {strides = array<i32: 2, 1>} : memref<192x128xf32, #tpu.memory_space<vmem>>, vector<47x128xf32>
    %39 = arith.truncf %38 : vector<47x128xf32> to vector<47x128xbf16>
    %c2_39 = arith.constant 2 : index
    %c0_40 = arith.constant 0 : index
    %c0_41 = arith.constant 0 : index
    %40 = vector.load %arg4[%c2_39, %c0_40, %c0_41] : memref<3x128x128xbf16, #tpu.memory_space<vmem>>, vector<1x128x128xbf16>
    %41 = vector.shape_cast %40 : vector<1x128x128xbf16> to vector<128x128xbf16>
    %cst_42 = arith.constant dense<0.000000e+00> : vector<47x128xf32>
    %42 = tpu.matmul %39, %41, %cst_42 {dimension_numbers = #tpu.dot_dimension_numbers<[1], [0], [0], [1], [0, 0, 1, 1], [], []>} : vector<47x128xbf16>, vector<128x128xbf16>, vector<47x128xf32> -> vector<47x128xf32>
    %43 = arith.addf %37, %42 : vector<47x128xf32>
    %c0_43 = arith.constant 0 : index
    %c0_44 = arith.constant 0 : index
    %44 = vector.load %arg5[%c0_43, %c0_44] : memref<1x128xf32, #tpu.memory_space<vmem>>, vector<1x128xf32>
    %45 = vector.broadcast %44 : vector<1x128xf32> to vector<47x128xf32>
    %46 = arith.addf %43, %45 : vector<47x128xf32>
    %cst_45 = arith.constant 0.000000e+00 : f32
    %47 = vector.broadcast %cst_45 : f32 to vector<47x128xf32>
    %48 = arith.maximumf %46, %47 : vector<47x128xf32>
    %c1_46 = arith.constant 1 : index
    %c0_47 = arith.constant 0 : index
    %49 = vector.load %arg14[%c1_46, %c0_47] : memref<98x128xf32, #tpu.memory_space<vmem>>, vector<47x128xf32>
    tpu.vector_store %arg14[%c1_46, %c0_47], %48 {strides = array<i32>} : memref<98x128xf32, #tpu.memory_space<vmem>>, vector<47x128xf32>,
    %c0_48 = arith.constant 0 : index
    %c0_49 = arith.constant 0 : index
    %50 = tpu.strided_load %arg14[%c0_48, %c0_49] {strides = array<i32: 2, 1>} : memref<98x128xf32, #tpu.memory_space<vmem>>, vector<24x128xf32>
    %51 = arith.truncf %50 : vector<24x128xf32> to vector<24x128xbf16>
    %c0_50 = arith.constant 0 : index
    %c0_51 = arith.constant 0 : index
    %c0_52 = arith.constant 0 : index
    %52 = vector.load %arg6[%c0_50, %c0_51, %c0_52] : memref<3x128x128xbf16, #tpu.memory_space<vmem>>, vector<1x128x128xbf16>
    %53 = vector.shape_cast %52 : vector<1x128x128xbf16> to vector<128x128xbf16>
    %cst_53 = arith.constant dense<0.000000e+00> : vector<24x128xf32>
    %54 = tpu.matmul %51, %53, %cst_53 {dimension_numbers = #tpu.dot_dimension_numbers<[1], [0], [0], [1], [0, 0, 1, 1], [], []>} : vector<24x128xbf16>, vector<128x128xbf16>, vector<24x128xf32> -> vector<24x128xf32>
    %c1_54 = arith.constant 1 : index
    %c0_55 = arith.constant 0 : index
    %55 = tpu.strided_load %arg14[%c1_54, %c0_55] {strides = array<i32: 2, 1>} : memref<98x128xf32, #tpu.memory_space<vmem>>, vector<24x128xf32>
    %56 = arith.truncf %55 : vector<24x128xf32> to vector<24x128xbf16>
    %c1_56 = arith.constant 1 : index
    %c0_57 = arith.constant 0 : index
    %c0_58 = arith.constant 0 : index
    %57 = vector.load %arg6[%c1_56, %c0_57, %c0_58] : memref<3x128x128xbf16, #tpu.memory_space<vmem>>, vector<1x128x128xbf16>
    %58 = vector.shape_cast %57 : vector<1x128x128xbf16> to vector<128x128xbf16>
    %cst_59 = arith.constant dense<0.000000e+00> : vector<24x128xf32>
    %59 = tpu.matmul %56, %58, %cst_59 {dimension_numbers = #tpu.dot_dimension_numbers<[1], [0], [0], [1], [0, 0, 1, 1], [], []>} : vector<24x128xbf16>, vector<128x128xbf16>, vector<24x128xf32> -> vector<24x128xf32>
    %60 = arith.addf %54, %59 : vector<24x128xf32>
    %c2_60 = arith.constant 2 : index
    %c0_61 = arith.constant 0 : index
    %61 = tpu.strided_load %arg14[%c2_60, %c0_61] {strides = array<i32: 2, 1>} : memref<98x128xf32, #tpu.memory_space<vmem>>, vector<24x128xf32>
    %62 = arith.truncf %61 : vector<24x128xf32> to vector<24x128xbf16>
    %c2_62 = arith.constant 2 : index
    %c0_63 = arith.constant 0 : index
    %c0_64 = arith.constant 0 : index
    %63 = vector.load %arg6[%c2_62, %c0_63, %c0_64] : memref<3x128x128xbf16, #tpu.memory_space<vmem>>, vector<1x128x128xbf16>
    %64 = vector.shape_cast %63 : vector<1x128x128xbf16> to vector<128x128xbf16>
    %cst_65 = arith.constant dense<0.000000e+00> : vector<24x128xf32>
    %65 = tpu.matmul %62, %64, %cst_65 {dimension_numbers = #tpu.dot_dimension_numbers<[1], [0], [0], [1], [0, 0, 1, 1], [], []>} : vector<24x128xbf16>, vector<128x128xbf16>, vector<24x128xf32> -> vector<24x128xf32>
    %66 = arith.addf %60, %65 : vector<24x128xf32>
    %c0_66 = arith.constant 0 : index
    %c0_67 = arith.constant 0 : index
    %67 = vector.load %arg7[%c0_66, %c0_67] : memref<1x128xf32, #tpu.memory_space<vmem>>, vector<1x128xf32>
    %68 = vector.broadcast %67 : vector<1x128xf32> to vector<24x128xf32>
    %69 = arith.addf %66, %68 : vector<24x128xf32>
    %cst_68 = arith.constant 0.000000e+00 : f32
    %70 = vector.broadcast %cst_68 : f32 to vector<24x128xf32>
    %71 = arith.maximumf %69, %70 : vector<24x128xf32>
    %c0_69 = arith.constant 0 : index
    %c0_70 = arith.constant 0 : index
    %72 = vector.load %arg15[%c0_69, %c0_70] : memref<48x128xf32, #tpu.memory_space<vmem>>, vector<24x128xf32>
    tpu.vector_store %arg15[%c0_69, %c0_70], %71 {strides = array<i32>} : memref<48x128xf32, #tpu.memory_space<vmem>>, vector<24x128xf32>,
    %c96 = arith.constant 96 : index
    %c0_71 = arith.constant 0 : index
    %73 = vector.load %arg1[%c96, %c0_71] : memref<192x128xf32, #tpu.memory_space<vmem>>, vector<94x128xf32>
    %74 = arith.truncf %73 : vector<94x128xf32> to vector<94x128xbf16>
    %c0_72 = arith.constant 0 : index
    %c0_73 = arith.constant 0 : index
    %c0_74 = arith.constant 0 : index
    %75 = vector.load %arg2[%c0_72, %c0_73, %c0_74] : memref<3x128x128xbf16, #tpu.memory_space<vmem>>, vector<1x128x128xbf16>
    %76 = vector.shape_cast %75 : vector<1x128x128xbf16> to vector<128x128xbf16>
    %cst_75 = arith.constant dense<0.000000e+00> : vector<94x128xf32>
    %77 = tpu.matmul %74, %76, %cst_75 {dimension_numbers = #tpu.dot_dimension_numbers<[1], [0], [0], [1], [0, 0, 1, 1], [], []>} : vector<94x128xbf16>, vector<128x128xbf16>, vector<94x128xf32> -> vector<94x128xf32>
    %c97 = arith.constant 97 : index
    %c0_76 = arith.constant 0 : index
    %78 = vector.load %arg1[%c97, %c0_76] : memref<192x128xf32, #tpu.memory_space<vmem>>, vector<94x128xf32>
    %79 = arith.truncf %78 : vector<94x128xf32> to vector<94x128xbf16>
    %c1_77 = arith.constant 1 : index
    %c0_78 = arith.constant 0 : index
    %c0_79 = arith.constant 0 : index
    %80 = vector.load %arg2[%c1_77, %c0_78, %c0_79] : memref<3x128x128xbf16, #tpu.memory_space<vmem>>, vector<1x128x128xbf16>
    %81 = vector.shape_cast %80 : vector<1x128x128xbf16> to vector<128x128xbf16>
    %cst_80 = arith.constant dense<0.000000e+00> : vector<94x128xf32>
    %82 = tpu.matmul %79, %81, %cst_80 {dimension_numbers = #tpu.dot_dimension_numbers<[1], [0], [0], [1], [0, 0, 1, 1], [], []>} : vector<94x128xbf16>, vector<128x128xbf16>, vector<94x128xf32> -> vector<94x128xf32>
    %83 = arith.addf %77, %82 : vector<94x128xf32>
    %c98 = arith.constant 98 : index
    %c0_81 = arith.constant 0 : index
    %84 = vector.load %arg1[%c98, %c0_81] : memref<192x128xf32, #tpu.memory_space<vmem>>, vector<94x128xf32>
    %85 = arith.truncf %84 : vector<94x128xf32> to vector<94x128xbf16>
    %c2_82 = arith.constant 2 : index
    %c0_83 = arith.constant 0 : index
    %c0_84 = arith.constant 0 : index
    %86 = vector.load %arg2[%c2_82, %c0_83, %c0_84] : memref<3x128x128xbf16, #tpu.memory_space<vmem>>, vector<1x128x128xbf16>
    %87 = vector.shape_cast %86 : vector<1x128x128xbf16> to vector<128x128xbf16>
    %cst_85 = arith.constant dense<0.000000e+00> : vector<94x128xf32>
    %88 = tpu.matmul %85, %87, %cst_85 {dimension_numbers = #tpu.dot_dimension_numbers<[1], [0], [0], [1], [0, 0, 1, 1], [], []>} : vector<94x128xbf16>, vector<128x128xbf16>, vector<94x128xf32> -> vector<94x128xf32>
    %89 = arith.addf %83, %88 : vector<94x128xf32>
    %c0_86 = arith.constant 0 : index
    %c0_87 = arith.constant 0 : index
    %90 = vector.load %arg3[%c0_86, %c0_87] : memref<1x128xf32, #tpu.memory_space<vmem>>, vector<1x128xf32>
    %91 = vector.broadcast %90 : vector<1x128xf32> to vector<94x128xf32>
    %92 = arith.addf %89, %91 : vector<94x128xf32>
    %cst_88 = arith.constant 0.000000e+00 : f32
    %93 = vector.broadcast %cst_88 : f32 to vector<94x128xf32>
    %94 = arith.maximumf %92, %93 : vector<94x128xf32>
    %c97_89 = arith.constant 97 : index
    %c0_90 = arith.constant 0 : index
    %95 = vector.load %arg13[%c97_89, %c0_90] : memref<192x128xf32, #tpu.memory_space<vmem>>, vector<94x128xf32>
    tpu.vector_store %arg13[%c97_89, %c0_90], %94 {strides = array<i32>} : memref<192x128xf32, #tpu.memory_space<vmem>>, vector<94x128xf32>,
    %c96_91 = arith.constant 96 : index
    %c0_92 = arith.constant 0 : index
    %96 = tpu.strided_load %arg13[%c96_91, %c0_92] {strides = array<i32: 2, 1>} : memref<192x128xf32, #tpu.memory_space<vmem>>, vector<47x128xf32>
    %97 = arith.truncf %96 : vector<47x128xf32> to vector<47x128xbf16>
    %c0_93 = arith.constant 0 : index
    %c0_94 = arith.constant 0 : index
    %c0_95 = arith.constant 0 : index
    %98 = vector.load %arg4[%c0_93, %c0_94, %c0_95] : memref<3x128x128xbf16, #tpu.memory_space<vmem>>, vector<1x128x128xbf16>
    %99 = vector.shape_cast %98 : vector<1x128x128xbf16> to vector<128x128xbf16>
    %cst_96 = arith.constant dense<0.000000e+00> : vector<47x128xf32>
    %100 = tpu.matmul %97, %99, %cst_96 {dimension_numbers = #tpu.dot_dimension_numbers<[1], [0], [0], [1], [0, 0, 1, 1], [], []>} : vector<47x128xbf16>, vector<128x128xbf16>, vector<47x128xf32> -> vector<47x128xf32>
    %c97_97 = arith.constant 97 : index
    %c0_98 = arith.constant 0 : index
    %101 = tpu.strided_load %arg13[%c97_97, %c0_98] {strides = array<i32: 2, 1>} : memref<192x128xf32, #tpu.memory_space<vmem>>, vector<47x128xf32>
    %102 = arith.truncf %101 : vector<47x128xf32> to vector<47x128xbf16>
    %c1_99 = arith.constant 1 : index
    %c0_100 = arith.constant 0 : index
    %c0_101 = arith.constant 0 : index
    %103 = vector.load %arg4[%c1_99, %c0_100, %c0_101] : memref<3x128x128xbf16, #tpu.memory_space<vmem>>, vector<1x128x128xbf16>
    %104 = vector.shape_cast %103 : vector<1x128x128xbf16> to vector<128x128xbf16>
    %cst_102 = arith.constant dense<0.000000e+00> : vector<47x128xf32>
    %105 = tpu.matmul %102, %104, %cst_102 {dimension_numbers = #tpu.dot_dimension_numbers<[1], [0], [0], [1], [0, 0, 1, 1], [], []>} : vector<47x128xbf16>, vector<128x128xbf16>, vector<47x128xf32> -> vector<47x128xf32>
    %106 = arith.addf %100, %105 : vector<47x128xf32>
    %c98_103 = arith.constant 98 : index
    %c0_104 = arith.constant 0 : index
    %107 = tpu.strided_load %arg13[%c98_103, %c0_104] {strides = array<i32: 2, 1>} : memref<192x128xf32, #tpu.memory_space<vmem>>, vector<47x128xf32>
    %108 = arith.truncf %107 : vector<47x128xf32> to vector<47x128xbf16>
    %c2_105 = arith.constant 2 : index
    %c0_106 = arith.constant 0 : index
    %c0_107 = arith.constant 0 : index
    %109 = vector.load %arg4[%c2_105, %c0_106, %c0_107] : memref<3x128x128xbf16, #tpu.memory_space<vmem>>, vector<1x128x128xbf16>
    %110 = vector.shape_cast %109 : vector<1x128x128xbf16> to vector<128x128xbf16>
    %cst_108 = arith.constant dense<0.000000e+00> : vector<47x128xf32>
    %111 = tpu.matmul %108, %110, %cst_108 {dimension_numbers = #tpu.dot_dimension_numbers<[1], [0], [0], [1], [0, 0, 1, 1], [], []>} : vector<47x128xbf16>, vector<128x128xbf16>, vector<47x128xf32> -> vector<47x128xf32>
    %112 = arith.addf %106, %111 : vector<47x128xf32>
    %c0_109 = arith.constant 0 : index
    %c0_110 = arith.constant 0 : index
    %113 = vector.load %arg5[%c0_109, %c0_110] : memref<1x128xf32, #tpu.memory_space<vmem>>, vector<1x128xf32>
    %114 = vector.broadcast %113 : vector<1x128xf32> to vector<47x128xf32>
    %115 = arith.addf %112, %114 : vector<47x128xf32>
    %cst_111 = arith.constant 0.000000e+00 : f32
    %116 = vector.broadcast %cst_111 : f32 to vector<47x128xf32>
    %117 = arith.maximumf %115, %116 : vector<47x128xf32>
    %c50 = arith.constant 50 : index
    %c0_112 = arith.constant 0 : index
    %118 = vector.load %arg14[%c50, %c0_112] : memref<98x128xf32, #tpu.memory_space<vmem>>, vector<47x128xf32>
    tpu.vector_store %arg14[%c50, %c0_112], %117 {strides = array<i32>} : memref<98x128xf32, #tpu.memory_space<vmem>>, vector<47x128xf32>,
    %c49 = arith.constant 49 : index
    %c0_113 = arith.constant 0 : index
    %119 = tpu.strided_load %arg14[%c49, %c0_113] {strides = array<i32: 2, 1>} : memref<98x128xf32, #tpu.memory_space<vmem>>, vector<24x128xf32>
    %120 = arith.truncf %119 : vector<24x128xf32> to vector<24x128xbf16>
    %c0_114 = arith.constant 0 : index
    %c0_115 = arith.constant 0 : index
    %c0_116 = arith.constant 0 : index
    %121 = vector.load %arg6[%c0_114, %c0_115, %c0_116] : memref<3x128x128xbf16, #tpu.memory_space<vmem>>, vector<1x128x128xbf16>
    %122 = vector.shape_cast %121 : vector<1x128x128xbf16> to vector<128x128xbf16>
    %cst_117 = arith.constant dense<0.000000e+00> : vector<24x128xf32>
    %123 = tpu.matmul %120, %122, %cst_117 {dimension_numbers = #tpu.dot_dimension_numbers<[1], [0], [0], [1], [0, 0, 1, 1], [], []>} : vector<24x128xbf16>, vector<128x128xbf16>, vector<24x128xf32> -> vector<24x128xf32>
    %c50_118 = arith.constant 50 : index
    %c0_119 = arith.constant 0 : index
    %124 = tpu.strided_load %arg14[%c50_118, %c0_119] {strides = array<i32: 2, 1>} : memref<98x128xf32, #tpu.memory_space<vmem>>, vector<24x128xf32>
    %125 = arith.truncf %124 : vector<24x128xf32> to vector<24x128xbf16>
    %c1_120 = arith.constant 1 : index
    %c0_121 = arith.constant 0 : index
    %c0_122 = arith.constant 0 : index
    %126 = vector.load %arg6[%c1_120, %c0_121, %c0_122] : memref<3x128x128xbf16, #tpu.memory_space<vmem>>, vector<1x128x128xbf16>
    %127 = vector.shape_cast %126 : vector<1x128x128xbf16> to vector<128x128xbf16>
    %cst_123 = arith.constant dense<0.000000e+00> : vector<24x128xf32>
    %128 = tpu.matmul %125, %127, %cst_123 {dimension_numbers = #tpu.dot_dimension_numbers<[1], [0], [0], [1], [0, 0, 1, 1], [], []>} : vector<24x128xbf16>, vector<128x128xbf16>, vector<24x128xf32> -> vector<24x128xf32>
    %129 = arith.addf %123, %128 : vector<24x128xf32>
    %c51 = arith.constant 51 : index
    %c0_124 = arith.constant 0 : index
    %130 = tpu.strided_load %arg14[%c51, %c0_124] {strides = array<i32: 2, 1>} : memref<98x128xf32, #tpu.memory_space<vmem>>, vector<24x128xf32>
    %131 = arith.truncf %130 : vector<24x128xf32> to vector<24x128xbf16>
    %c2_125 = arith.constant 2 : index
    %c0_126 = arith.constant 0 : index
    %c0_127 = arith.constant 0 : index
    %132 = vector.load %arg6[%c2_125, %c0_126, %c0_127] : memref<3x128x128xbf16, #tpu.memory_space<vmem>>, vector<1x128x128xbf16>
    %133 = vector.shape_cast %132 : vector<1x128x128xbf16> to vector<128x128xbf16>
    %cst_128 = arith.constant dense<0.000000e+00> : vector<24x128xf32>
    %134 = tpu.matmul %131, %133, %cst_128 {dimension_numbers = #tpu.dot_dimension_numbers<[1], [0], [0], [1], [0, 0, 1, 1], [], []>} : vector<24x128xbf16>, vector<128x128xbf16>, vector<24x128xf32> -> vector<24x128xf32>
    %135 = arith.addf %129, %134 : vector<24x128xf32>
    %c0_129 = arith.constant 0 : index
    %c0_130 = arith.constant 0 : index
    %136 = vector.load %arg7[%c0_129, %c0_130] : memref<1x128xf32, #tpu.memory_space<vmem>>, vector<1x128xf32>
    %137 = vector.broadcast %136 : vector<1x128xf32> to vector<24x128xf32>
    %138 = arith.addf %135, %137 : vector<24x128xf32>
    %cst_131 = arith.constant 0.000000e+00 : f32
    %139 = vector.broadcast %cst_131 : f32 to vector<24x128xf32>
    %140 = arith.maximumf %138, %139 : vector<24x128xf32>
    %c24 = arith.constant 24 : index
    %c0_132 = arith.constant 0 : index
    %141 = vector.load %arg15[%c24, %c0_132] : memref<48x128xf32, #tpu.memory_space<vmem>>, vector<24x128xf32>
    tpu.vector_store %arg15[%c24, %c0_132], %140 {strides = array<i32>} : memref<48x128xf32, #tpu.memory_space<vmem>>, vector<24x128xf32>,
    %c0_133 = arith.constant 0 : index
    %c0_134 = arith.constant 0 : index
    %142 = tpu.strided_load %arg15[%c0_133, %c0_134] {strides = array<i32: 24, 1>} : memref<48x128xf32, #tpu.memory_space<vmem>>, vector<2x128xf32>
    %143 = arith.truncf %142 : vector<2x128xf32> to vector<2x128xbf16>
    %c0_135 = arith.constant 0 : index
    %c0_136 = arith.constant 0 : index
    %c0_137 = arith.constant 0 : index
    %144 = vector.load %arg8[%c0_135, %c0_136, %c0_137] : memref<24x128x128xbf16, #tpu.memory_space<vmem>>, vector<1x128x128xbf16>
    %145 = vector.shape_cast %144 : vector<1x128x128xbf16> to vector<128x128xbf16>
    %cst_138 = arith.constant dense<0.000000e+00> : vector<2x128xf32>
    %146 = tpu.matmul %143, %145, %cst_138 {dimension_numbers = #tpu.dot_dimension_numbers<[1], [0], [0], [1], [0, 0, 1, 1], [], []>} : vector<2x128xbf16>, vector<128x128xbf16>, vector<2x128xf32> -> vector<2x128xf32>
    %c1_139 = arith.constant 1 : index
    %c0_140 = arith.constant 0 : index
    %147 = tpu.strided_load %arg15[%c1_139, %c0_140] {strides = array<i32: 24, 1>} : memref<48x128xf32, #tpu.memory_space<vmem>>, vector<2x128xf32>
    %148 = arith.truncf %147 : vector<2x128xf32> to vector<2x128xbf16>
    %c1_141 = arith.constant 1 : index
    %c0_142 = arith.constant 0 : index
    %c0_143 = arith.constant 0 : index
    %149 = vector.load %arg8[%c1_141, %c0_142, %c0_143] : memref<24x128x128xbf16, #tpu.memory_space<vmem>>, vector<1x128x128xbf16>
    %150 = vector.shape_cast %149 : vector<1x128x128xbf16> to vector<128x128xbf16>
    %cst_144 = arith.constant dense<0.000000e+00> : vector<2x128xf32>
    %151 = tpu.matmul %148, %150, %cst_144 {dimension_numbers = #tpu.dot_dimension_numbers<[1], [0], [0], [1], [0, 0, 1, 1], [], []>} : vector<2x128xbf16>, vector<128x128xbf16>, vector<2x128xf32> -> vector<2x128xf32>
    %152 = arith.addf %146, %151 : vector<2x128xf32>
    %c2_145 = arith.constant 2 : index
    %c0_146 = arith.constant 0 : index
    %153 = tpu.strided_load %arg15[%c2_145, %c0_146] {strides = array<i32: 24, 1>} : memref<48x128xf32, #tpu.memory_space<vmem>>, vector<2x128xf32>
    %154 = arith.truncf %153 : vector<2x128xf32> to vector<2x128xbf16>
    %c2_147 = arith.constant 2 : index
    %c0_148 = arith.constant 0 : index
    %c0_149 = arith.constant 0 : index
    %155 = vector.load %arg8[%c2_147, %c0_148, %c0_149] : memref<24x128x128xbf16, #tpu.memory_space<vmem>>, vector<1x128x128xbf16>
    %156 = vector.shape_cast %155 : vector<1x128x128xbf16> to vector<128x128xbf16>
    %cst_150 = arith.constant dense<0.000000e+00> : vector<2x128xf32>
    %157 = tpu.matmul %154, %156, %cst_150 {dimension_numbers = #tpu.dot_dimension_numbers<[1], [0], [0], [1], [0, 0, 1, 1], [], []>} : vector<2x128xbf16>, vector<128x128xbf16>, vector<2x128xf32> -> vector<2x128xf32>
    %158 = arith.addf %152, %157 : vector<2x128xf32>
    %c3 = arith.constant 3 : index
    %c0_151 = arith.constant 0 : index
    %159 = tpu.strided_load %arg15[%c3, %c0_151] {strides = array<i32: 24, 1>} : memref<48x128xf32, #tpu.memory_space<vmem>>, vector<2x128xf32>
    %160 = arith.truncf %159 : vector<2x128xf32> to vector<2x128xbf16>
    %c3_152 = arith.constant 3 : index
    %c0_153 = arith.constant 0 : index
    %c0_154 = arith.constant 0 : index
    %161 = vector.load %arg8[%c3_152, %c0_153, %c0_154] : memref<24x128x128xbf16, #tpu.memory_space<vmem>>, vector<1x128x128xbf16>
    %162 = vector.shape_cast %161 : vector<1x128x128xbf16> to vector<128x128xbf16>
    %cst_155 = arith.constant dense<0.000000e+00> : vector<2x128xf32>
    %163 = tpu.matmul %160, %162, %cst_155 {dimension_numbers = #tpu.dot_dimension_numbers<[1], [0], [0], [1], [0, 0, 1, 1], [], []>} : vector<2x128xbf16>, vector<128x128xbf16>, vector<2x128xf32> -> vector<2x128xf32>
    %164 = arith.addf %158, %163 : vector<2x128xf32>
    %c4 = arith.constant 4 : index
    %c0_156 = arith.constant 0 : index
    %165 = tpu.strided_load %arg15[%c4, %c0_156] {strides = array<i32: 24, 1>} : memref<48x128xf32, #tpu.memory_space<vmem>>, vector<2x128xf32>
    %166 = arith.truncf %165 : vector<2x128xf32> to vector<2x128xbf16>
    %c4_157 = arith.constant 4 : index
    %c0_158 = arith.constant 0 : index
    %c0_159 = arith.constant 0 : index
    %167 = vector.load %arg8[%c4_157, %c0_158, %c0_159] : memref<24x128x128xbf16, #tpu.memory_space<vmem>>, vector<1x128x128xbf16>
    %168 = vector.shape_cast %167 : vector<1x128x128xbf16> to vector<128x128xbf16>
    %cst_160 = arith.constant dense<0.000000e+00> : vector<2x128xf32>
    %169 = tpu.matmul %166, %168, %cst_160 {dimension_numbers = #tpu.dot_dimension_numbers<[1], [0], [0], [1], [0, 0, 1, 1], [], []>} : vector<2x128xbf16>, vector<128x128xbf16>, vector<2x128xf32> -> vector<2x128xf32>
    %170 = arith.addf %164, %169 : vector<2x128xf32>
    %c5 = arith.constant 5 : index
    %c0_161 = arith.constant 0 : index
    %171 = tpu.strided_load %arg15[%c5, %c0_161] {strides = array<i32: 24, 1>} : memref<48x128xf32, #tpu.memory_space<vmem>>, vector<2x128xf32>
    %172 = arith.truncf %171 : vector<2x128xf32> to vector<2x128xbf16>
    %c5_162 = arith.constant 5 : index
    %c0_163 = arith.constant 0 : index
    %c0_164 = arith.constant 0 : index
    %173 = vector.load %arg8[%c5_162, %c0_163, %c0_164] : memref<24x128x128xbf16, #tpu.memory_space<vmem>>, vector<1x128x128xbf16>
    %174 = vector.shape_cast %173 : vector<1x128x128xbf16> to vector<128x128xbf16>
    %cst_165 = arith.constant dense<0.000000e+00> : vector<2x128xf32>
    %175 = tpu.matmul %172, %174, %cst_165 {dimension_numbers = #tpu.dot_dimension_numbers<[1], [0], [0], [1], [0, 0, 1, 1], [], []>} : vector<2x128xbf16>, vector<128x128xbf16>, vector<2x128xf32> -> vector<2x128xf32>
    %176 = arith.addf %170, %175 : vector<2x128xf32>
    %c6 = arith.constant 6 : index
    %c0_166 = arith.constant 0 : index
    %177 = tpu.strided_load %arg15[%c6, %c0_166] {strides = array<i32: 24, 1>} : memref<48x128xf32, #tpu.memory_space<vmem>>, vector<2x128xf32>
    %178 = arith.truncf %177 : vector<2x128xf32> to vector<2x128xbf16>
    %c6_167 = arith.constant 6 : index
    %c0_168 = arith.constant 0 : index
    %c0_169 = arith.constant 0 : index
    %179 = vector.load %arg8[%c6_167, %c0_168, %c0_169] : memref<24x128x128xbf16, #tpu.memory_space<vmem>>, vector<1x128x128xbf16>
    %180 = vector.shape_cast %179 : vector<1x128x128xbf16> to vector<128x128xbf16>
    %cst_170 = arith.constant dense<0.000000e+00> : vector<2x128xf32>
    %181 = tpu.matmul %178, %180, %cst_170 {dimension_numbers = #tpu.dot_dimension_numbers<[1], [0], [0], [1], [0, 0, 1, 1], [], []>} : vector<2x128xbf16>, vector<128x128xbf16>, vector<2x128xf32> -> vector<2x128xf32>
    %182 = arith.addf %176, %181 : vector<2x128xf32>
    %c7 = arith.constant 7 : index
    %c0_171 = arith.constant 0 : index
    %183 = tpu.strided_load %arg15[%c7, %c0_171] {strides = array<i32: 24, 1>} : memref<48x128xf32, #tpu.memory_space<vmem>>, vector<2x128xf32>
    %184 = arith.truncf %183 : vector<2x128xf32> to vector<2x128xbf16>
    %c7_172 = arith.constant 7 : index
    %c0_173 = arith.constant 0 : index
    %c0_174 = arith.constant 0 : index
    %185 = vector.load %arg8[%c7_172, %c0_173, %c0_174] : memref<24x128x128xbf16, #tpu.memory_space<vmem>>, vector<1x128x128xbf16>
    %186 = vector.shape_cast %185 : vector<1x128x128xbf16> to vector<128x128xbf16>
    %cst_175 = arith.constant dense<0.000000e+00> : vector<2x128xf32>
    %187 = tpu.matmul %184, %186, %cst_175 {dimension_numbers = #tpu.dot_dimension_numbers<[1], [0], [0], [1], [0, 0, 1, 1], [], []>} : vector<2x128xbf16>, vector<128x128xbf16>, vector<2x128xf32> -> vector<2x128xf32>
    %188 = arith.addf %182, %187 : vector<2x128xf32>
    %c8 = arith.constant 8 : index
    %c0_176 = arith.constant 0 : index
    %189 = tpu.strided_load %arg15[%c8, %c0_176] {strides = array<i32: 24, 1>} : memref<48x128xf32, #tpu.memory_space<vmem>>, vector<2x128xf32>
    %190 = arith.truncf %189 : vector<2x128xf32> to vector<2x128xbf16>
    %c8_177 = arith.constant 8 : index
    %c0_178 = arith.constant 0 : index
    %c0_179 = arith.constant 0 : index
    %191 = vector.load %arg8[%c8_177, %c0_178, %c0_179] : memref<24x128x128xbf16, #tpu.memory_space<vmem>>, vector<1x128x128xbf16>
    %192 = vector.shape_cast %191 : vector<1x128x128xbf16> to vector<128x128xbf16>
    %cst_180 = arith.constant dense<0.000000e+00> : vector<2x128xf32>
    %193 = tpu.matmul %190, %192, %cst_180 {dimension_numbers = #tpu.dot_dimension_numbers<[1], [0], [0], [1], [0, 0, 1, 1], [], []>} : vector<2x128xbf16>, vector<128x128xbf16>, vector<2x128xf32> -> vector<2x128xf32>
    %194 = arith.addf %188, %193 : vector<2x128xf32>
    %c9 = arith.constant 9 : index
    %c0_181 = arith.constant 0 : index
    %195 = tpu.strided_load %arg15[%c9, %c0_181] {strides = array<i32: 24, 1>} : memref<48x128xf32, #tpu.memory_space<vmem>>, vector<2x128xf32>
    %196 = arith.truncf %195 : vector<2x128xf32> to vector<2x128xbf16>
    %c9_182 = arith.constant 9 : index
    %c0_183 = arith.constant 0 : index
    %c0_184 = arith.constant 0 : index
    %197 = vector.load %arg8[%c9_182, %c0_183, %c0_184] : memref<24x128x128xbf16, #tpu.memory_space<vmem>>, vector<1x128x128xbf16>
    %198 = vector.shape_cast %197 : vector<1x128x128xbf16> to vector<128x128xbf16>
    %cst_185 = arith.constant dense<0.000000e+00> : vector<2x128xf32>
    %199 = tpu.matmul %196, %198, %cst_185 {dimension_numbers = #tpu.dot_dimension_numbers<[1], [0], [0], [1], [0, 0, 1, 1], [], []>} : vector<2x128xbf16>, vector<128x128xbf16>, vector<2x128xf32> -> vector<2x128xf32>
    %200 = arith.addf %194, %199 : vector<2x128xf32>
    %c10 = arith.constant 10 : index
    %c0_186 = arith.constant 0 : index
    %201 = tpu.strided_load %arg15[%c10, %c0_186] {strides = array<i32: 24, 1>} : memref<48x128xf32, #tpu.memory_space<vmem>>, vector<2x128xf32>
    %202 = arith.truncf %201 : vector<2x128xf32> to vector<2x128xbf16>
    %c10_187 = arith.constant 10 : index
    %c0_188 = arith.constant 0 : index
    %c0_189 = arith.constant 0 : index
    %203 = vector.load %arg8[%c10_187, %c0_188, %c0_189] : memref<24x128x128xbf16, #tpu.memory_space<vmem>>, vector<1x128x128xbf16>
    %204 = vector.shape_cast %203 : vector<1x128x128xbf16> to vector<128x128xbf16>
    %cst_190 = arith.constant dense<0.000000e+00> : vector<2x128xf32>
    %205 = tpu.matmul %202, %204, %cst_190 {dimension_numbers = #tpu.dot_dimension_numbers<[1], [0], [0], [1], [0, 0, 1, 1], [], []>} : vector<2x128xbf16>, vector<128x128xbf16>, vector<2x128xf32> -> vector<2x128xf32>
    %206 = arith.addf %200, %205 : vector<2x128xf32>
    %c11 = arith.constant 11 : index
    %c0_191 = arith.constant 0 : index
    %207 = tpu.strided_load %arg15[%c11, %c0_191] {strides = array<i32: 24, 1>} : memref<48x128xf32, #tpu.memory_space<vmem>>, vector<2x128xf32>
    %208 = arith.truncf %207 : vector<2x128xf32> to vector<2x128xbf16>
    %c11_192 = arith.constant 11 : index
    %c0_193 = arith.constant 0 : index
    %c0_194 = arith.constant 0 : index
    %209 = vector.load %arg8[%c11_192, %c0_193, %c0_194] : memref<24x128x128xbf16, #tpu.memory_space<vmem>>, vector<1x128x128xbf16>
    %210 = vector.shape_cast %209 : vector<1x128x128xbf16> to vector<128x128xbf16>
    %cst_195 = arith.constant dense<0.000000e+00> : vector<2x128xf32>
    %211 = tpu.matmul %208, %210, %cst_195 {dimension_numbers = #tpu.dot_dimension_numbers<[1], [0], [0], [1], [0, 0, 1, 1], [], []>} : vector<2x128xbf16>, vector<128x128xbf16>, vector<2x128xf32> -> vector<2x128xf32>
    %212 = arith.addf %206, %211 : vector<2x128xf32>
    %c12 = arith.constant 12 : index
    %c0_196 = arith.constant 0 : index
    %213 = tpu.strided_load %arg15[%c12, %c0_196] {strides = array<i32: 24, 1>} : memref<48x128xf32, #tpu.memory_space<vmem>>, vector<2x128xf32>
    %214 = arith.truncf %213 : vector<2x128xf32> to vector<2x128xbf16>
    %c12_197 = arith.constant 12 : index
    %c0_198 = arith.constant 0 : index
    %c0_199 = arith.constant 0 : index
    %215 = vector.load %arg8[%c12_197, %c0_198, %c0_199] : memref<24x128x128xbf16, #tpu.memory_space<vmem>>, vector<1x128x128xbf16>
    %216 = vector.shape_cast %215 : vector<1x128x128xbf16> to vector<128x128xbf16>
    %cst_200 = arith.constant dense<0.000000e+00> : vector<2x128xf32>
    %217 = tpu.matmul %214, %216, %cst_200 {dimension_numbers = #tpu.dot_dimension_numbers<[1], [0], [0], [1], [0, 0, 1, 1], [], []>} : vector<2x128xbf16>, vector<128x128xbf16>, vector<2x128xf32> -> vector<2x128xf32>
    %218 = arith.addf %212, %217 : vector<2x128xf32>
    %c13 = arith.constant 13 : index
    %c0_201 = arith.constant 0 : index
    %219 = tpu.strided_load %arg15[%c13, %c0_201] {strides = array<i32: 24, 1>} : memref<48x128xf32, #tpu.memory_space<vmem>>, vector<2x128xf32>
    %220 = arith.truncf %219 : vector<2x128xf32> to vector<2x128xbf16>
    %c13_202 = arith.constant 13 : index
    %c0_203 = arith.constant 0 : index
    %c0_204 = arith.constant 0 : index
    %221 = vector.load %arg8[%c13_202, %c0_203, %c0_204] : memref<24x128x128xbf16, #tpu.memory_space<vmem>>, vector<1x128x128xbf16>
    %222 = vector.shape_cast %221 : vector<1x128x128xbf16> to vector<128x128xbf16>
    %cst_205 = arith.constant dense<0.000000e+00> : vector<2x128xf32>
    %223 = tpu.matmul %220, %222, %cst_205 {dimension_numbers = #tpu.dot_dimension_numbers<[1], [0], [0], [1], [0, 0, 1, 1], [], []>} : vector<2x128xbf16>, vector<128x128xbf16>, vector<2x128xf32> -> vector<2x128xf32>
    %224 = arith.addf %218, %223 : vector<2x128xf32>
    %c14 = arith.constant 14 : index
    %c0_206 = arith.constant 0 : index
    %225 = tpu.strided_load %arg15[%c14, %c0_206] {strides = array<i32: 24, 1>} : memref<48x128xf32, #tpu.memory_space<vmem>>, vector<2x128xf32>
    %226 = arith.truncf %225 : vector<2x128xf32> to vector<2x128xbf16>
    %c14_207 = arith.constant 14 : index
    %c0_208 = arith.constant 0 : index
    %c0_209 = arith.constant 0 : index
    %227 = vector.load %arg8[%c14_207, %c0_208, %c0_209] : memref<24x128x128xbf16, #tpu.memory_space<vmem>>, vector<1x128x128xbf16>
    %228 = vector.shape_cast %227 : vector<1x128x128xbf16> to vector<128x128xbf16>
    %cst_210 = arith.constant dense<0.000000e+00> : vector<2x128xf32>
    %229 = tpu.matmul %226, %228, %cst_210 {dimension_numbers = #tpu.dot_dimension_numbers<[1], [0], [0], [1], [0, 0, 1, 1], [], []>} : vector<2x128xbf16>, vector<128x128xbf16>, vector<2x128xf32> -> vector<2x128xf32>
    %230 = arith.addf %224, %229 : vector<2x128xf32>
    %c15 = arith.constant 15 : index
    %c0_211 = arith.constant 0 : index
    %231 = tpu.strided_load %arg15[%c15, %c0_211] {strides = array<i32: 24, 1>} : memref<48x128xf32, #tpu.memory_space<vmem>>, vector<2x128xf32>
    %232 = arith.truncf %231 : vector<2x128xf32> to vector<2x128xbf16>
    %c15_212 = arith.constant 15 : index
    %c0_213 = arith.constant 0 : index
    %c0_214 = arith.constant 0 : index
    %233 = vector.load %arg8[%c15_212, %c0_213, %c0_214] : memref<24x128x128xbf16, #tpu.memory_space<vmem>>, vector<1x128x128xbf16>
    %234 = vector.shape_cast %233 : vector<1x128x128xbf16> to vector<128x128xbf16>
    %cst_215 = arith.constant dense<0.000000e+00> : vector<2x128xf32>
    %235 = tpu.matmul %232, %234, %cst_215 {dimension_numbers = #tpu.dot_dimension_numbers<[1], [0], [0], [1], [0, 0, 1, 1], [], []>} : vector<2x128xbf16>, vector<128x128xbf16>, vector<2x128xf32> -> vector<2x128xf32>
    %236 = arith.addf %230, %235 : vector<2x128xf32>
    %c16 = arith.constant 16 : index
    %c0_216 = arith.constant 0 : index
    %237 = tpu.strided_load %arg15[%c16, %c0_216] {strides = array<i32: 24, 1>} : memref<48x128xf32, #tpu.memory_space<vmem>>, vector<2x128xf32>
    %238 = arith.truncf %237 : vector<2x128xf32> to vector<2x128xbf16>
    %c16_217 = arith.constant 16 : index
    %c0_218 = arith.constant 0 : index
    %c0_219 = arith.constant 0 : index
    %239 = vector.load %arg8[%c16_217, %c0_218, %c0_219] : memref<24x128x128xbf16, #tpu.memory_space<vmem>>, vector<1x128x128xbf16>
    %240 = vector.shape_cast %239 : vector<1x128x128xbf16> to vector<128x128xbf16>
    %cst_220 = arith.constant dense<0.000000e+00> : vector<2x128xf32>
    %241 = tpu.matmul %238, %240, %cst_220 {dimension_numbers = #tpu.dot_dimension_numbers<[1], [0], [0], [1], [0, 0, 1, 1], [], []>} : vector<2x128xbf16>, vector<128x128xbf16>, vector<2x128xf32> -> vector<2x128xf32>
    %242 = arith.addf %236, %241 : vector<2x128xf32>
    %c17 = arith.constant 17 : index
    %c0_221 = arith.constant 0 : index
    %243 = tpu.strided_load %arg15[%c17, %c0_221] {strides = array<i32: 24, 1>} : memref<48x128xf32, #tpu.memory_space<vmem>>, vector<2x128xf32>
    %244 = arith.truncf %243 : vector<2x128xf32> to vector<2x128xbf16>
    %c17_222 = arith.constant 17 : index
    %c0_223 = arith.constant 0 : index
    %c0_224 = arith.constant 0 : index
    %245 = vector.load %arg8[%c17_222, %c0_223, %c0_224] : memref<24x128x128xbf16, #tpu.memory_space<vmem>>, vector<1x128x128xbf16>
    %246 = vector.shape_cast %245 : vector<1x128x128xbf16> to vector<128x128xbf16>
    %cst_225 = arith.constant dense<0.000000e+00> : vector<2x128xf32>
    %247 = tpu.matmul %244, %246, %cst_225 {dimension_numbers = #tpu.dot_dimension_numbers<[1], [0], [0], [1], [0, 0, 1, 1], [], []>} : vector<2x128xbf16>, vector<128x128xbf16>, vector<2x128xf32> -> vector<2x128xf32>
    %248 = arith.addf %242, %247 : vector<2x128xf32>
    %c18 = arith.constant 18 : index
    %c0_226 = arith.constant 0 : index
    %249 = tpu.strided_load %arg15[%c18, %c0_226] {strides = array<i32: 24, 1>} : memref<48x128xf32, #tpu.memory_space<vmem>>, vector<2x128xf32>
    %250 = arith.truncf %249 : vector<2x128xf32> to vector<2x128xbf16>
    %c18_227 = arith.constant 18 : index
    %c0_228 = arith.constant 0 : index
    %c0_229 = arith.constant 0 : index
    %251 = vector.load %arg8[%c18_227, %c0_228, %c0_229] : memref<24x128x128xbf16, #tpu.memory_space<vmem>>, vector<1x128x128xbf16>
    %252 = vector.shape_cast %251 : vector<1x128x128xbf16> to vector<128x128xbf16>
    %cst_230 = arith.constant dense<0.000000e+00> : vector<2x128xf32>
    %253 = tpu.matmul %250, %252, %cst_230 {dimension_numbers = #tpu.dot_dimension_numbers<[1], [0], [0], [1], [0, 0, 1, 1], [], []>} : vector<2x128xbf16>, vector<128x128xbf16>, vector<2x128xf32> -> vector<2x128xf32>
    %254 = arith.addf %248, %253 : vector<2x128xf32>
    %c19 = arith.constant 19 : index
    %c0_231 = arith.constant 0 : index
    %255 = tpu.strided_load %arg15[%c19, %c0_231] {strides = array<i32: 24, 1>} : memref<48x128xf32, #tpu.memory_space<vmem>>, vector<2x128xf32>
    %256 = arith.truncf %255 : vector<2x128xf32> to vector<2x128xbf16>
    %c19_232 = arith.constant 19 : index
    %c0_233 = arith.constant 0 : index
    %c0_234 = arith.constant 0 : index
    %257 = vector.load %arg8[%c19_232, %c0_233, %c0_234] : memref<24x128x128xbf16, #tpu.memory_space<vmem>>, vector<1x128x128xbf16>
    %258 = vector.shape_cast %257 : vector<1x128x128xbf16> to vector<128x128xbf16>
    %cst_235 = arith.constant dense<0.000000e+00> : vector<2x128xf32>
    %259 = tpu.matmul %256, %258, %cst_235 {dimension_numbers = #tpu.dot_dimension_numbers<[1], [0], [0], [1], [0, 0, 1, 1], [], []>} : vector<2x128xbf16>, vector<128x128xbf16>, vector<2x128xf32> -> vector<2x128xf32>
    %260 = arith.addf %254, %259 : vector<2x128xf32>
    %c20 = arith.constant 20 : index
    %c0_236 = arith.constant 0 : index
    %261 = tpu.strided_load %arg15[%c20, %c0_236] {strides = array<i32: 24, 1>} : memref<48x128xf32, #tpu.memory_space<vmem>>, vector<2x128xf32>
    %262 = arith.truncf %261 : vector<2x128xf32> to vector<2x128xbf16>
    %c20_237 = arith.constant 20 : index
    %c0_238 = arith.constant 0 : index
    %c0_239 = arith.constant 0 : index
    %263 = vector.load %arg8[%c20_237, %c0_238, %c0_239] : memref<24x128x128xbf16, #tpu.memory_space<vmem>>, vector<1x128x128xbf16>
    %264 = vector.shape_cast %263 : vector<1x128x128xbf16> to vector<128x128xbf16>
    %cst_240 = arith.constant dense<0.000000e+00> : vector<2x128xf32>
    %265 = tpu.matmul %262, %264, %cst_240 {dimension_numbers = #tpu.dot_dimension_numbers<[1], [0], [0], [1], [0, 0, 1, 1], [], []>} : vector<2x128xbf16>, vector<128x128xbf16>, vector<2x128xf32> -> vector<2x128xf32>
    %266 = arith.addf %260, %265 : vector<2x128xf32>
    %c21 = arith.constant 21 : index
    %c0_241 = arith.constant 0 : index
    %267 = tpu.strided_load %arg15[%c21, %c0_241] {strides = array<i32: 24, 1>} : memref<48x128xf32, #tpu.memory_space<vmem>>, vector<2x128xf32>
    %268 = arith.truncf %267 : vector<2x128xf32> to vector<2x128xbf16>
    %c21_242 = arith.constant 21 : index
    %c0_243 = arith.constant 0 : index
    %c0_244 = arith.constant 0 : index
    %269 = vector.load %arg8[%c21_242, %c0_243, %c0_244] : memref<24x128x128xbf16, #tpu.memory_space<vmem>>, vector<1x128x128xbf16>
    %270 = vector.shape_cast %269 : vector<1x128x128xbf16> to vector<128x128xbf16>
    %cst_245 = arith.constant dense<0.000000e+00> : vector<2x128xf32>
    %271 = tpu.matmul %268, %270, %cst_245 {dimension_numbers = #tpu.dot_dimension_numbers<[1], [0], [0], [1], [0, 0, 1, 1], [], []>} : vector<2x128xbf16>, vector<128x128xbf16>, vector<2x128xf32> -> vector<2x128xf32>
    %272 = arith.addf %266, %271 : vector<2x128xf32>
    %c22 = arith.constant 22 : index
    %c0_246 = arith.constant 0 : index
    %273 = tpu.strided_load %arg15[%c22, %c0_246] {strides = array<i32: 24, 1>} : memref<48x128xf32, #tpu.memory_space<vmem>>, vector<2x128xf32>
    %274 = arith.truncf %273 : vector<2x128xf32> to vector<2x128xbf16>
    %c22_247 = arith.constant 22 : index
    %c0_248 = arith.constant 0 : index
    %c0_249 = arith.constant 0 : index
    %275 = vector.load %arg8[%c22_247, %c0_248, %c0_249] : memref<24x128x128xbf16, #tpu.memory_space<vmem>>, vector<1x128x128xbf16>
    %276 = vector.shape_cast %275 : vector<1x128x128xbf16> to vector<128x128xbf16>
    %cst_250 = arith.constant dense<0.000000e+00> : vector<2x128xf32>
    %277 = tpu.matmul %274, %276, %cst_250 {dimension_numbers = #tpu.dot_dimension_numbers<[1], [0], [0], [1], [0, 0, 1, 1], [], []>} : vector<2x128xbf16>, vector<128x128xbf16>, vector<2x128xf32> -> vector<2x128xf32>
    %278 = arith.addf %272, %277 : vector<2x128xf32>
    %c23 = arith.constant 23 : index
    %c0_251 = arith.constant 0 : index
    %279 = tpu.strided_load %arg15[%c23, %c0_251] {strides = array<i32: 24, 1>} : memref<48x128xf32, #tpu.memory_space<vmem>>, vector<2x128xf32>
    %280 = arith.truncf %279 : vector<2x128xf32> to vector<2x128xbf16>
    %c23_252 = arith.constant 23 : index
    %c0_253 = arith.constant 0 : index
    %c0_254 = arith.constant 0 : index
    %281 = vector.load %arg8[%c23_252, %c0_253, %c0_254] : memref<24x128x128xbf16, #tpu.memory_space<vmem>>, vector<1x128x128xbf16>
    %282 = vector.shape_cast %281 : vector<1x128x128xbf16> to vector<128x128xbf16>
    %cst_255 = arith.constant dense<0.000000e+00> : vector<2x128xf32>
    %283 = tpu.matmul %280, %282, %cst_255 {dimension_numbers = #tpu.dot_dimension_numbers<[1], [0], [0], [1], [0, 0, 1, 1], [], []>} : vector<2x128xbf16>, vector<128x128xbf16>, vector<2x128xf32> -> vector<2x128xf32>
    %284 = arith.addf %278, %283 : vector<2x128xf32>
    %c0_256 = arith.constant 0 : index
    %c0_257 = arith.constant 0 : index
    %285 = vector.load %arg9[%c0_256, %c0_257] : memref<1x128xf32, #tpu.memory_space<vmem>>, vector<1x128xf32>
    %286 = vector.broadcast %285 : vector<1x128xf32> to vector<2x128xf32>
    %287 = arith.addf %284, %286 : vector<2x128xf32>
    %cst_258 = arith.constant 0.000000e+00 : f32
    %288 = vector.broadcast %cst_258 : f32 to vector<2x128xf32>
    %289 = arith.maximumf %287, %288 : vector<2x128xf32>
    %290 = arith.truncf %289 : vector<2x128xf32> to vector<2x128xbf16>
    %c0_259 = arith.constant 0 : index
    %c0_260 = arith.constant 0 : index
    %291 = vector.load %arg10[%c0_259, %c0_260] : memref<128x128xbf16, #tpu.memory_space<vmem>>, vector<128x128xbf16>
    %cst_261 = arith.constant dense<0.000000e+00> : vector<2x128xf32>
    %292 = tpu.matmul %290, %291, %cst_261 {dimension_numbers = #tpu.dot_dimension_numbers<[1], [0], [0], [1], [0, 0, 1, 1], [], []>} : vector<2x128xbf16>, vector<128x128xbf16>, vector<2x128xf32> -> vector<2x128xf32>
    %c0_262 = arith.constant 0 : index
    %c0_263 = arith.constant 0 : index
    %293 = vector.load %arg11[%c0_262, %c0_263] : memref<1x128xf32, #tpu.memory_space<vmem>>, vector<1x128xf32>
    %294 = vector.broadcast %293 : vector<1x128xf32> to vector<2x128xf32>
    %295 = arith.addf %292, %294 : vector<2x128xf32>
    %c0_264 = arith.constant 0 : index
    %c0_265 = arith.constant 0 : index
    %296 = vector.load %arg12[%c0_264, %c0_265] : memref<2x128xf32, #tpu.memory_space<vmem>>, vector<2x128xf32>
    tpu.vector_store %arg12[%c0_264, %c0_265], %295 {strides = array<i32>} : memref<2x128xf32, #tpu.memory_space<vmem>>, vector<2x128xf32>,
    return
  }
  func.func @transform_0(%arg0: i32) -> (i32, i32) {
    %c0_i32 = arith.constant 0 : i32
    %c0_i32_0 = arith.constant 0 : i32
    %c0_i32_1 = arith.constant 0 : i32
    return %c0_i32, %c0_i32_0 : i32, i32
  }
  func.func @transform_1(%arg0: i32) -> (i32, i32, i32) {
    %c0_i32 = arith.constant 0 : i32
    %c0_i32_0 = arith.constant 0 : i32
    %c0_i32_1 = arith.constant 0 : i32
    %c0_i32_2 = arith.constant 0 : i32
    return %c0_i32, %c0_i32_0, %c0_i32_1 : i32, i32, i32
  }
  func.func @transform_2(%arg0: i32) -> (i32, i32) {
    %c0_i32 = arith.constant 0 : i32
    %c0_i32_0 = arith.constant 0 : i32
    %c0_i32_1 = arith.constant 0 : i32
    return %c0_i32, %c0_i32_0 : i32, i32
  }
  func.func @transform_3(%arg0: i32) -> (i32, i32, i32) {
    %c0_i32 = arith.constant 0 : i32
    %c0_i32_0 = arith.constant 0 : i32
    %c0_i32_1 = arith.constant 0 : i32
    %c0_i32_2 = arith.constant 0 : i32
    return %c0_i32, %c0_i32_0, %c0_i32_1 : i32, i32, i32
  }
  func.func @transform_4(%arg0: i32) -> (i32, i32) {
    %c0_i32 = arith.constant 0 : i32
    %c0_i32_0 = arith.constant 0 : i32
    %c0_i32_1 = arith.constant 0 : i32
    return %c0_i32, %c0_i32_0 : i32, i32
  }
  func.func @transform_5(%arg0: i32) -> (i32, i32, i32) {
    %c0_i32 = arith.constant 0 : i32
    %c0_i32_0 = arith.constant 0 : i32
    %c0_i32_1 = arith.constant 0 : i32
    %c0_i32_2 = arith.constant 0 : i32
    return %c0_i32, %c0_i32_0, %c0_i32_1 : i32, i32, i32
  }
  func.func @transform_6(%arg0: i32) -> (i32, i32) {
    %c0_i32 = arith.constant 0 : i32
    %c0_i32_0 = arith.constant 0 : i32
    %c0_i32_1 = arith.constant 0 : i32
    return %c0_i32, %c0_i32_0 : i32, i32
  }
  func.func @transform_7(%arg0: i32) -> (i32, i32, i32) {
    %c0_i32 = arith.constant 0 : i32
    %c0_i32_0 = arith.constant 0 : i32
    %c0_i32_1 = arith.constant 0 : i32
    %c0_i32_2 = arith.constant 0 : i32
    return %c0_i32, %c0_i32_0, %c0_i32_1 : i32, i32, i32
  }
  func.func @transform_8(%arg0: i32) -> (i32, i32) {
    %c0_i32 = arith.constant 0 : i32
    %c0_i32_0 = arith.constant 0 : i32
    %c0_i32_1 = arith.constant 0 : i32
    return %c0_i32, %c0_i32_0 : i32, i32
  }
  func.func @transform_9(%arg0: i32) -> (i32, i32) {
    %c0_i32 = arith.constant 0 : i32
    %c0_i32_0 = arith.constant 0 : i32
    %c0_i32_1 = arith.constant 0 : i32
    return %c0_i32, %c0_i32_0 : i32, i32
  }
  func.func @transform_10(%arg0: i32) -> (i32, i32) {
    %c0_i32 = arith.constant 0 : i32
    %c0_i32_0 = arith.constant 0 : i32
    %c0_i32_1 = arith.constant 0 : i32
    return %c0_i32, %c0_i32_0 : i32, i32
  }
  func.func @transform_11(%arg0: i32) -> (i32, i32) {
    %c0_i32 = arith.constant 0 : i32
    %c0_i32_0 = arith.constant 0 : i32
    %c0_i32_1 = arith.constant 0 : i32
    return %c0_i32, %c0_i32_0 : i32, i32
  }
}

</mosaic_0001>

<bundles_post_ra>
// kernel: _forward.1
= control target key start
LH: loop header
LB: loop body
LE: loop exit
PB: predicated region body
PF: predicated region fallthrough
CT: control target
= control target key end

     0   :  { %16 = vsyncpa [#allocation6], 0  ;;  %s9094_s0 = inlined_call_operand.vmem [shape: f32[192,128], index: 0, kind: input, shape index: {}]   ;;  %s9095_s1 = inlined_call_operand.vmem [shape: bf16[3,128,128], index: 1, kind: input, shape index: {}]   ;;  %s9096_s2 = inlined_call_operand.vmem [shape: f32[1,128], index: 2, kind: input, shape index: {}]   ;;  %s9097_s3 = inlined_call_operand.vmem [shape: bf16[3,128,128], index: 3, kind: input, shape index: {}]   ;;  %s9098_s4 = inlined_call_operand.vmem [shape: f32[1,128], index: 4, kind: input, shape index: {}]   ;;  %s9099_s5 = inlined_call_operand.vmem [shape: bf16[3,128,128], index: 5, kind: input, shape index: {}]   ;;  %s9100_s6 = inlined_call_operand.vmem [shape: f32[1,128], index: 6, kind: input, shape index: {}]   ;;  %s9101_s7 = inlined_call_operand.hbm [shape: bf16[24,128,128], index: 7, kind: input, shape index: {}]   ;;  %s9102_s8 = inlined_call_operand.vmem [shape: f32[1,128], index: 8, kind: input, shape index: {}]   ;;  %s9103_s9 = inlined_call_operand.vmem [shape: bf16[128,128], index: 9, kind: input, shape index: {}]   ;;  %s9104_s10 = inlined_call_operand.vmem [shape: f32[1,128], index: 10, kind: input, shape index: {}]   ;;  %s9105_s11 = inlined_call_operand.hbm [shape: f32[2,128], index: 11, kind: output, shape index: {}]  }
   0x1   :  { %17 = vsyncpa [#allocation7], 0  ;;  %s7899_s17 = smov [#allocation5]  }
   0x2   :  { %s37_s18 = sshll.u32 %s7899_s17, 4  ;;  %s38_s18 = int_to_ptr.vmem [resolvable:$true] %s37_s18 }
   0x3   :  { %s7863_s19 = scalar_lea.vmem %s38_s18, 24576  ;;  %p7868_p1 = scmp.lt.s32.totalorder %s38_s18, %s38_s18 }
   0x4   :  { %p7864_p0 = scmp.ne.s32.totalorder %s38_s18, %s7863_s19  ;;  %p7869_p2 = scmp.lt.s32.totalorder %s7863_s19, %s7863_s19 }
   0x6   :  { %p7870_p3 = por %p7869_p2, %p7868_p1 }
   0x8   :  { %p7871_p4 = pnand %p7870_p3, %p7864_p0 }
   0xa   :  { %7874 = shalt.err (!%p7871_p4)
}
   0xb   :  { %s7900_s20 = smov 64   ;;  %s7901_s21 = smov 4  }
   0xc   :  { %43 = dma.hbm_to_vmem [thread:$0]  %s9101_s7, 24576, %s38_s18, [#allocation6], %s7900_s20, %s7900_s20, %s7901_s21  }
   0xd   :  { %7895 = dma.done.wait [#allocation6], 24576  }
   0xe   :  { %7896 = vsyncadd [#allocation6], 4294942720  ;;  %v7509_v0 = vld [vmem:[%s9095_s1 + $0x78] sm:$0xff]   ;;  %v7511_v2 = vld [vmem:[%s9095_s1 + $0x70] sm:$0xff]   ;;  %vm7903_vm0 = vmmov 0   ;;  %s7904_s24 = smov [#allocation8]  }
   0xf   :  { %v7510_v1 = vld [vmem:[%s9095_s1 + $0x38] sm:$0xff]   ;;  %6547 = vmatprep.subr.bf16.mxu0 %v7509_v0  ;;  %v7512_v3 = vld [vmem:[%s9095_s1 + $0x30] sm:$0xff]   ;;  %v7513_v4 = vld [vmem:[%s9095_s1 + $0x68] sm:$0xff]   ;;  %s5559_s25 = sshll.u32 %s7904_s24, 4  ;;  %s5560_s25 = int_to_ptr.vmem [resolvable:$true] %s5559_s25 }
  0x10   :  { %6575 = vmatprep.subr.bf16.mxu1 %v7510_v1  ;;  %6548 = vmatpush3.bf16.msra.mxu0 %v7509_v0  ;;  %v7514_v5 = vld [vmem:[%s9095_s1 + $0x28] sm:$0xff]   ;;  %v7515_v6 = vld [vmem:[%s9095_s1 + $0x60] sm:$0xff]   ;;  %v7517_v8 = vld [vmem:[%s9095_s1 + $0x58] sm:$0xff]   ;;  %p7880_p6 = scmp.lt.s32.totalorder %s5560_s25, %s5560_s25 }
  0x11   :  { %6576 = vmatpush3.bf16.msra.mxu1 %v7510_v1  ;;  %6549 = vmatprep.subr.bf16.mxu0 %v7511_v2  ;;  %v7516_v7 = vld [vmem:[%s9095_s1 + $0x20] sm:$0xff]   ;;  %v7518_v9 = vld [vmem:[%s9095_s1 + $0x18] sm:$0xff]   ;;  %v7519_v10 = vld [vmem:[%s9095_s1 + $0x50] sm:$0xff]  }
  0x12   :  { %6577 = vmatprep.subr.bf16.mxu1 %v7512_v3  ;;  %v125_v11 = vld [vmem:[%s9094_s0 + $0x1] sm:$0xff]  ;;  %v126_v12 = vld [vmem:[%s9094_s0 + $0x9] sm:$0xff]  ;;  %v127_v22 = vld [vmem:[%s9094_s0 + $0x11] sm:$0xff] }
  0x13   :  { %v91_v13 = vld [vmem:[%s9094_s0] sm:$0xff]  ;;  %v7520_v14 = vld [vmem:[%s9095_s1 + $0x10] sm:$0xff]   ;;  %v137_v15 = vpack.c.bf16 %v126_v12, %v125_v11  ;;  %v92_v16 = vld [vmem:[%s9094_s0 + $0x8] sm:$0xff] }
  0x14   :  { %6550 = vmatpush3.bf16.msra.mxu0 %v7511_v2  ;;  %v103_v17 = vpack.c.bf16 %v92_v16, %v91_v13  ;;  %v7521_v18 = vld [vmem:[%s9095_s1 + $0x48] sm:$0xff]   ;;  %v7523_v20 = vld [vmem:[%s9095_s1 + $0x40] sm:$0xff]   ;;  %v93_v24 = vld [vmem:[%s9094_s0 + $0x10] sm:$0xff] }
  0x15   :  { %6578 = vmatpush3.bf16.msra.mxu1 %v7512_v3  ;;  %6551 = vmatprep.subr.bf16.mxu0 %v7513_v4  ;;  %v7522_v19 = vld [vmem:[%s9095_s1 + $0x8] sm:$0xff]   ;;  %v7524_v21 = vld [vmem:[%s9095_s1] sm:$0xff]   ;;  %v94_v25 = vld [vmem:[%s9094_s0 + $0x18] sm:$0xff] }
  0x16   :  { %6579 = vmatprep.subr.bf16.mxu1 %v7514_v5  ;;  %6563 = vmatprep.mubr.bf16.mxu0 %v137_v15  ;;  %v128_v23 = vld [vmem:[%s9094_s0 + $0x19] sm:$0xff]  ;;  %v129_v27 = vld [vmem:[%s9094_s0 + $0x21] sm:$0xff]  ;;  %v130_v28 = vld [vmem:[%s9094_s0 + $0x29] sm:$0xff]  ;;  %v104_v32 = vpack.c.bf16 %v94_v25, %v93_v24  ;;  %v7902_v15 = vmov 0.0  }
  0x17   :  { %6591 = vmatprep.mubr.bf16.mxu1 %v103_v17  ;;  %v7525_v26 = vld [vmem:[%s9095_s1 + $0xb8] sm:$0xff]   ;;  %v95_v29 = vld [vmem:[%s9094_s0 + $0x20] sm:$0xff]  ;;  %v138_v30 = vpack.c.bf16 %v128_v23, %v127_v22  ;;  %v96_v31 = vld [vmem:[%s9094_s0 + $0x28] sm:$0xff]  ;;  %v139_v34 = vpack.c.bf16 %v130_v28, %v129_v27  ;;  %54 = vst [vmem:[#allocation2] sm:$0xff] %v7902_v15 }
  0x18   :  { %6552 = vmatpush3.bf16.msra.mxu0 %v7513_v4  ;;  %v7526_v33 = vld [vmem:[%s9095_s1 + $0xb0] sm:$0xff]   ;;  %v105_v35 = vpack.c.bf16 %v96_v31, %v95_v29  ;;  %v7527_v36 = vld [vmem:[%s9095_s1 + $0xa8] sm:$0xff]   ;;  %v132_v38 = vld [vmem:[%s9094_s0 + $0x39] sm:$0xff]  ;;  %55 = vst [vmem:[#allocation2 + $0x8] sm:$0xff] %v7902_v15 }
  0x19   :  { %6580 = vmatpush3.bf16.msra.mxu1 %v7514_v5  ;;  %6553 = vmatprep.subr.bf16.mxu0 %v7515_v6  ;;  %v131_v37 = vld [vmem:[%s9094_s0 + $0x31] sm:$0xff]  ;;  %v133_v41 = vld [vmem:[%s9094_s0 + $0x41] sm:$0xff]  ;;  %v134_v42 = vld [vmem:[%s9094_s0 + $0x49] sm:$0xff]  ;;  %56 = vst [vmem:[#allocation2 + $0x10] sm:$0xff] %v7902_v15 }
  0x1a   :  { %6581 = vmatprep.subr.bf16.mxu1 %v7516_v7  ;;  %v97_v39 = vld [vmem:[%s9094_s0 + $0x30] sm:$0xff]  ;;  %v98_v40 = vld [vmem:[%s9094_s0 + $0x38] sm:$0xff]  ;;  %v99_v43 = vld [vmem:[%s9094_s0 + $0x40] sm:$0xff]  ;;  %v140_v45 = vpack.c.bf16 %v132_v38, %v131_v37  ;;  %v141_v48 = vpack.c.bf16 %v134_v42, %v133_v41  ;;  %57 = vst [vmem:[#allocation2 + $0x18] sm:$0xff] %v7902_v15 }
  0x1b   :  { %v100_v44 = vld [vmem:[%s9094_s0 + $0x48] sm:$0xff]  ;;  %v7528_v46 = vld [vmem:[%s9095_s1 + $0xa0] sm:$0xff]   ;;  %v106_v47 = vpack.c.bf16 %v98_v40, %v97_v39  ;;  %v135_v50 = vld [vmem:[%s9094_s0 + $0x51] sm:$0xff]  ;;  %58 = vst [vmem:[#allocation2 + $0x20] sm:$0xff] %v7902_v15 }
  0x1c   :  { %6554 = vmatpush3.bf16.msra.mxu0 %v7515_v6  ;;  %v107_v49 = vpack.c.bf16 %v100_v44, %v99_v43  ;;  %v136_v51 = vld [vmem:[%s9094_s0 + $0x59] sm:$0x3f]  ;;  %v101_v53 = vld [vmem:[%s9094_s0 + $0x50] sm:$0xff]  ;;  %v418_v55 = vld [vmem:[%s9094_s0 + $0x2] sm:$0xff]  ;;  %59 = vst [vmem:[#allocation2 + $0x28] sm:$0xff] %v7902_v15 }
  0x1d   :  { %6582 = vmatpush3.bf16.msra.mxu1 %v7516_v7  ;;  %6555 = vmatprep.subr.bf16.mxu0 %v7517_v8  ;;  %v7529_v52 = vld [vmem:[%s9095_s1 + $0x98] sm:$0xff]   ;;  %v419_v56 = vld [vmem:[%s9094_s0 + $0xa] sm:$0xff]  ;;  %v142_v57 = vpack.c.bf16 %v136_v51, %v135_v50  ;;  %v7532_v62 = vld [vmem:[%s9095_s1 + $0x80] sm:$0xff]   ;;  %60 = vst [vmem:[#allocation2 + $0x30] sm:$0xff] %v7902_v15 }
  0x1e   :  { %6583 = vmatprep.subr.bf16.mxu1 %v7518_v9  ;;  %v102_v54 = vld [vmem:[%s9094_s0 + $0x58] sm:$0x3f]  ;;  %v7530_v58 = vld [vmem:[%s9095_s1 + $0x90] sm:$0xff]   ;;  %v430_v60 = vpack.c.bf16 %v419_v56, %v418_v55  ;;  %v7531_v61 = vld [vmem:[%s9095_s1 + $0x88] sm:$0xff]   ;;  %61 = vst [vmem:[#allocation2 + $0x38] sm:$0xff] %v7902_v15 }
  0x1f   :  { %v108_v59 = vpack.c.bf16 %v102_v54, %v101_v53  ;;  %v420_v63 = vld [vmem:[%s9094_s0 + $0x12] sm:$0xff]  ;;  %v421_v0 = vld [vmem:[%s9094_s0 + $0x1a] sm:$0xff]  ;;  %v422_v1 = vld [vmem:[%s9094_s0 + $0x22] sm:$0xff]  ;;  %62 = vst [vmem:[#allocation2 + $0x40] sm:$0xff] %v7902_v15 }
  0x20   :  { %6556 = vmatpush3.bf16.msra.mxu0 %v7517_v8  ;;  %v423_v2 = vld [vmem:[%s9094_s0 + $0x2a] sm:$0xff]  ;;  %v431_v3 = vpack.c.bf16 %v421_v0, %v420_v63  ;;  %v424_v5 = vld [vmem:[%s9094_s0 + $0x32] sm:$0xff]  ;;  %v425_v6 = vld [vmem:[%s9094_s0 + $0x3a] sm:$0xff]  ;;  %63 = vst [vmem:[#allocation2 + $0x48] sm:$0xff] %v7902_v15 }
  0x21   :  { %6584 = vmatpush3.bf16.msra.mxu1 %v7518_v9  ;;  %6557 = vmatprep.subr.bf16.mxu0 %v7519_v10  ;;  %v432_v4 = vpack.c.bf16 %v423_v2, %v422_v1  ;;  %v426_v7 = vld [vmem:[%s9094_s0 + $0x42] sm:$0xff]  ;;  %v427_v8 = vld [vmem:[%s9094_s0 + $0x4a] sm:$0xff]  ;;  %v433_v9 = vpack.c.bf16 %v425_v6, %v424_v5  ;;  %v428_v11 = vld [vmem:[%s9094_s0 + $0x52] sm:$0xff]  ;;  %64 = vst [vmem:[#allocation2 + $0x50] sm:$0xff] %v7902_v15 }
  0x22   :  { %6585 = vmatprep.subr.bf16.mxu1 %v7520_v14  ;;  %v429_v12 = vld [vmem:[%s9094_s0 + $0x5a] sm:$0x3f]  ;;  %65 = vst [vmem:[#allocation2 + $0x58] sm:$0xff] %v7902_v15  ;;  %66 = vst [vmem:[#allocation2 + $0x60] sm:$0xff] %v7902_v15  ;;  %v7535_v17 = vld [vmem:[%s9097_s3 + $0x70] sm:$0xff]  }
  0x23   :  { %v435_v13 = vpack.c.bf16 %v429_v12, %v428_v11  ;;  %67 = vst [vmem:[#allocation2 + $0x68] sm:$0xff] %v7902_v15  ;;  %68 = vst [vmem:[#allocation2 + $0x70] sm:$0xff] %v7902_v15  ;;  %v7534_v16 = vld [vmem:[%s9097_s3 + $0x38] sm:$0xff]   ;;  %v7540_v22 = vld [vmem:[%s9097_s3 + $0x20] sm:$0xff]  }
  0x24   :  { %6558 = vmatpush3.bf16.msra.mxu0 %v7519_v10  ;;  %v434_v10 = vpack.c.bf16 %v427_v8, %v426_v7  ;;  %69 = vst [vmem:[#allocation2 + $0x78] sm:$0xff] %v7902_v15  ;;  %70 = vst [vmem:[#allocation2 + $0x80] sm:$0xff] %v7902_v15  ;;  %v7541_v23 = vld [vmem:[%s9097_s3 + $0x58] sm:$0xff]   ;;  %v7543_v25 = vld [vmem:[%s9097_s3 + $0x50] sm:$0xff]  }
  0x25   :  { %6586 = vmatpush3.bf16.msra.mxu1 %v7520_v14  ;;  %6559 = vmatprep.subr.bf16.mxu0 %v7521_v18  ;;  %v7533_v14 = vld [vmem:[%s9097_s3 + $0x78] sm:$0xff]   ;;  %71 = vst [vmem:[#allocation2 + $0x88] sm:$0xff] %v7902_v15  ;;  %72 = vst [vmem:[#allocation2 + $0x90] sm:$0xff] %v7902_v15  ;;  %v7545_v27 = vld [vmem:[%s9097_s3 + $0x48] sm:$0xff]  }
  0x26   :  { %6587 = vmatprep.subr.bf16.mxu1 %v7522_v19  ;;  %73 = vst [vmem:[#allocation2 + $0x98] sm:$0xff] %v7902_v15  ;;  %74 = vst [vmem:[#allocation2 + $0xa0] sm:$0xff] %v7902_v15  ;;  %v7542_v24 = vld [vmem:[%s9097_s3 + $0x18] sm:$0xff]   ;;  %v7546_v28 = vld [vmem:[%s9097_s3 + $0x8] sm:$0xff]  }
  0x27   :  { %75 = vst [vmem:[#allocation2 + $0xa8] sm:$0xff] %v7902_v15  ;;  %76 = vst [vmem:[#allocation2 + $0xb0] sm:$0xff] %v7902_v15  ;;  %v7547_v29 = vld [vmem:[%s9097_s3 + $0x40] sm:$0xff]  }
  0x28   :  { %6560 = vmatpush3.bf16.msra.mxu0 %v7521_v18  ;;  %77 = vst [vmem:[#allocation2 + $0xb8] sm:$0xff] %v7902_v15  ;;  %78 = vst [vmem:[#allocation3] sm:$0xff] %v7902_v15  ;;  %v7536_v18 = vld [vmem:[%s9097_s3 + $0x30] sm:$0xff]  }
  0x29   :  { %6588 = vmatpush3.bf16.msra.mxu1 %v7522_v19  ;;  %6561 = vmatprep.subr.bf16.mxu0 %v7523_v20  ;;  %79 = vst [vmem:[#allocation3 + $0x8] sm:$0xff] %v7902_v15  ;;  %80 = vst [vmem:[#allocation3 + $0x10] sm:$0xff] %v7902_v15  ;;  %v7537_v19 = vld [vmem:[%s9097_s3 + $0x68] sm:$0xff]  }
  0x2a   :  { %6589 = vmatprep.subr.bf16.mxu1 %v7524_v21  ;;  %81 = vst [vmem:[#allocation3 + $0x18] sm:$0xff] %v7902_v15  ;;  %82 = vst [vmem:[#allocation3 + $0x20] sm:$0xff] %v7902_v15 }
  0x2b   :  { %83 = vst [vmem:[#allocation3 + $0x28] sm:$0xff] %v7902_v15  ;;  %84 = vst [vmem:[#allocation3 + $0x30] sm:$0xff] %v7902_v15 }
  0x2c   :  { %6562 = vmatpush3.bf16.msra.mxu0 %v7523_v20  ;;  %85 = vst [vmem:[#allocation3 + $0x38] sm:$0xff] %v7902_v15  ;;  %86 = vst [vmem:[#allocation3 + $0x40] sm:$0xff] %v7902_v15  ;;  %v7538_v20 = vld [vmem:[%s9097_s3 + $0x28] sm:$0xff]  }
  0x2d   :  { %6590 = vmatpush3.bf16.msra.mxu1 %v7524_v21  ;;  %6603 = vmatprep.subr.bf16.mxu0 %v7525_v26  ;;  %87 = vst [vmem:[#allocation3 + $0x48] sm:$0xff] %v7902_v15  ;;  %88 = vst [vmem:[#allocation3 + $0x50] sm:$0xff] %v7902_v15  ;;  %v7539_v21 = vld [vmem:[%s9097_s3 + $0x60] sm:$0xff]  }
  0x2e   :  { %6631 = vmatprep.subr.bf16.mxu1 %v7902_v15  ;;  %89 = vst [vmem:[#allocation3 + $0x58] sm:$0xff] %v7902_v15  ;;  %90 = vst [vmem:[#allocation3 + $0x60] sm:$0x3] %v7902_v15 }
  0x2f   :  { %6564 = vmatmul.mubr.bf16.vlgmr.msra.gmra.mxu0 %v138_v30  ;;  %v7548_v30 = vld [vmem:[%s9097_s3] sm:$0xff]  }
  0x30   :  { %6592 = vmatmul.mubr.bf16.vlgmr.msra.gmra.mxu1 %v104_v32  ;;  %6604 = vmatpush3.bf16.msra.mxu0 %v7525_v26  ;;  %v7544_v26 = vld [vmem:[%s9097_s3 + $0x10] sm:$0xff]  }
  0x31   :  { %6605 = vmatprep.subr.bf16.mxu0 %v7526_v33  ;;  %6567 = vmatprep.mubr.bf16.mxu0 %v139_v34 }
  0x32   :  { %6595 = vmatprep.mubr.bf16.mxu1 %v105_v35  ;;  %6632 = vmatpush3.bf16.msra.mxu1 %v7533_v14 }
  0x33   :  { %6633 = vmatprep.subr.bf16.mxu1 %v7902_v15 }
  0x34   :  { %6606 = vmatpush3.bf16.msra.mxu0 %v7526_v33 }
  0x35   :  { %6607 = vmatprep.subr.bf16.mxu0 %v7527_v36 }
  0x36   :  { %6634 = vmatpush3.bf16.msra.mxu1 %v7535_v17 }
  0x37   :  { %6568 = vmatmul.mubr.bf16.gmra.mxu0 %v140_v45  ;;  %6635 = vmatprep.subr.bf16.mxu1 %v7902_v15 }
  0x38   :  { %6608 = vmatpush3.bf16.msra.mxu0 %v7527_v36  ;;  %6596 = vmatmul.mubr.bf16.gmra.mxu1 %v106_v47 }
  0x39   :  { %6609 = vmatprep.subr.bf16.mxu0 %v7528_v46  ;;  %6571 = vmatprep.mubr.bf16.mxu0 %v141_v48 }
  0x3a   :  { %6599 = vmatprep.mubr.bf16.mxu1 %v107_v49  ;;  %6636 = vmatpush3.bf16.msra.mxu1 %v7537_v19 }
  0x3b   :  { %6637 = vmatprep.subr.bf16.mxu1 %v7902_v15 }
  0x3c   :  { %6610 = vmatpush3.bf16.msra.mxu0 %v7528_v46 }
  0x3d   :  { %6611 = vmatprep.subr.bf16.mxu0 %v7529_v52 }
  0x3e   :  { %6638 = vmatpush3.bf16.msra.mxu1 %v7539_v21 }
  0x3f   :  { %6572 = vmatmul.mubr.bf16.gmra.mxu0 %v142_v57  ;;  %6639 = vmatprep.subr.bf16.mxu1 %v7902_v15 }
  0x40   :  { %6612 = vmatpush3.bf16.msra.mxu0 %v7529_v52  ;;  %6600 = vmatmul.mubr.bf16.gmra.mxu1 %v108_v59  ;;  %v8259_v52 = vld [vmem:[%s9096_s2] ss:$0 sm:$0xff] }
  0x41   :  { %6613 = vmatprep.subr.bf16.mxu0 %v7530_v58  ;;  %6619 = vmatprep.mubr.bf16.mxu0 %v430_v60 }
  0x42   :  { %6640 = vmatpush3.bf16.msra.mxu1 %v7541_v23  ;;  %6647 = vmatprep.mubr.msk.bf16.mxu1 %vm7903_vm0, %v7902_v15 }
  0x43   :  { %6641 = vmatprep.subr.bf16.mxu1 %v7902_v15 }
  0x44   :  { %6614 = vmatpush3.bf16.msra.mxu0 %v7530_v58 }
  0x45   :  { %6615 = vmatprep.subr.bf16.mxu0 %v7531_v61 }
  0x46   :  { %6642 = vmatpush3.bf16.msra.mxu1 %v7543_v25 }
  0x47   :  { %6643 = vmatprep.subr.bf16.mxu1 %v7902_v15 }
  0x48   :  { %6616 = vmatpush3.bf16.msra.mxu0 %v7531_v61 }
  0x49   :  { %6617 = vmatprep.subr.bf16.mxu0 %v7532_v62 }
  0x4a   :  { %6644 = vmatpush3.bf16.msra.mxu1 %v7545_v27 }
  0x4b   :  { %6645 = vmatprep.subr.bf16.mxu1 %v7902_v15 }
  0x4c   :  { %6618 = vmatpush3.bf16.msra.mxu0 %v7532_v62 }
  0x4d   :  { %6659 = vmatprep.subr.bf16.mxu0 %v7902_v15 }
  0x4e   :  { %6646 = vmatpush3.bf16.msra.mxu1 %v7547_v29 }
  0x4f   :  { %6620 = vmatmul.mubr.bf16.vlgmr.msra.gmra.mxu0 %v431_v3  ;;  %6687 = vmatprep.subr.bf16.mxu1 %v7902_v15 }
  0x50   :  { %6623 = vmatprep.mubr.bf16.mxu0 %v432_v4  ;;  %6660 = vmatpush3.bf16.msra.mxu0 %v7534_v16 }
  0x51   :  { %6661 = vmatprep.subr.bf16.mxu0 %v7902_v15 }
  0x54   :  { %6662 = vmatpush3.bf16.msra.mxu0 %v7536_v18 }
  0x55   :  { %6663 = vmatprep.subr.bf16.mxu0 %v7902_v15 }
  0x57   :  { %6624 = vmatmul.mubr.bf16.gmra.mxu0 %v433_v9 }
  0x58   :  { %6627 = vmatprep.mubr.bf16.mxu0 %v434_v10  ;;  %6664 = vmatpush3.bf16.msra.mxu0 %v7538_v20 }
  0x59   :  { %6665 = vmatprep.subr.bf16.mxu0 %v7902_v15 }
  0x5c   :  { %6666 = vmatpush3.bf16.msra.mxu0 %v7540_v22 }
  0x5d   :  { %6667 = vmatprep.subr.bf16.mxu0 %v7902_v15 }
  0x5f   :  { %6628 = vmatmul.mubr.bf16.gmra.mxu0 %v435_v13 }
  0x60   :  { %6668 = vmatpush3.bf16.msra.mxu0 %v7542_v24  ;;  %6675 = vmatprep.mubr.msk.bf16.mxu0 %vm7903_vm0, %v7902_v15 }
  0x61   :  { %6669 = vmatprep.subr.bf16.mxu0 %v7902_v15 }
  0x64   :  { %6670 = vmatpush3.bf16.msra.mxu0 %v7544_v26 }
  0x65   :  { %6671 = vmatprep.subr.bf16.mxu0 %v7902_v15 }
  0x68   :  { %6672 = vmatpush3.bf16.msra.mxu0 %v7546_v28 }
  0x69   :  { %6673 = vmatprep.subr.bf16.mxu0 %v7902_v15 }
  0x6c   :  { %6674 = vmatpush3.bf16.msra.mxu0 %v7548_v30 }
  0xef   :  { %v6565_v31 = vpop.f32.mrf.mxu0 }
  0xf0   :  { %v6593_v35 = vpop.f32.mrf.mxu1 }
  0xf1   :  { %v242_v32 = vpop.f32.mrf.mxu0  ;;  %v380_v50 = vadd.f32 %v6593_v35, %v6565_v31 }
  0xf2   :  { %v371_v38 = vpop.f32.mrf.mxu1 }
  0xf3   :  { %v6566_v33 = vpop.f32.mrf.mxu0  ;;  %v372_v53 = vadd.f32 %v371_v38, %v242_v32 }
  0xf4   :  { %v6594_v41 = vpop.f32.mrf.mxu1 }
  0xf5   :  { %v245_v34 = vpop.f32.mrf.mxu0  ;;  %v383_v57 = vadd.f32 %v6594_v41, %v6566_v33  ;;  %v7549_v41 = vld [vmem:[%s9097_s3 + $0xb8] sm:$0xff]  }
  0xf6   :  { %v374_v43 = vpop.f32.mrf.mxu1 }
  0xf7   :  { %v6569_v36 = vpop.f32.mrf.mxu0  ;;  %v375_v61 = vadd.f32 %v374_v43, %v245_v34 }
  0xf8   :  { %v6597_v44 = vpop.f32.mrf.mxu1 }
  0xf9   :  { %v258_v37 = vpop.f32.mrf.mxu0  ;;  %v396_v3 = vadd.f32 %v6597_v44, %v6569_v36 }
  0xfa   :  { %v387_v46 = vpop.f32.mrf.mxu1 }
  0xfb   :  { %v6570_v39 = vpop.f32.mrf.mxu0  ;;  %v388_v8 = vadd.f32 %v387_v46, %v258_v37 }
  0xfc   :  { %v6598_v48 = vpop.f32.mrf.mxu1 }
  0xfd   :  { %v261_v40 = vpop.f32.mrf.mxu0  ;;  %v399_v14 = vadd.f32 %v6598_v48, %v6570_v39 }
  0xfe   :  { %v390_v54 = vpop.f32.mrf.mxu1 }
  0xff   :  { %v6573_v42 = vpop.f32.mrf.mxu0  ;;  %v391_v19 = vadd.f32 %v390_v54, %v261_v40 }
 0x100   :  { %v6601_v62 = vpop.f32.mrf.mxu1 }
 0x101   :  { %v274_v45 = vpop.f32.mrf.mxu0  ;;  %v412_v25 = vadd.f32 %v6601_v62, %v6573_v42 }
 0x102   :  { %v403_v9 = vpop.f32.mrf.mxu1 }
 0x103   :  { %v6574_v47 = vpop.f32.mrf.mxu0  ;;  %v404_v30 = vadd.f32 %v403_v9, %v274_v45 }
 0x104   :  { %v6602_v20 = vpop.f32.mrf.mxu1 }
 0x105   :  { %v8254_v49 = vpop.f32.mrf.mxu0  ;;  %v415_v36 = vadd.f32 %v6602_v20, %v6574_v47 }
 0x106   :  { %v406_v31 = vpop.f32.mrf.mxu1 }
 0x107   :  { %v407_v42 = vadd.f32 %v406_v31, %v8254_v49  ;;  %v7550_v49 = vld [vmem:[%s9097_s3 + $0xb0] sm:$0xff]   ;;  %v7564_v31 = vld [vmem:[%s9099_s5 + $0x20] sm:$0xff]  }
 0x10f   :  { %v6621_v51 = vpop.f32.mrf.mxu0 }
 0x110   :  { %v584_v55 = vadd.f32 %v6621_v51, %v380_v50 }
 0x111   :  { %v535_v56 = vpop.f32.mrf.mxu0 }
 0x112   :  { %v603_v58 = vadd.f32 %v8259_v52, %v584_v55  ;;  %v582_v59 = vadd.f32 %v535_v56, %v372_v53 }
 0x113   :  { %v6622_v60 = vpop.f32.mrf.mxu0 }
 0x114   :  { %v615_v63 = vmax.f32 %v603_v58, 0.0  ;;  %v601_v0 = vadd.f32 %v8259_v52, %v582_v59  ;;  %v585_v1 = vadd.f32 %v6622_v60, %v383_v57  ;;  %v8280_v60 = vld [vmem:[#allocation2 + $0x60] sm:$0xff] }
 0x115   :  { %v538_v2 = vpop.f32.mrf.mxu0 }
 0x116   :  { %627 = vst [vmem:[#allocation2 + $0x11] sm:$0xff] %v615_v63  ;;  %v613_v4 = vmax.f32 %v601_v0, 0.0  ;;  %v604_v5 = vadd.f32 %v8259_v52, %v585_v1  ;;  %v583_v6 = vadd.f32 %v538_v2, %v375_v61  ;;  %v7551_v63 = vld [vmem:[%s9097_s3 + $0xa8] sm:$0xff]  }
 0x117   :  { %v6625_v7 = vpop.f32.mrf.mxu0 }
 0x118   :  { %625 = vst [vmem:[#allocation2 + $0x1] sm:$0xff] %v613_v4  ;;  %v616_v10 = vmax.f32 %v604_v5, 0.0  ;;  %v602_v11 = vadd.f32 %v8259_v52, %v583_v6  ;;  %v588_v12 = vadd.f32 %v6625_v7, %v396_v3  ;;  %v7552_v4 = vld [vmem:[%s9097_s3 + $0xa0] sm:$0xff]  }
 0x119   :  { %v551_v13 = vpop.f32.mrf.mxu0 }
 0x11a   :  { %628 = vst [vmem:[#allocation2 + $0x19] sm:$0xff] %v616_v10  ;;  %v614_v15 = vmax.f32 %v602_v11, 0.0  ;;  %v607_v16 = vadd.f32 %v8259_v52, %v588_v12  ;;  %v586_v17 = vadd.f32 %v551_v13, %v388_v8  ;;  %v7553_v8 = vld [vmem:[%s9097_s3 + $0x98] sm:$0xff]   ;;  %v7554_v12 = vld [vmem:[%s9097_s3 + $0x90] sm:$0xff]   ;;  %v7555_v13 = vld [vmem:[%s9097_s3 + $0x88] sm:$0xff]  }
 0x11b   :  { %v6626_v18 = vpop.f32.mrf.mxu0 }
 0x11c   :  { %626 = vst [vmem:[#allocation2 + $0x9] sm:$0xff] %v614_v15  ;;  %v619_v21 = vmax.f32 %v607_v16, 0.0  ;;  %v605_v22 = vadd.f32 %v8259_v52, %v586_v17  ;;  %v589_v23 = vadd.f32 %v6626_v18, %v399_v14  ;;  %v7556_v14 = vld [vmem:[%s9097_s3 + $0x80] sm:$0xff]  }
 0x11d   :  { %v554_v24 = vpop.f32.mrf.mxu0 }
 0x11e   :  { %631 = vst [vmem:[#allocation2 + $0x31] sm:$0xff] %v619_v21  ;;  %v617_v26 = vmax.f32 %v605_v22, 0.0  ;;  %v608_v27 = vadd.f32 %v8259_v52, %v589_v23  ;;  %v587_v28 = vadd.f32 %v554_v24, %v391_v19  ;;  %v7557_v24 = vld [vmem:[%s9099_s5 + $0x78] sm:$0xff]  }
 0x11f   :  { %v6629_v29 = vpop.f32.mrf.mxu0  ;;  %6715 = vmatprep.subr.bf16.mxu0 %v7557_v24 }
 0x120   :  { %629 = vst [vmem:[#allocation2 + $0x21] sm:$0xff] %v617_v26  ;;  %v620_v32 = vmax.f32 %v608_v27, 0.0  ;;  %v606_v33 = vadd.f32 %v8259_v52, %v587_v28  ;;  %v592_v34 = vadd.f32 %v6629_v29, %v412_v25  ;;  %v7558_v25 = vld [vmem:[%s9099_s5 + $0x38] sm:$0xff]   ;;  %v7559_v26 = vld [vmem:[%s9099_s5 + $0x70] sm:$0xff]   ;;  %v7561_v28 = vld [vmem:[%s9099_s5 + $0x68] sm:$0xff]  }
 0x121   :  { %v567_v35 = vpop.f32.mrf.mxu0  ;;  %v670_v40 = vld [vmem:[#allocation2 + $0x11] ss:$2 sm:$0xff]  ;;  %v912_v16 = vld [vmem:[#allocation2 + $0x12] ss:$2 sm:$0xff]  ;;  %v7562_v29 = vld [vmem:[%s9099_s5 + $0x28] sm:$0xff]  }
 0x122   :  { %632 = vst [vmem:[#allocation2 + $0x39] sm:$0xff] %v620_v32  ;;  %v618_v37 = vmax.f32 %v606_v33, 0.0  ;;  %v611_v38 = vadd.f32 %v8259_v52, %v592_v34  ;;  %v590_v39 = vadd.f32 %v567_v35, %v404_v30  ;;  %v7560_v27 = vld [vmem:[%s9099_s5 + $0x30] sm:$0xff]   ;;  %v7563_v30 = vld [vmem:[%s9099_s5 + $0x60] sm:$0xff]   ;;  %v7565_v32 = vld [vmem:[%s9099_s5 + $0x58] sm:$0xff]  }
 0x123   :  { %v6630_v43 = vpop.f32.mrf.mxu0  ;;  %v668_v44 = vld [vmem:[#allocation2 + $0x1] ss:$2 sm:$0xff]  ;;  %v637_v45 = vld [vmem:[#allocation2] ss:$2 sm:$0xff]  ;;  %v639_v46 = vld [vmem:[#allocation2 + $0x10] ss:$2 sm:$0xff] }
 0x124   :  { %630 = vst [vmem:[#allocation2 + $0x29] sm:$0xff] %v618_v37  ;;  %v623_v48 = vmax.f32 %v611_v38, 0.0  ;;  %v609_v47 = vadd.f32 %v8259_v52, %v590_v39  ;;  %v593_v50 = vadd.f32 %v6630_v43, %v415_v36  ;;  %v679_v51 = vpack.c.bf16 %v670_v40, %v668_v44  ;;  %v910_v15 = vld [vmem:[#allocation2 + $0x2] ss:$2 sm:$0xff]  ;;  %v7566_v33 = vld [vmem:[%s9099_s5 + $0x18] sm:$0xff]  }
 0x125   :  { %v570_v53 = vpop.f32.mrf.mxu0  ;;  %v648_v54 = vpack.c.bf16 %v639_v46, %v637_v45  ;;  %v921_v17 = vpack.c.bf16 %v912_v16, %v910_v15  ;;  %v7567_v34 = vld [vmem:[%s9099_s5 + $0x50] sm:$0xff]   ;;  %v7569_v36 = vld [vmem:[%s9099_s5 + $0x48] sm:$0xff]   ;;  %v7571_v38 = vld [vmem:[%s9099_s5 + $0x40] sm:$0xff]  }
 0x126   :  { %635 = vst [vmem:[#allocation2 + $0x51] sm:$0xff] %v623_v48  ;;  %v621_v55 = vmax.f32 %v609_v47, 0.0  ;;  %v612_v56 = vadd.f32 %v8259_v52, %v593_v50  ;;  %v591_v57 = vadd.f32 %v570_v53, %v407_v42  ;;  %6648 = vmatmul.mubr.bf16.vlgmr.msra.gmra.mxu1 %v679_v51  ;;  %v7568_v35 = vld [vmem:[%s9099_s5 + $0x10] sm:$0xff]   ;;  %v7570_v37 = vld [vmem:[%s9099_s5 + $0x8] sm:$0xff]   ;;  %v7572_v39 = vld [vmem:[%s9099_s5] sm:$0xff]  }
 0x127   :  { %6676 = vmatmul.mubr.bf16.vlgmr.msra.gmra.mxu0 %v648_v54  ;;  %6688 = vmatpush3.bf16.msra.mxu1 %v7549_v41  ;;  %v8372_v40 = vld [vmem:[%s9099_s5 + $0xb8] sm:$0xff]  }
 0x128   :  { %633 = vst [vmem:[#allocation2 + $0x41] sm:$0xff] %v621_v55  ;;  %v624_v58 = vmax.f32 %v612_v56, 0.0  ;;  %v610_v59 = vadd.f32 %v8259_v52, %v591_v57  ;;  %6689 = vmatprep.subr.bf16.mxu1 %v8280_v60  ;;  %6651 = vmatprep.mubr.msk.bf16.mxu1 %vm7903_vm0, %v8280_v60  ;;  %v8377_v41 = vld [vmem:[%s9095_s1 + $0x78] sm:$0xff]  }
 0x129   :  { %6679 = vmatprep.mubr.msk.bf16.mxu0 %vm7903_vm0, %v8280_v60  ;;  %v674_v62 = vld [vmem:[#allocation2 + $0x31] ss:$2 sm:$0xff]  ;;  %v916_v19 = vld [vmem:[#allocation2 + $0x32] ss:$2 sm:$0xff]  ;;  %6716 = vmatpush3.bf16.msra.mxu0 %v7557_v24 }
 0x12a   :  { %636 = vst [vmem:[#allocation2 + $0x59] sm:$0x3f] %v624_v58  ;;  %v622_v61 = vmax.f32 %v610_v59, 0.0  ;;  %6717 = vmatprep.subr.bf16.mxu0 %v7559_v26 }
 0x12b   :  { %6690 = vmatpush3.bf16.msra.mxu1 %v7550_v49  ;;  %v672_v0 = vld [vmem:[#allocation2 + $0x21] ss:$2 sm:$0xff]  ;;  %v641_v52 = vld [vmem:[#allocation2 + $0x20] ss:$2 sm:$0xff]  ;;  %v643_v1 = vld [vmem:[#allocation2 + $0x30] ss:$2 sm:$0xff] }
 0x12c   :  { %634 = vst [vmem:[#allocation2 + $0x49] sm:$0xff] %v622_v61  ;;  %6691 = vmatprep.subr.bf16.mxu1 %v8280_v60  ;;  %v680_v2 = vpack.c.bf16 %v674_v62, %v672_v0  ;;  %v649_v3 = vpack.c.bf16 %v643_v1, %v641_v52  ;;  %v914_v18 = vld [vmem:[#allocation2 + $0x22] ss:$2 sm:$0xff] }
 0x12d   :  { %v922_v20 = vpack.c.bf16 %v916_v19, %v914_v18  ;;  %6718 = vmatpush3.bf16.msra.mxu0 %v7559_v26 }
 0x12e   :  { %6652 = vmatmul.mubr.bf16.gmra.mxu1 %v680_v2  ;;  %6719 = vmatprep.subr.bf16.mxu0 %v7561_v28 }
 0x12f   :  { %6680 = vmatmul.mubr.bf16.gmra.mxu0 %v649_v3  ;;  %6692 = vmatpush3.bf16.msra.mxu1 %v7551_v63 }
 0x130   :  { %6693 = vmatprep.subr.bf16.mxu1 %v8280_v60  ;;  %6655 = vmatprep.mubr.msk.bf16.mxu1 %vm7903_vm0, %v8280_v60 }
 0x131   :  { %6683 = vmatprep.mubr.msk.bf16.mxu0 %vm7903_vm0, %v8280_v60  ;;  %v678_v5 = vld [vmem:[#allocation2 + $0x51] ss:$2 sm:$0x7f]  ;;  %v920_v22 = vld [vmem:[#allocation2 + $0x52] ss:$2 sm:$0x7f]  ;;  %6720 = vmatpush3.bf16.msra.mxu0 %v7561_v28 }
 0x132   :  { %6721 = vmatprep.subr.bf16.mxu0 %v7563_v30 }
 0x133   :  { %6694 = vmatpush3.bf16.msra.mxu1 %v7552_v4  ;;  %v676_v6 = vld [vmem:[#allocation2 + $0x41] ss:$2 sm:$0xff]  ;;  %v645_v7 = vld [vmem:[#allocation2 + $0x40] ss:$2 sm:$0xff] }
 0x134   :  { %6695 = vmatprep.subr.bf16.mxu1 %v8280_v60  ;;  %v681_v9 = vpack.c.bf16 %v678_v5, %v676_v6  ;;  %v647_v10 = vld [vmem:[#allocation2 + $0x50] ss:$2 sm:$0x7f]  ;;  %v5681_v5 = vld [vmem:[%s9098_s4] ss:$0 sm:$0xff] }
 0x135   :  { %v650_v11 = vpack.c.bf16 %v647_v10, %v645_v7  ;;  %v918_v21 = vld [vmem:[#allocation2 + $0x42] ss:$2 sm:$0xff]  ;;  %6722 = vmatpush3.bf16.msra.mxu0 %v7563_v30 }
 0x136   :  { %6656 = vmatmul.mubr.bf16.gmra.mxu1 %v681_v9  ;;  %v923_v23 = vpack.c.bf16 %v920_v22, %v918_v21  ;;  %6723 = vmatprep.subr.bf16.mxu0 %v7565_v32 }
 0x137   :  { %6684 = vmatmul.mubr.bf16.gmra.mxu0 %v650_v11  ;;  %6696 = vmatpush3.bf16.msra.mxu1 %v7553_v8 }
 0x138   :  { %6697 = vmatprep.subr.bf16.mxu1 %v8280_v60  ;;  %6703 = vmatprep.mubr.msk.bf16.mxu1 %vm7903_vm0, %v8280_v60 }
 0x139   :  { %6724 = vmatpush3.bf16.msra.mxu0 %v7565_v32 }
 0x13a   :  { %6725 = vmatprep.subr.bf16.mxu0 %v7567_v34 }
 0x13b   :  { %6698 = vmatpush3.bf16.msra.mxu1 %v7554_v12 }
 0x13c   :  { %6699 = vmatprep.subr.bf16.mxu1 %v8280_v60 }
 0x13d   :  { %6726 = vmatpush3.bf16.msra.mxu0 %v7567_v34 }
 0x13e   :  { %6727 = vmatprep.subr.bf16.mxu0 %v7569_v36 }
 0x13f   :  { %6700 = vmatpush3.bf16.msra.mxu1 %v7555_v13 }
 0x140   :  { %6701 = vmatprep.subr.bf16.mxu1 %v8280_v60 }
 0x141   :  { %6728 = vmatpush3.bf16.msra.mxu0 %v7569_v36 }
 0x142   :  { %6729 = vmatprep.subr.bf16.mxu0 %v7571_v38 }
 0x143   :  { %6702 = vmatpush3.bf16.msra.mxu1 %v7556_v14 }
 0x144   :  { %6735 = vmatprep.subr.bf16.mxu1 %v7558_v25 }
 0x145   :  { %6730 = vmatpush3.bf16.msra.mxu0 %v7571_v38 }
 0x146   :  { %6704 = vmatmul.mubr.bf16.vlgmr.msra.gmra.mxu1 %v921_v17  ;;  %6755 = vmatprep.subr.bf16.mxu0 %v8372_v40 }
 0x147   :  { %6707 = vmatprep.mubr.msk.bf16.mxu1 %vm7903_vm0, %v8280_v60  ;;  %6736 = vmatpush3.bf16.msra.mxu1 %v7558_v25 }
 0x148   :  { %6737 = vmatprep.subr.bf16.mxu1 %v7560_v27 }
 0x14b   :  { %6738 = vmatpush3.bf16.msra.mxu1 %v7560_v27 }
 0x14c   :  { %6739 = vmatprep.subr.bf16.mxu1 %v7562_v29 }
 0x14e   :  { %6708 = vmatmul.mubr.bf16.gmra.mxu1 %v922_v20 }
 0x14f   :  { %6711 = vmatprep.mubr.msk.bf16.mxu1 %vm7903_vm0, %v8280_v60  ;;  %6740 = vmatpush3.bf16.msra.mxu1 %v7562_v29 }
 0x150   :  { %6741 = vmatprep.subr.bf16.mxu1 %v7564_v31 }
 0x153   :  { %6742 = vmatpush3.bf16.msra.mxu1 %v7564_v31 }
 0x154   :  { %6743 = vmatprep.subr.bf16.mxu1 %v7566_v33 }
 0x156   :  { %6712 = vmatmul.mubr.bf16.gmra.mxu1 %v923_v23 }
 0x157   :  { %6744 = vmatpush3.bf16.msra.mxu1 %v7566_v33 }
 0x158   :  { %6745 = vmatprep.subr.bf16.mxu1 %v7568_v35 }
 0x15b   :  { %6746 = vmatpush3.bf16.msra.mxu1 %v7568_v35 }
 0x15c   :  { %6747 = vmatprep.subr.bf16.mxu1 %v7570_v37 }
 0x15f   :  { %6748 = vmatpush3.bf16.msra.mxu1 %v7570_v37 }
 0x160   :  { %6749 = vmatprep.subr.bf16.mxu1 %v7572_v39 }
 0x163   :  { %6750 = vmatpush3.bf16.msra.mxu1 %v7572_v39 }
 0x164   :  { %6775 = vmatprep.subr.bf16.mxu1 %v8377_v41 }
 0x1e6   :  { %v781_v42 = vpop.f32.mrf.mxu1 }
 0x1e7   :  { %v886_v43 = vpop.f32.mrf.mxu0 }
 0x1e8   :  { %v6649_v44 = vpop.f32.mrf.mxu1  ;;  %v887_v3 = vadd.f32 %v886_v43, %v781_v42 }
 0x1e9   :  { %v6677_v45 = vpop.f32.mrf.mxu0 }
 0x1ea   :  { %v784_v46 = vpop.f32.mrf.mxu1 }
 0x1eb   :  { %v889_v48 = vpop.f32.mrf.mxu0 }
 0x1ec   :  { %v6650_v47 = vpop.f32.mrf.mxu1  ;;  %v890_v8 = vadd.f32 %v889_v48, %v784_v46 }
 0x1ed   :  { %v6678_v50 = vpop.f32.mrf.mxu0  ;;  %v1491_v47 = vld [vmem:[%s9094_s0 + $0x61] sm:$0xff] }
 0x1ee   :  { %v789_v51 = vpop.f32.mrf.mxu1  ;;  %v1492_v50 = vld [vmem:[%s9094_s0 + $0x69] sm:$0xff] }
 0x1ef   :  { %v894_v53 = vpop.f32.mrf.mxu0 }
 0x1f0   :  { %v6653_v54 = vpop.f32.mrf.mxu1  ;;  %v895_v14 = vadd.f32 %v894_v53, %v789_v51 }
 0x1f1   :  { %v6681_v55 = vpop.f32.mrf.mxu0 }
 0x1f2   :  { %v792_v56 = vpop.f32.mrf.mxu1 }
 0x1f3   :  { %v897_v57 = vpop.f32.mrf.mxu0 }
 0x1f4   :  { %v6654_v49 = vpop.f32.mrf.mxu1  ;;  %v898_v20 = vadd.f32 %v897_v57, %v792_v56  ;;  %v7575_v57 = vld [vmem:[%s9099_s5 + $0xb0] sm:$0xff]  }
 0x1f5   :  { %v6682_v58 = vpop.f32.mrf.mxu0 }
 0x1f6   :  { %v797_v59 = vpop.f32.mrf.mxu1  ;;  %v7576_v58 = vld [vmem:[%s9095_s1 + $0x70] sm:$0xff]  }
 0x1f7   :  { %v902_v61 = vpop.f32.mrf.mxu0 }
 0x1f8   :  { %v6657_v62 = vpop.f32.mrf.mxu1  ;;  %v903_v26 = vadd.f32 %v902_v61, %v797_v59  ;;  %v1503_v59 = vpack.c.bf16 %v1492_v50, %v1491_v47  ;;  %v1459_v47 = vld [vmem:[%s9094_s0 + $0x70] sm:$0xff]  ;;  %v1460_v50 = vld [vmem:[%s9094_s0 + $0x78] sm:$0xff] }
 0x1f9   :  { %v6685_v63 = vpop.f32.mrf.mxu0  ;;  %v7577_v62 = vld [vmem:[%s9099_s5 + $0xa8] sm:$0xff]  }
 0x1fa   :  { %v800_v0 = vpop.f32.mrf.mxu1  ;;  %v7578_v63 = vld [vmem:[%s9095_s1 + $0x68] sm:$0xff]  }
 0x1fb   :  { %v905_v52 = vpop.f32.mrf.mxu0 }
 0x1fc   :  { %v6658_v1 = vpop.f32.mrf.mxu1  ;;  %v906_v32 = vadd.f32 %v905_v52, %v800_v0  ;;  %v7581_v0 = vld [vmem:[%s9099_s5 + $0x98] sm:$0xff]  }
 0x1fd   :  { %v6686_v2 = vpop.f32.mrf.mxu0  ;;  %v7582_v52 = vld [vmem:[%s9095_s1 + $0x58] sm:$0xff]   ;;  %v7583_v1 = vld [vmem:[%s9099_s5 + $0x90] sm:$0xff]  }
 0x1fe   :  { %v7584_v2 = vld [vmem:[%s9095_s1 + $0x50] sm:$0xff]  }
 0x206   :  { %v1023_v4 = vpop.f32.mrf.mxu1 }
 0x207   :  { %v1046_v6 = vadd.f32 %v1023_v4, %v887_v3  ;;  %v7585_v3 = vld [vmem:[%s9099_s5 + $0x88] sm:$0xff]  }
 0x208   :  { %v6705_v7 = vpop.f32.mrf.mxu1  ;;  %v7586_v4 = vld [vmem:[%s9095_s1 + $0x48] sm:$0xff]  }
 0x209   :  { %v1059_v9 = vadd.f32 %v5681_v5, %v1046_v6  ;;  %v7588_v6 = vld [vmem:[%s9095_s1 + $0x40] sm:$0xff]   ;;  %v1493_v7 = vld [vmem:[%s9094_s0 + $0x71] sm:$0xff] }
 0x20a   :  { %v1026_v10 = vpop.f32.mrf.mxu1 }
 0x20b   :  { %v1065_v11 = vmax.f32 %v1059_v9, 0.0  ;;  %v1047_v12 = vadd.f32 %v1026_v10, %v890_v8  ;;  %v1494_v8 = vld [vmem:[%s9094_s0 + $0x79] sm:$0xff] }
 0x20c   :  { %v6706_v13 = vpop.f32.mrf.mxu1  ;;  %v7589_v9 = vld [vmem:[%s9095_s1 + $0x38] sm:$0xff]  }
 0x20d   :  { %1071 = vst [vmem:[#allocation3 + $0x1] sm:$0xff] %v1065_v11  ;;  %v1060_v15 = vadd.f32 %v5681_v5, %v1047_v12  ;;  %v7590_v10 = vld [vmem:[%s9095_s1 + $0xb8] sm:$0xff]   ;;  %v1495_v12 = vld [vmem:[%s9094_s0 + $0x81] sm:$0xff]  ;;  %v1504_v13 = vpack.c.bf16 %v1494_v8, %v1493_v7  ;;  %v1467_v7 = vld [vmem:[%s9094_s0 + $0xb0] sm:$0xff] }
 0x20e   :  { %v1031_v16 = vpop.f32.mrf.mxu1  ;;  %v1468_v8 = vld [vmem:[%s9094_s0 + $0xb8] sm:$0x3f] }
 0x20f   :  { %v1066_v17 = vmax.f32 %v1060_v15, 0.0  ;;  %v1048_v18 = vadd.f32 %v1031_v16, %v895_v14  ;;  %v1496_v14 = vld [vmem:[%s9094_s0 + $0x89] sm:$0xff]  ;;  %v1457_v15 = vld [vmem:[%s9094_s0 + $0x60] sm:$0xff] }
 0x210   :  { %v6709_v19 = vpop.f32.mrf.mxu1  ;;  %v1458_v16 = vld [vmem:[%s9094_s0 + $0x68] sm:$0xff] }
 0x211   :  { %1072 = vst [vmem:[#allocation3 + $0x9] sm:$0xff] %v1066_v17  ;;  %v1061_v21 = vadd.f32 %v5681_v5, %v1048_v18  ;;  %v7591_v18 = vld [vmem:[%s9095_s1 + $0x30] sm:$0xff]  }
 0x212   :  { %v1034_v22 = vpop.f32.mrf.mxu1  ;;  %v7592_v19 = vld [vmem:[%s9095_s1 + $0xb0] sm:$0xff]  }
 0x213   :  { %v1067_v23 = vmax.f32 %v1061_v21, 0.0  ;;  %v1049_v24 = vadd.f32 %v1034_v22, %v898_v20  ;;  %v1505_v20 = vpack.c.bf16 %v1496_v14, %v1495_v12  ;;  %v1469_v21 = vpack.c.bf16 %v1458_v16, %v1457_v15  ;;  %v1497_v22 = vld [vmem:[%s9094_s0 + $0x91] sm:$0xff] }
 0x214   :  { %v6710_v25 = vpop.f32.mrf.mxu1  ;;  %v7606_v14 = vld [vmem:[%s9097_s3 + $0x38] sm:$0xff]   ;;  %v7607_v15 = vld [vmem:[%s9097_s3 + $0x70] sm:$0xff]  }
 0x215   :  { %1073 = vst [vmem:[#allocation3 + $0x11] sm:$0xff] %v1067_v23  ;;  %v1062_v27 = vadd.f32 %v5681_v5, %v1049_v24  ;;  %v1498_v23 = vld [vmem:[%s9094_s0 + $0x99] sm:$0xff]  ;;  %v7593_v24 = vld [vmem:[%s9095_s1 + $0x28] sm:$0xff]   ;;  %v7608_v16 = vld [vmem:[%s9097_s3 + $0x30] sm:$0xff]  }
 0x216   :  { %v1039_v28 = vpop.f32.mrf.mxu1  ;;  %v7594_v25 = vld [vmem:[%s9095_s1 + $0xa8] sm:$0xff]  }
 0x217   :  { %v1068_v29 = vmax.f32 %v1062_v27, 0.0  ;;  %v1050_v30 = vadd.f32 %v1039_v28, %v903_v26  ;;  %v1506_v26 = vpack.c.bf16 %v1498_v23, %v1497_v22  ;;  %v1499_v27 = vld [vmem:[%s9094_s0 + $0xa1] sm:$0xff]  ;;  %v1500_v28 = vld [vmem:[%s9094_s0 + $0xa9] sm:$0xff]  ;;  %v7614_v22 = vld [vmem:[%s9097_s3 + $0x18] sm:$0xff]  }
 0x218   :  { %v6713_v31 = vpop.f32.mrf.mxu1  ;;  %v1101_v42 = vld [vmem:[#allocation3 + $0x1] ss:$2 sm:$0xff]  ;;  %v1077_v44 = vld [vmem:[#allocation3] ss:$2 sm:$0xff]  ;;  %v7615_v23 = vld [vmem:[%s9097_s3 + $0x50] sm:$0xff]  }
 0x219   :  { %1074 = vst [vmem:[#allocation3 + $0x19] sm:$0xff] %v1068_v29  ;;  %v1063_v33 = vadd.f32 %v5681_v5, %v1050_v30  ;;  %v1318_v49 = vld [vmem:[#allocation3 + $0x2] ss:$2 sm:$0xff]  ;;  %v1507_v31 = vpack.c.bf16 %v1500_v28, %v1499_v27 }
 0x21a   :  { %v1042_v34 = vpop.f32.mrf.mxu1  ;;  %v7595_v29 = vld [vmem:[%s9095_s1 + $0x20] sm:$0xff]  }
 0x21b   :  { %v1069_v35 = vmax.f32 %v1063_v33, 0.0  ;;  %v1051_v36 = vadd.f32 %v1042_v34, %v906_v32  ;;  %v7596_v30 = vld [vmem:[%s9095_s1 + $0xa0] sm:$0xff]   ;;  %v1501_v32 = vld [vmem:[%s9094_s0 + $0xb1] sm:$0xff]  ;;  %v1502_v33 = vld [vmem:[%s9094_s0 + $0xb9] sm:$0x3f] }
 0x21c   :  { %v6714_v37 = vpop.f32.mrf.mxu1  ;;  %v7597_v34 = vld [vmem:[%s9095_s1 + $0x18] sm:$0xff]   ;;  %v7619_v27 = vld [vmem:[%s9097_s3 + $0x40] sm:$0xff]  }
 0x21d   :  { %1075 = vst [vmem:[#allocation3 + $0x21] sm:$0xff] %v1069_v35  ;;  %v1064_v38 = vadd.f32 %v5681_v5, %v1051_v36  ;;  %v7587_v5 = vld [vmem:[%s9099_s5 + $0x80] sm:$0xff]   ;;  %v7598_v35 = vld [vmem:[%s9095_s1 + $0x98] sm:$0xff]   ;;  %v1508_v36 = vpack.c.bf16 %v1502_v33, %v1501_v32 }
 0x21e   :  { %v1783_v37 = vld [vmem:[%s9094_s0 + $0x62] sm:$0xff] }
 0x21f   :  { %v1070_v39 = vmax.f32 %v1064_v38, 0.0  ;;  %v1784_v38 = vld [vmem:[%s9094_s0 + $0x6a] sm:$0xff]  ;;  %v7620_v28 = vld [vmem:[%s9097_s3] sm:$0xff]  }
 0x220   :  { %v1103_v43 = vld [vmem:[#allocation3 + $0x11] ss:$2 sm:$0xff]  ;;  %v1079_v45 = vld [vmem:[#allocation3 + $0x10] ss:$2 sm:$0xff] }
 0x221   :  { %1076 = vst [vmem:[#allocation3 + $0x29] sm:$0x7f] %v1070_v39  ;;  %v1106_v46 = vpack.c.bf16 %v1103_v43, %v1101_v42  ;;  %v1082_v48 = vpack.c.bf16 %v1079_v45, %v1077_v44  ;;  %v1320_v54 = vld [vmem:[#allocation3 + $0x12] ss:$2 sm:$0xff]  ;;  %v1795_v43 = vpack.c.bf16 %v1784_v38, %v1783_v37  ;;  %v7601_v44 = vld [vmem:[%s9095_s1 + $0x8] sm:$0xff]  }
 0x222   :  { %v1323_v61 = vpack.c.bf16 %v1320_v54, %v1318_v49  ;;  %v7599_v39 = vld [vmem:[%s9095_s1 + $0x10] sm:$0xff]   ;;  %v7602_v45 = vld [vmem:[%s9095_s1 + $0x88] sm:$0xff]   ;;  %v1461_v54 = vld [vmem:[%s9094_s0 + $0x80] sm:$0xff]  ;;  %v1470_v49 = vpack.c.bf16 %v1460_v50, %v1459_v47 }
 0x223   :  { %6731 = vmatprep.mubr.bf16.mxu0 %v1106_v46  ;;  %6751 = vmatprep.mubr.bf16.mxu1 %v1082_v48  ;;  %v7600_v42 = vld [vmem:[%s9095_s1 + $0x90] sm:$0xff]   ;;  %v7603_v46 = vld [vmem:[%s9095_s1] sm:$0xff]  }
 0x224   :  { %v7604_v48 = vld [vmem:[%s9095_s1 + $0x80] sm:$0xff]  }
 0x228   :  { %v1105_v51 = vld [vmem:[#allocation3 + $0x21] ss:$2 sm:$0xff]  ;;  %v1081_v53 = vld [vmem:[#allocation3 + $0x20] ss:$2 sm:$0xff] }
 0x229   :  { %v1107_v55 = vpack.c.bf16 %v1105_v51, %v1105_v51  ;;  %v1083_v56 = vpack.c.bf16 %v1081_v53, %v1081_v53  ;;  %v1322_v11 = vld [vmem:[#allocation3 + $0x22] ss:$2 sm:$0xff]  ;;  %v1785_v51 = vld [vmem:[%s9094_s0 + $0x72] sm:$0xff]  ;;  %v1786_v53 = vld [vmem:[%s9094_s0 + $0x7a] sm:$0xff] }
 0x22a   :  { %v1324_v17 = vpack.c.bf16 %v1322_v11, %v1322_v11  ;;  %v1474_v11 = vpack.c.bf16 %v1468_v8, %v1467_v7 }
 0x22b   :  { %6732 = vmatmul.mubr.bf16.vlgmr.msra.gmra.mxu0 %v1107_v55  ;;  %6752 = vmatmul.mubr.bf16.vlgmr.msra.gmra.mxu1 %v1083_v56  ;;  %v1462_v55 = vld [vmem:[%s9094_s0 + $0x88] sm:$0xff] }
 0x22c   :  { %6756 = vmatpush3.bf16.msra.mxu0 %v8372_v40  ;;  %6776 = vmatpush3.bf16.msra.mxu1 %v8377_v41  ;;  %v7579_v40 = vld [vmem:[%s9099_s5 + $0xa0] sm:$0xff]  }
 0x22d   :  { %6771 = vmatprep.mubr.bf16.mxu0 %v1323_v61  ;;  %6757 = vmatprep.subr.bf16.mxu0 %v7575_v57  ;;  %v7580_v41 = vld [vmem:[%s9095_s1 + $0x60] sm:$0xff]  }
 0x22e   :  { %6777 = vmatprep.subr.bf16.mxu1 %v7576_v58  ;;  %6791 = vmatprep.mubr.bf16.mxu1 %v1503_v59  ;;  %v1787_v56 = vld [vmem:[%s9094_s0 + $0x82] sm:$0xff]  ;;  %v1471_v59 = vpack.c.bf16 %v1462_v55, %v1461_v54 }
 0x230   :  { %6758 = vmatpush3.bf16.msra.mxu0 %v7575_v57  ;;  %6778 = vmatpush3.bf16.msra.mxu1 %v7576_v58  ;;  %v1788_v57 = vld [vmem:[%s9094_s0 + $0x8a] sm:$0xff]  ;;  %v1796_v58 = vpack.c.bf16 %v1786_v53, %v1785_v51 }
 0x231   :  { %6759 = vmatprep.subr.bf16.mxu0 %v7577_v62  ;;  %6779 = vmatprep.subr.bf16.mxu1 %v7578_v63  ;;  %v1797_v61 = vpack.c.bf16 %v1788_v57, %v1787_v56 }
 0x234   :  { %6760 = vmatpush3.bf16.msra.mxu0 %v7577_v62  ;;  %6780 = vmatpush3.bf16.msra.mxu1 %v7578_v63  ;;  %v1463_v62 = vld [vmem:[%s9094_s0 + $0x90] sm:$0xff]  ;;  %v1464_v63 = vld [vmem:[%s9094_s0 + $0x98] sm:$0xff] }
 0x235   :  { %6761 = vmatprep.subr.bf16.mxu0 %v7579_v40  ;;  %6781 = vmatprep.subr.bf16.mxu1 %v7580_v41 }
 0x238   :  { %6762 = vmatpush3.bf16.msra.mxu0 %v7579_v40  ;;  %6782 = vmatpush3.bf16.msra.mxu1 %v7580_v41  ;;  %v1789_v40 = vld [vmem:[%s9094_s0 + $0x92] sm:$0xff]  ;;  %v1790_v41 = vld [vmem:[%s9094_s0 + $0x9a] sm:$0xff] }
 0x239   :  { %6763 = vmatprep.subr.bf16.mxu0 %v7581_v0  ;;  %6783 = vmatprep.subr.bf16.mxu1 %v7582_v52 }
 0x23c   :  { %6764 = vmatpush3.bf16.msra.mxu0 %v7581_v0  ;;  %6784 = vmatpush3.bf16.msra.mxu1 %v7582_v52  ;;  %v1465_v0 = vld [vmem:[%s9094_s0 + $0xa0] sm:$0xff]  ;;  %v1466_v52 = vld [vmem:[%s9094_s0 + $0xa8] sm:$0xff] }
 0x23d   :  { %6765 = vmatprep.subr.bf16.mxu0 %v7583_v1  ;;  %6785 = vmatprep.subr.bf16.mxu1 %v7584_v2 }
 0x240   :  { %6766 = vmatpush3.bf16.msra.mxu0 %v7583_v1  ;;  %6786 = vmatpush3.bf16.msra.mxu1 %v7584_v2  ;;  %v1791_v1 = vld [vmem:[%s9094_s0 + $0xa2] sm:$0xff]  ;;  %v1792_v2 = vld [vmem:[%s9094_s0 + $0xaa] sm:$0xff] }
 0x241   :  { %6767 = vmatprep.subr.bf16.mxu0 %v7585_v3  ;;  %6787 = vmatprep.subr.bf16.mxu1 %v7586_v4 }
 0x244   :  { %6768 = vmatpush3.bf16.msra.mxu0 %v7585_v3  ;;  %6788 = vmatpush3.bf16.msra.mxu1 %v7586_v4  ;;  %v1472_v3 = vpack.c.bf16 %v1464_v63, %v1463_v62  ;;  %v1798_v4 = vpack.c.bf16 %v1790_v41, %v1789_v40 }
 0x245   :  { %6769 = vmatprep.subr.bf16.mxu0 %v7587_v5  ;;  %6789 = vmatprep.subr.bf16.mxu1 %v7588_v6 }
 0x248   :  { %6770 = vmatpush3.bf16.msra.mxu0 %v7587_v5  ;;  %6790 = vmatpush3.bf16.msra.mxu1 %v7588_v6  ;;  %v1473_v5 = vpack.c.bf16 %v1466_v52, %v1465_v0  ;;  %v1799_v6 = vpack.c.bf16 %v1792_v2, %v1791_v1 }
 0x249   :  { %6803 = vmatprep.subr.bf16.mxu0 %v7589_v9  ;;  %6831 = vmatprep.subr.bf16.mxu1 %v7590_v10 }
 0x24b   :  { %6772 = vmatmul.mubr.bf16.vlgmr.msra.gmra.mxu0 %v1324_v17  ;;  %6792 = vmatmul.mubr.bf16.vlgmr.msra.gmra.mxu1 %v1504_v13  ;;  %v7605_v13 = vld [vmem:[%s9097_s3 + $0x78] sm:$0xff]   ;;  %v7609_v17 = vld [vmem:[%s9097_s3 + $0x68] sm:$0xff]  }
 0x24c   :  { %6804 = vmatpush3.bf16.msra.mxu0 %v7589_v9  ;;  %6832 = vmatpush3.bf16.msra.mxu1 %v7590_v10  ;;  %v1793_v9 = vld [vmem:[%s9094_s0 + $0xb2] sm:$0xff]  ;;  %v1794_v10 = vld [vmem:[%s9094_s0 + $0xba] sm:$0x3f] }
 0x24d   :  { %6805 = vmatprep.subr.bf16.mxu0 %v7591_v18  ;;  %6833 = vmatprep.subr.bf16.mxu1 %v7592_v19  ;;  %v1800_v12 = vpack.c.bf16 %v1794_v10, %v1793_v9 }
 0x24e   :  { %6795 = vmatprep.mubr.bf16.mxu1 %v1505_v20  ;;  %6819 = vmatprep.mubr.bf16.mxu0 %v1469_v21  ;;  %v7612_v20 = vld [vmem:[%s9097_s3 + $0x20] sm:$0xff]   ;;  %v7613_v21 = vld [vmem:[%s9097_s3 + $0x58] sm:$0xff]  }
 0x250   :  { %6806 = vmatpush3.bf16.msra.mxu0 %v7591_v18  ;;  %6834 = vmatpush3.bf16.msra.mxu1 %v7592_v19  ;;  %v7610_v18 = vld [vmem:[%s9097_s3 + $0x28] sm:$0xff]   ;;  %v7611_v19 = vld [vmem:[%s9097_s3 + $0x60] sm:$0xff]  }
 0x251   :  { %6807 = vmatprep.subr.bf16.mxu0 %v7593_v24  ;;  %6835 = vmatprep.subr.bf16.mxu1 %v7594_v25 }
 0x253   :  { %6796 = vmatmul.mubr.bf16.gmra.mxu1 %v1506_v26  ;;  %v7618_v26 = vld [vmem:[%s9097_s3 + $0x8] sm:$0xff]  }
 0x254   :  { %6808 = vmatpush3.bf16.msra.mxu0 %v7593_v24  ;;  %6836 = vmatpush3.bf16.msra.mxu1 %v7594_v25  ;;  %v7616_v24 = vld [vmem:[%s9097_s3 + $0x10] sm:$0xff]   ;;  %v7617_v25 = vld [vmem:[%s9097_s3 + $0x48] sm:$0xff]  }
 0x255   :  { %6809 = vmatprep.subr.bf16.mxu0 %v7595_v29  ;;  %6837 = vmatprep.subr.bf16.mxu1 %v7596_v30 }
 0x256   :  { %6799 = vmatprep.mubr.bf16.mxu1 %v1507_v31 }
 0x258   :  { %6810 = vmatpush3.bf16.msra.mxu0 %v7595_v29  ;;  %6838 = vmatpush3.bf16.msra.mxu1 %v7596_v30 }
 0x259   :  { %6811 = vmatprep.subr.bf16.mxu0 %v7597_v34  ;;  %6839 = vmatprep.subr.bf16.mxu1 %v7598_v35 }
 0x25b   :  { %6800 = vmatmul.mubr.bf16.gmra.mxu1 %v1508_v36 }
 0x25c   :  { %6812 = vmatpush3.bf16.msra.mxu0 %v7597_v34  ;;  %6840 = vmatpush3.bf16.msra.mxu1 %v7598_v35 }
 0x25d   :  { %6813 = vmatprep.subr.bf16.mxu0 %v7599_v39  ;;  %6841 = vmatprep.subr.bf16.mxu1 %v7600_v42 }
 0x25e   :  { %6847 = vmatprep.mubr.bf16.mxu1 %v1795_v43 }
 0x260   :  { %6814 = vmatpush3.bf16.msra.mxu0 %v7599_v39  ;;  %6842 = vmatpush3.bf16.msra.mxu1 %v7600_v42  ;;  %v5738_v39 = vld [vmem:[%s9100_s6] ss:$0 sm:$0xff] }
 0x261   :  { %6815 = vmatprep.subr.bf16.mxu0 %v7601_v44  ;;  %6843 = vmatprep.subr.bf16.mxu1 %v7602_v45 }
 0x264   :  { %6816 = vmatpush3.bf16.msra.mxu0 %v7601_v44  ;;  %6844 = vmatpush3.bf16.msra.mxu1 %v7602_v45 }
 0x265   :  { %6817 = vmatprep.subr.bf16.mxu0 %v7603_v46  ;;  %6845 = vmatprep.subr.bf16.mxu1 %v7604_v48 }
 0x268   :  { %6818 = vmatpush3.bf16.msra.mxu0 %v7603_v46  ;;  %6846 = vmatpush3.bf16.msra.mxu1 %v7604_v48 }
 0x269   :  { %6859 = vmatprep.subr.bf16.mxu0 %v8280_v60  ;;  %6887 = vmatprep.subr.bf16.mxu1 %v8280_v60 }
 0x26b   :  { %6820 = vmatmul.mubr.bf16.vlgmr.msra.gmra.mxu0 %v1470_v49  ;;  %6848 = vmatmul.mubr.bf16.vlgmr.msra.gmra.mxu1 %v1796_v58 }
 0x26c   :  { %6823 = vmatprep.mubr.bf16.mxu0 %v1471_v59  ;;  %6851 = vmatprep.mubr.bf16.mxu1 %v1797_v61 }
 0x26d   :  { %6860 = vmatpush3.bf16.msra.mxu0 %v7605_v13  ;;  %6888 = vmatpush3.bf16.msra.mxu1 %v7606_v14 }
 0x26e   :  { %6861 = vmatprep.subr.bf16.mxu0 %v8280_v60  ;;  %6889 = vmatprep.subr.bf16.mxu1 %v8280_v60 }
 0x271   :  { %6862 = vmatpush3.bf16.msra.mxu0 %v7607_v15  ;;  %6890 = vmatpush3.bf16.msra.mxu1 %v7608_v16 }
 0x272   :  { %6863 = vmatprep.subr.bf16.mxu0 %v8280_v60  ;;  %6891 = vmatprep.subr.bf16.mxu1 %v8280_v60 }
 0x273   :  { %6824 = vmatmul.mubr.bf16.gmra.mxu0 %v1472_v3  ;;  %6852 = vmatmul.mubr.bf16.gmra.mxu1 %v1798_v4 }
 0x274   :  { %6827 = vmatprep.mubr.bf16.mxu0 %v1473_v5  ;;  %6855 = vmatprep.mubr.bf16.mxu1 %v1799_v6  ;;  %v8663_v5 = vld [vmem:[%s9096_s2] ss:$0 sm:$0xff] }
 0x275   :  { %6864 = vmatpush3.bf16.msra.mxu0 %v7609_v17  ;;  %6892 = vmatpush3.bf16.msra.mxu1 %v7610_v18 }
 0x276   :  { %6865 = vmatprep.subr.bf16.mxu0 %v8280_v60  ;;  %6893 = vmatprep.subr.bf16.mxu1 %v8280_v60 }
 0x279   :  { %6866 = vmatpush3.bf16.msra.mxu0 %v7611_v19  ;;  %6894 = vmatpush3.bf16.msra.mxu1 %v7612_v20 }
 0x27a   :  { %6867 = vmatprep.subr.bf16.mxu0 %v8280_v60  ;;  %6895 = vmatprep.subr.bf16.mxu1 %v8280_v60 }
 0x27b   :  { %6828 = vmatmul.mubr.bf16.gmra.mxu0 %v1474_v11  ;;  %6856 = vmatmul.mubr.bf16.gmra.mxu1 %v1800_v12 }
 0x27c   :  { %6875 = vmatprep.mubr.msk.bf16.mxu0 %vm7903_vm0, %v8280_v60  ;;  %6903 = vmatprep.mubr.msk.bf16.mxu1 %vm7903_vm0, %v8280_v60 }
 0x27d   :  { %6868 = vmatpush3.bf16.msra.mxu0 %v7613_v21  ;;  %6896 = vmatpush3.bf16.msra.mxu1 %v7614_v22 }
 0x27e   :  { %6869 = vmatprep.subr.bf16.mxu0 %v8280_v60  ;;  %6897 = vmatprep.subr.bf16.mxu1 %v8280_v60 }
 0x281   :  { %6870 = vmatpush3.bf16.msra.mxu0 %v7615_v23  ;;  %6898 = vmatpush3.bf16.msra.mxu1 %v7616_v24 }
 0x282   :  { %6871 = vmatprep.subr.bf16.mxu0 %v8280_v60  ;;  %6899 = vmatprep.subr.bf16.mxu1 %v8280_v60 }
 0x285   :  { %6872 = vmatpush3.bf16.msra.mxu0 %v7617_v25  ;;  %6900 = vmatpush3.bf16.msra.mxu1 %v7618_v26 }
 0x286   :  { %6873 = vmatprep.subr.bf16.mxu0 %v8280_v60  ;;  %6901 = vmatprep.subr.bf16.mxu1 %v8280_v60 }
 0x289   :  { %6874 = vmatpush3.bf16.msra.mxu0 %v7619_v27  ;;  %6902 = vmatpush3.bf16.msra.mxu1 %v7620_v28 }
 0x28a   :  { %6915 = vmatprep.subr.bf16.mxu0 %v8280_v60 }
 0x2eb   :  { %v6733_v29 = vpop.f32.mrf.mxu0  ;;  %v6753_v30 = vpop.f32.mrf.mxu1 }
 0x2ec   :  { %v1312_v37 = vadd.f32 %v6753_v30, %v6733_v29 }
 0x2ed   :  { %v1207_v31 = vpop.f32.mrf.mxu0  ;;  %v1303_v32 = vpop.f32.mrf.mxu1 }
 0x2ee   :  { %v1304_v43 = vadd.f32 %v1303_v32, %v1207_v31 }
 0x2ef   :  { %v6734_v33 = vpop.f32.mrf.mxu0  ;;  %v6754_v34 = vpop.f32.mrf.mxu1 }
 0x2f1   :  { %v1210_v35 = vpop.f32.mrf.mxu0  ;;  %v1306_v36 = vpop.f32.mrf.mxu1 }
 0x2f2   :  { %v1307_v51 = vadd.f32 %v1306_v36, %v1210_v35 }
 0x30b   :  { %v6773_v38 = vpop.f32.mrf.mxu0  ;;  %v6793_v42 = vpop.f32.mrf.mxu1 }
 0x30c   :  { %v1440_v44 = vadd.f32 %v6773_v38, %v1312_v37 }
 0x30d   :  { %v1424_v45 = vpop.f32.mrf.mxu0  ;;  %v1607_v46 = vpop.f32.mrf.mxu1 }
 0x30e   :  { %v1450_v60 = vadd.f32 %v5738_v39, %v1440_v44  ;;  %v1438_v48 = vadd.f32 %v1424_v45, %v1304_v43 }
 0x30f   :  { %v6774_v47 = vpop.f32.mrf.mxu0  ;;  %v6794_v50 = vpop.f32.mrf.mxu1 }
 0x310   :  { %v1453_v53 = vmax.f32 %v1450_v60, 0.0  ;;  %v1448_v54 = vadd.f32 %v5738_v39, %v1438_v48 }
 0x311   :  { %v1427_v55 = vpop.f32.mrf.mxu0  ;;  %v1610_v56 = vpop.f32.mrf.mxu1 }
 0x312   :  { %1456 = vst [vmem:[#allocation4 + $0x10] sm:$0xff] %v1453_v53  ;;  %v1451_v57 = vmax.f32 %v1448_v54, 0.0  ;;  %v1439_v49 = vadd.f32 %v1427_v55, %v1307_v51 }
 0x313   :  { %v6797_v58 = vpop.f32.mrf.mxu1 }
 0x314   :  { %1454 = vst [vmem:[#allocation4] sm:$0xff] %v1451_v57  ;;  %v1449_v59 = vadd.f32 %v5738_v39, %v1439_v49 }
 0x315   :  { %v1623_v61 = vpop.f32.mrf.mxu1 }
 0x316   :  { %v1452_v62 = vmax.f32 %v1449_v59, 0.0 }
 0x317   :  { %v6798_v63 = vpop.f32.mrf.mxu1 }
 0x318   :  { %1455 = vst [vmem:[#allocation4 + $0x8] sm:$0xff] %v1452_v62 }
 0x319   :  { %v1626_v40 = vpop.f32.mrf.mxu1 }
 0x31b   :  { %v6801_v41 = vpop.f32.mrf.mxu1 }
 0x31d   :  { %v1639_v0 = vpop.f32.mrf.mxu1 }
 0x31f   :  { %v8656_v52 = vpop.f32.mrf.mxu1 }
 0x321   :  { %v8658_v1 = vpop.f32.mrf.mxu1 }
 0x32b   :  { %v6821_v2 = vpop.f32.mrf.mxu0  ;;  %v6849_v3 = vpop.f32.mrf.mxu1 }
 0x32c   :  { %v1745_v4 = vadd.f32 %v6821_v2, %v6793_v42 }
 0x32d   :  { %v1736_v6 = vpop.f32.mrf.mxu0  ;;  %v1899_v7 = vpop.f32.mrf.mxu1 }
 0x32e   :  { %v1948_v8 = vadd.f32 %v6849_v3, %v1745_v4  ;;  %v1737_v9 = vadd.f32 %v1736_v6, %v1607_v46 }
 0x32f   :  { %v6822_v10 = vpop.f32.mrf.mxu0  ;;  %v6850_v11 = vpop.f32.mrf.mxu1 }
 0x330   :  { %v1967_v12 = vadd.f32 %v8663_v5, %v1948_v8  ;;  %v1946_v13 = vadd.f32 %v1899_v7, %v1737_v9  ;;  %v1748_v14 = vadd.f32 %v6822_v10, %v6794_v50 }
 0x331   :  { %v1739_v15 = vpop.f32.mrf.mxu0  ;;  %v1902_v16 = vpop.f32.mrf.mxu1 }
 0x332   :  { %v1979_v17 = vmax.f32 %v1967_v12, 0.0  ;;  %v1965_v18 = vadd.f32 %v8663_v5, %v1946_v13  ;;  %v1949_v19 = vadd.f32 %v6850_v11, %v1748_v14  ;;  %v1740_v20 = vadd.f32 %v1739_v15, %v1610_v56  ;;  %v7621_v12 = vld [vmem:[%s9097_s3 + $0xb8] sm:$0xff]  }
 0x333   :  { %v6825_v21 = vpop.f32.mrf.mxu0  ;;  %v6853_v22 = vpop.f32.mrf.mxu1 }
 0x334   :  { %1991 = vst [vmem:[#allocation2 + $0x71] sm:$0xff] %v1979_v17  ;;  %v1977_v23 = vmax.f32 %v1965_v18, 0.0  ;;  %v1968_v24 = vadd.f32 %v8663_v5, %v1949_v19  ;;  %v1947_v25 = vadd.f32 %v1902_v16, %v1740_v20  ;;  %v1761_v26 = vadd.f32 %v6825_v21, %v6797_v58  ;;  %v8685_v19 = vld [vmem:[#allocation3 + $0x30] sm:$0xff] }
 0x335   :  { %v1752_v27 = vpop.f32.mrf.mxu0  ;;  %v1915_v28 = vpop.f32.mrf.mxu1 }
 0x336   :  { %1989 = vst [vmem:[#allocation2 + $0x61] sm:$0xff] %v1977_v23  ;;  %v1980_v29 = vmax.f32 %v1968_v24, 0.0  ;;  %v1966_v30 = vadd.f32 %v8663_v5, %v1947_v25  ;;  %v1753_v31 = vadd.f32 %v1752_v27, %v1623_v61  ;;  %v1952_v32 = vadd.f32 %v6853_v22, %v1761_v26  ;;  %v7623_v26 = vld [vmem:[%s9097_s3 + $0xa8] sm:$0xff]   ;;  %v7624_v27 = vld [vmem:[%s9097_s3 + $0xa0] sm:$0xff]  }
 0x337   :  { %v6826_v33 = vpop.f32.mrf.mxu0  ;;  %v6854_v34 = vpop.f32.mrf.mxu1 }
 0x338   :  { %1992 = vst [vmem:[#allocation2 + $0x79] sm:$0xff] %v1980_v29  ;;  %v1978_v35 = vmax.f32 %v1966_v30, 0.0  ;;  %v1971_v36 = vadd.f32 %v8663_v5, %v1952_v32  ;;  %v1764_v37 = vadd.f32 %v6826_v33, %v6798_v63  ;;  %v1950_v38 = vadd.f32 %v1915_v28, %v1753_v31  ;;  %v7625_v33 = vld [vmem:[%s9097_s3 + $0x98] sm:$0xff]  }
 0x339   :  { %v1755_v39 = vpop.f32.mrf.mxu0  ;;  %v1918_v42 = vpop.f32.mrf.mxu1 }
 0x33a   :  { %1990 = vst [vmem:[#allocation2 + $0x69] sm:$0xff] %v1978_v35  ;;  %v1983_v43 = vmax.f32 %v1971_v36, 0.0  ;;  %v1969_v44 = vadd.f32 %v8663_v5, %v1950_v38  ;;  %v1756_v45 = vadd.f32 %v1755_v39, %v1626_v40  ;;  %v1953_v46 = vadd.f32 %v6854_v34, %v1764_v37  ;;  %v7626_v35 = vld [vmem:[%s9097_s3 + $0x90] sm:$0xff]   ;;  %v7627_v36 = vld [vmem:[%s9097_s3 + $0x88] sm:$0xff]   ;;  %v7628_v37 = vld [vmem:[%s9097_s3 + $0x80] sm:$0xff]  }
 0x33b   :  { %v6829_v60 = vpop.f32.mrf.mxu0  ;;  %v6857_v48 = vpop.f32.mrf.mxu1 }
 0x33c   :  { %1995 = vst [vmem:[#allocation2 + $0x91] sm:$0xff] %v1983_v43  ;;  %v1981_v47 = vmax.f32 %v1969_v44, 0.0  ;;  %v1972_v50 = vadd.f32 %v8663_v5, %v1953_v46  ;;  %v1777_v51 = vadd.f32 %v6829_v60, %v6801_v41  ;;  %v1951_v53 = vadd.f32 %v1918_v42, %v1756_v45 }
 0x33d   :  { %v1768_v54 = vpop.f32.mrf.mxu0  ;;  %v1931_v55 = vpop.f32.mrf.mxu1 }
 0x33e   :  { %1993 = vst [vmem:[#allocation2 + $0x81] sm:$0xff] %v1981_v47  ;;  %v1984_v56 = vmax.f32 %v1972_v50, 0.0  ;;  %v1970_v57 = vadd.f32 %v8663_v5, %v1951_v53  ;;  %v1769_v49 = vadd.f32 %v1768_v54, %v1639_v0  ;;  %v1956_v58 = vadd.f32 %v6857_v48, %v1777_v51  ;;  %v7629_v47 = vld [vmem:[%s9099_s5 + $0x78] sm:$0xff]   ;;  %v7631_v51 = vld [vmem:[%s9099_s5 + $0x70] sm:$0xff]   ;;  %v7633_v54 = vld [vmem:[%s9099_s5 + $0x68] sm:$0xff]  }
 0x33f   :  { %v6830_v59 = vpop.f32.mrf.mxu0  ;;  %v6858_v61 = vpop.f32.mrf.mxu1  ;;  %v2035_v11 = vld [vmem:[#allocation2 + $0x71] ss:$2 sm:$0xff]  ;;  %v2276_v39 = vld [vmem:[#allocation2 + $0x72] ss:$2 sm:$0xff]  ;;  %6943 = vmatprep.subr.bf16.mxu1 %v7629_v47 }
 0x340   :  { %1996 = vst [vmem:[#allocation2 + $0x99] sm:$0xff] %v1984_v56  ;;  %v1982_v62 = vmax.f32 %v1970_v57, 0.0  ;;  %v1975_v63 = vadd.f32 %v8663_v5, %v1956_v58  ;;  %v1780_v40 = vadd.f32 %v6830_v59, %v8656_v52  ;;  %v1954_v2 = vadd.f32 %v1931_v55, %v1769_v49  ;;  %v7630_v50 = vld [vmem:[%s9099_s5 + $0x38] sm:$0xff]   ;;  %v7632_v53 = vld [vmem:[%s9099_s5 + $0x30] sm:$0xff]   ;;  %v7634_v55 = vld [vmem:[%s9099_s5 + $0x28] sm:$0xff]  }
 0x341   :  { %v1771_v3 = vpop.f32.mrf.mxu0  ;;  %v1934_v41 = vpop.f32.mrf.mxu1  ;;  %v2033_v4 = vld [vmem:[#allocation2 + $0x61] ss:$2 sm:$0xff]  ;;  %v2002_v6 = vld [vmem:[#allocation2 + $0x60] ss:$2 sm:$0xff]  ;;  %v2004_v7 = vld [vmem:[#allocation2 + $0x70] ss:$2 sm:$0xff] }
 0x342   :  { %1994 = vst [vmem:[#allocation2 + $0x89] sm:$0xff] %v1982_v62  ;;  %v1987_v8 = vmax.f32 %v1975_v63, 0.0  ;;  %v1973_v9 = vadd.f32 %v8663_v5, %v1954_v2  ;;  %v1772_v0 = vadd.f32 %v1771_v3, %v8658_v1  ;;  %v1957_v10 = vadd.f32 %v6858_v61, %v1780_v40  ;;  %v7622_v1 = vld [vmem:[%s9097_s3 + $0xb0] sm:$0xff]   ;;  %v7635_v56 = vld [vmem:[%s9099_s5 + $0x60] sm:$0xff]   ;;  %v7637_v49 = vld [vmem:[%s9099_s5 + $0x58] sm:$0xff]  }
 0x343   :  { %v2044_v13 = vpack.c.bf16 %v2035_v11, %v2033_v4  ;;  %v2013_v52 = vpack.c.bf16 %v2004_v7, %v2002_v6  ;;  %v2274_v38 = vld [vmem:[#allocation2 + $0x62] ss:$2 sm:$0xff]  ;;  %v7638_v58 = vld [vmem:[%s9099_s5 + $0x18] sm:$0xff]  }
 0x344   :  { %1999 = vst [vmem:[#allocation2 + $0xb1] sm:$0xff] %v1987_v8  ;;  %v1985_v14 = vmax.f32 %v1973_v9, 0.0  ;;  %v1976_v15 = vadd.f32 %v8663_v5, %v1957_v10  ;;  %v1955_v16 = vadd.f32 %v1934_v41, %v1772_v0  ;;  %v2285_v42 = vpack.c.bf16 %v2276_v39, %v2274_v38  ;;  %v7636_v57 = vld [vmem:[%s9099_s5 + $0x20] sm:$0xff]   ;;  %v7639_v59 = vld [vmem:[%s9099_s5 + $0x50] sm:$0xff]   ;;  %v7641_v62 = vld [vmem:[%s9099_s5 + $0x48] sm:$0xff]  }
 0x345   :  { %6876 = vmatmul.mubr.bf16.vlgmr.msra.gmra.mxu0 %v2044_v13  ;;  %6904 = vmatmul.mubr.bf16.vlgmr.msra.gmra.mxu1 %v2013_v52  ;;  %v7640_v61 = vld [vmem:[%s9099_s5 + $0x10] sm:$0xff]   ;;  %v7642_v63 = vld [vmem:[%s9099_s5 + $0x8] sm:$0xff]   ;;  %v7643_v40 = vld [vmem:[%s9099_s5 + $0x40] sm:$0xff]  }
 0x346   :  { %1997 = vst [vmem:[#allocation2 + $0xa1] sm:$0xff] %v1985_v14  ;;  %v1988_v17 = vmax.f32 %v1976_v15, 0.0  ;;  %v1974_v18 = vadd.f32 %v8663_v5, %v1955_v16  ;;  %6916 = vmatpush3.bf16.msra.mxu0 %v7621_v12  ;;  %6879 = vmatprep.mubr.msk.bf16.mxu0 %vm7903_vm0, %v8685_v19  ;;  %v7644_v2 = vld [vmem:[%s9099_s5] sm:$0xff]   ;;  %v8777_v3 = vld [vmem:[%s9099_s5 + $0xb8] sm:$0xff]  }
 0x347   :  { %6917 = vmatprep.subr.bf16.mxu0 %v8685_v19  ;;  %6907 = vmatprep.mubr.msk.bf16.mxu1 %vm7903_vm0, %v8685_v19  ;;  %v2039_v21 = vld [vmem:[#allocation2 + $0x91] ss:$2 sm:$0xff]  ;;  %v2280_v44 = vld [vmem:[#allocation2 + $0x92] ss:$2 sm:$0xff] }
 0x348   :  { %2000 = vst [vmem:[#allocation2 + $0xb9] sm:$0x3f] %v1988_v17  ;;  %v1986_v20 = vmax.f32 %v1974_v18, 0.0  ;;  %6944 = vmatpush3.bf16.msra.mxu1 %v7629_v47 }
 0x349   :  { %v2037_v22 = vld [vmem:[#allocation2 + $0x81] ss:$2 sm:$0xff]  ;;  %v2006_v5 = vld [vmem:[#allocation2 + $0x80] ss:$2 sm:$0xff]  ;;  %v2008_v23 = vld [vmem:[#allocation2 + $0x90] ss:$2 sm:$0xff]  ;;  %6945 = vmatprep.subr.bf16.mxu1 %v7631_v51 }
 0x34a   :  { %1998 = vst [vmem:[#allocation2 + $0xa9] sm:$0xff] %v1986_v20  ;;  %6918 = vmatpush3.bf16.msra.mxu0 %v7622_v1  ;;  %v2045_v24 = vpack.c.bf16 %v2039_v21, %v2037_v22  ;;  %v2014_v25 = vpack.c.bf16 %v2008_v23, %v2006_v5  ;;  %v2278_v43 = vld [vmem:[#allocation2 + $0x82] ss:$2 sm:$0xff] }
 0x34b   :  { %6919 = vmatprep.subr.bf16.mxu0 %v8685_v19  ;;  %v2286_v45 = vpack.c.bf16 %v2280_v44, %v2278_v43 }
 0x34c   :  { %6946 = vmatpush3.bf16.msra.mxu1 %v7631_v51 }
 0x34d   :  { %6880 = vmatmul.mubr.bf16.gmra.mxu0 %v2045_v24  ;;  %6908 = vmatmul.mubr.bf16.gmra.mxu1 %v2014_v25 }
 0x34e   :  { %6920 = vmatpush3.bf16.msra.mxu0 %v7623_v26  ;;  %6883 = vmatprep.mubr.msk.bf16.mxu0 %vm7903_vm0, %v8685_v19 }
 0x34f   :  { %6921 = vmatprep.subr.bf16.mxu0 %v8685_v19  ;;  %6911 = vmatprep.mubr.msk.bf16.mxu1 %vm7903_vm0, %v8685_v19  ;;  %v2043_v28 = vld [vmem:[#allocation2 + $0xb1] ss:$2 sm:$0x7f]  ;;  %v2284_v60 = vld [vmem:[#allocation2 + $0xb2] ss:$2 sm:$0x7f] }
 0x350   :  { %6947 = vmatprep.subr.bf16.mxu1 %v7633_v54 }
 0x351   :  { %v2041_v29 = vld [vmem:[#allocation2 + $0xa1] ss:$2 sm:$0xff]  ;;  %v2010_v30 = vld [vmem:[#allocation2 + $0xa0] ss:$2 sm:$0xff]  ;;  %6948 = vmatpush3.bf16.msra.mxu1 %v7633_v54 }
 0x352   :  { %6922 = vmatpush3.bf16.msra.mxu0 %v7624_v27  ;;  %v2046_v31 = vpack.c.bf16 %v2043_v28, %v2041_v29  ;;  %v2012_v32 = vld [vmem:[#allocation2 + $0xb0] ss:$2 sm:$0x7f]  ;;  %6949 = vmatprep.subr.bf16.mxu1 %v7635_v56  ;;  %v5852_v27 = vld [vmem:[%s9098_s4] ss:$0 sm:$0xff] }
 0x353   :  { %6923 = vmatprep.subr.bf16.mxu0 %v8685_v19  ;;  %v2015_v34 = vpack.c.bf16 %v2012_v32, %v2010_v30  ;;  %v2282_v46 = vld [vmem:[#allocation2 + $0xa2] ss:$2 sm:$0xff] }
 0x354   :  { %v2287_v48 = vpack.c.bf16 %v2284_v60, %v2282_v46 }
 0x355   :  { %6884 = vmatmul.mubr.bf16.gmra.mxu0 %v2046_v31  ;;  %6912 = vmatmul.mubr.bf16.gmra.mxu1 %v2015_v34 }
 0x356   :  { %6924 = vmatpush3.bf16.msra.mxu0 %v7625_v33  ;;  %6931 = vmatprep.mubr.msk.bf16.mxu0 %vm7903_vm0, %v8685_v19 }
 0x357   :  { %6925 = vmatprep.subr.bf16.mxu0 %v8685_v19  ;;  %6950 = vmatpush3.bf16.msra.mxu1 %v7635_v56 }
 0x358   :  { %6951 = vmatprep.subr.bf16.mxu1 %v7637_v49 }
 0x35a   :  { %6926 = vmatpush3.bf16.msra.mxu0 %v7626_v35 }
 0x35b   :  { %6927 = vmatprep.subr.bf16.mxu0 %v8685_v19  ;;  %6952 = vmatpush3.bf16.msra.mxu1 %v7637_v49 }
 0x35c   :  { %6953 = vmatprep.subr.bf16.mxu1 %v7639_v59 }
 0x35e   :  { %6928 = vmatpush3.bf16.msra.mxu0 %v7627_v36 }
 0x35f   :  { %6929 = vmatprep.subr.bf16.mxu0 %v8685_v19  ;;  %6954 = vmatpush3.bf16.msra.mxu1 %v7639_v59 }
 0x360   :  { %6955 = vmatprep.subr.bf16.mxu1 %v7641_v62 }
 0x362   :  { %6930 = vmatpush3.bf16.msra.mxu0 %v7628_v37 }
 0x363   :  { %6963 = vmatprep.subr.bf16.mxu0 %v7630_v50  ;;  %6956 = vmatpush3.bf16.msra.mxu1 %v7641_v62 }
 0x364   :  { %6957 = vmatprep.subr.bf16.mxu1 %v7643_v40 }
 0x365   :  { %6932 = vmatmul.mubr.bf16.vlgmr.msra.gmra.mxu0 %v2285_v42 }
 0x366   :  { %6935 = vmatprep.mubr.msk.bf16.mxu0 %vm7903_vm0, %v8685_v19  ;;  %6964 = vmatpush3.bf16.msra.mxu0 %v7630_v50 }
 0x367   :  { %6965 = vmatprep.subr.bf16.mxu0 %v7632_v53  ;;  %6958 = vmatpush3.bf16.msra.mxu1 %v7643_v40 }
 0x368   :  { %6983 = vmatprep.subr.bf16.mxu1 %v8777_v3 }
 0x36a   :  { %6966 = vmatpush3.bf16.msra.mxu0 %v7632_v53 }
 0x36b   :  { %6967 = vmatprep.subr.bf16.mxu0 %v7634_v55 }
 0x36d   :  { %6936 = vmatmul.mubr.bf16.gmra.mxu0 %v2286_v45 }
 0x36e   :  { %6939 = vmatprep.mubr.msk.bf16.mxu0 %vm7903_vm0, %v8685_v19  ;;  %6968 = vmatpush3.bf16.msra.mxu0 %v7634_v55 }
 0x36f   :  { %6969 = vmatprep.subr.bf16.mxu0 %v7636_v57 }
 0x372   :  { %6970 = vmatpush3.bf16.msra.mxu0 %v7636_v57 }
 0x373   :  { %6971 = vmatprep.subr.bf16.mxu0 %v7638_v58 }
 0x375   :  { %6940 = vmatmul.mubr.bf16.gmra.mxu0 %v2287_v48 }
 0x376   :  { %6972 = vmatpush3.bf16.msra.mxu0 %v7638_v58 }
 0x377   :  { %6973 = vmatprep.subr.bf16.mxu0 %v7640_v61 }
 0x37a   :  { %6974 = vmatpush3.bf16.msra.mxu0 %v7640_v61 }
 0x37b   :  { %6975 = vmatprep.subr.bf16.mxu0 %v7642_v63 }
 0x37e   :  { %6976 = vmatpush3.bf16.msra.mxu0 %v7642_v63 }
 0x37f   :  { %6977 = vmatprep.subr.bf16.mxu0 %v7644_v2 }
 0x382   :  { %6978 = vmatpush3.bf16.msra.mxu0 %v7644_v2 }
 0x383   :  { %7003 = vmatprep.subr.bf16.mxu0 %v8685_v19 }
 0x405   :  { %v2145_v41 = vpop.f32.mrf.mxu0  ;;  %v2250_v4 = vpop.f32.mrf.mxu1 }
 0x406   :  { %v2251_v25 = vadd.f32 %v2250_v4, %v2145_v41 }
 0x407   :  { %v6877_v6 = vpop.f32.mrf.mxu0  ;;  %v6905_v7 = vpop.f32.mrf.mxu1 }
 0x409   :  { %v2148_v8 = vpop.f32.mrf.mxu0  ;;  %v2253_v9 = vpop.f32.mrf.mxu1 }
 0x40a   :  { %v2254_v30 = vadd.f32 %v2253_v9, %v2148_v8 }
 0x40b   :  { %v6878_v0 = vpop.f32.mrf.mxu0  ;;  %v6906_v10 = vpop.f32.mrf.mxu1 }
 0x40d   :  { %v2153_v11 = vpop.f32.mrf.mxu0  ;;  %v2258_v12 = vpop.f32.mrf.mxu1 }
 0x40e   :  { %v2259_v36 = vadd.f32 %v2258_v12, %v2153_v11 }
 0x40f   :  { %v6881_v13 = vpop.f32.mrf.mxu0  ;;  %v6909_v52 = vpop.f32.mrf.mxu1 }
 0x410   :  { %v7646_v52 = vld [vmem:[%s9099_s5 + $0xb0] sm:$0xff]  }
 0x411   :  { %v2156_v14 = vpop.f32.mrf.mxu0  ;;  %v2261_v15 = vpop.f32.mrf.mxu1 }
 0x412   :  { %v2262_v44 = vadd.f32 %v2261_v15, %v2156_v14  ;;  %v7647_v15 = vld [vmem:[%s9099_s5 + $0xa8] sm:$0xff]  }
 0x413   :  { %v6882_v16 = vpop.f32.mrf.mxu0  ;;  %v6910_v17 = vpop.f32.mrf.mxu1 }
 0x414   :  { %v7648_v16 = vld [vmem:[%s9099_s5 + $0xa0] sm:$0xff]   ;;  %v7650_v17 = vld [vmem:[%s9099_s5 + $0x90] sm:$0xff]  }
 0x415   :  { %v2161_v18 = vpop.f32.mrf.mxu0  ;;  %v2266_v1 = vpop.f32.mrf.mxu1 }
 0x416   :  { %v2267_v50 = vadd.f32 %v2266_v1, %v2161_v18  ;;  %v7651_v18 = vld [vmem:[%s9099_s5 + $0x88] sm:$0xff]   ;;  %v7652_v1 = vld [vmem:[%s9099_s5 + $0x80] sm:$0xff]  }
 0x417   :  { %v6885_v20 = vpop.f32.mrf.mxu0  ;;  %v6913_v21 = vpop.f32.mrf.mxu1 }
 0x419   :  { %v2164_v22 = vpop.f32.mrf.mxu0  ;;  %v2269_v5 = vpop.f32.mrf.mxu1 }
 0x41a   :  { %v2270_v57 = vadd.f32 %v2269_v5, %v2164_v22  ;;  %v7653_v22 = vld [vmem:[#allocation5 + $0x78] sm:$0xff]  }
 0x41b   :  { %v6886_v23 = vpop.f32.mrf.mxu0  ;;  %v6914_v24 = vpop.f32.mrf.mxu1  ;;  %v7654_v5 = vld [vmem:[#allocation5 + $0x38] sm:$0xff]  }
 0x41c   :  { %v7655_v23 = vld [vmem:[#allocation5 + $0x70] sm:$0xff]  }
 0x41d   :  { %v7656_v24 = vld [vmem:[#allocation5 + $0x30] sm:$0xff]  }
 0x425   :  { %v2386_v26 = vpop.f32.mrf.mxu0 }
 0x426   :  { %v2409_v28 = vadd.f32 %v2386_v26, %v2251_v25  ;;  %v7657_v25 = vld [vmem:[#allocation5 + $0x68] sm:$0xff]  }
 0x427   :  { %v6933_v29 = vpop.f32.mrf.mxu0  ;;  %v7658_v26 = vld [vmem:[#allocation5 + $0x28] sm:$0xff]  }
 0x428   :  { %v2422_v31 = vadd.f32 %v5852_v27, %v2409_v28  ;;  %v7660_v28 = vld [vmem:[#allocation5 + $0x20] sm:$0xff]   ;;  %v7661_v29 = vld [vmem:[#allocation5 + $0x58] sm:$0xff]  }
 0x429   :  { %v2389_v32 = vpop.f32.mrf.mxu0 }
 0x42a   :  { %v2428_v33 = vmax.f32 %v2422_v31, 0.0  ;;  %v2410_v34 = vadd.f32 %v2389_v32, %v2254_v30  ;;  %v7662_v30 = vld [vmem:[#allocation5 + $0x18] sm:$0xff]   ;;  %v7663_v31 = vld [vmem:[#allocation5 + $0x50] sm:$0xff]  }
 0x42b   :  { %v6934_v35 = vpop.f32.mrf.mxu0  ;;  %v7664_v32 = vld [vmem:[#allocation5 + $0x10] sm:$0xff]  }
 0x42c   :  { %2434 = vst [vmem:[#allocation3 + $0x32] sm:$0xff] %v2428_v33  ;;  %v2423_v37 = vadd.f32 %v5852_v27, %v2410_v34  ;;  %v7665_v33 = vld [vmem:[#allocation5 + $0x48] sm:$0xff]   ;;  %v7667_v35 = vld [vmem:[#allocation5 + $0x40] sm:$0xff]  }
 0x42d   :  { %v2394_v38 = vpop.f32.mrf.mxu0  ;;  %v7666_v34 = vld [vmem:[#allocation5 + $0x8] sm:$0xff]  }
 0x42e   :  { %v2429_v39 = vmax.f32 %v2423_v37, 0.0  ;;  %v2411_v42 = vadd.f32 %v2394_v38, %v2259_v36  ;;  %v7668_v36 = vld [vmem:[#allocation5] sm:$0xff]  }
 0x42f   :  { %v6937_v43 = vpop.f32.mrf.mxu0 }
 0x430   :  { %2435 = vst [vmem:[#allocation3 + $0x3a] sm:$0xff] %v2429_v39  ;;  %v2424_v45 = vadd.f32 %v5852_v27, %v2411_v42 }
 0x431   :  { %v2397_v46 = vpop.f32.mrf.mxu0 }
 0x432   :  { %v2430_v60 = vmax.f32 %v2424_v45, 0.0  ;;  %v2412_v48 = vadd.f32 %v2397_v46, %v2262_v44 }
 0x433   :  { %v6938_v47 = vpop.f32.mrf.mxu0 }
 0x434   :  { %2436 = vst [vmem:[#allocation3 + $0x42] sm:$0xff] %v2430_v60  ;;  %v2425_v51 = vadd.f32 %v5852_v27, %v2412_v48  ;;  %v5909_v48 = vld [vmem:[%s9100_s6] ss:$0 sm:$0xff] }
 0x435   :  { %v2402_v53 = vpop.f32.mrf.mxu0 }
 0x436   :  { %v2431_v54 = vmax.f32 %v2425_v51, 0.0  ;;  %v2413_v55 = vadd.f32 %v2402_v53, %v2267_v50 }
 0x437   :  { %v6941_v56 = vpop.f32.mrf.mxu0  ;;  %v2465_v2 = vld [vmem:[#allocation3 + $0x32] ss:$2 sm:$0xff]  ;;  %v2441_v4 = vld [vmem:[#allocation3 + $0x31] ss:$2 sm:$0xff] }
 0x438   :  { %2437 = vst [vmem:[#allocation3 + $0x4a] sm:$0xff] %v2431_v54  ;;  %v2426_v49 = vadd.f32 %v5852_v27, %v2413_v55  ;;  %v2681_v13 = vld [vmem:[#allocation3 + $0x33] ss:$2 sm:$0xff] }
 0x439   :  { %v2405_v58 = vpop.f32.mrf.mxu0 }
 0x43a   :  { %v2432_v59 = vmax.f32 %v2426_v49, 0.0  ;;  %v2414_v61 = vadd.f32 %v2405_v58, %v2270_v57 }
 0x43b   :  { %v6942_v62 = vpop.f32.mrf.mxu0 }
 0x43c   :  { %2438 = vst [vmem:[#allocation3 + $0x52] sm:$0xff] %v2432_v59  ;;  %v2427_v63 = vadd.f32 %v5852_v27, %v2414_v61  ;;  %v7659_v27 = vld [vmem:[#allocation5 + $0x60] sm:$0xff]  }
 0x43e   :  { %v2433_v40 = vmax.f32 %v2427_v63, 0.0 }
 0x43f   :  { %v2467_v41 = vld [vmem:[#allocation3 + $0x42] ss:$2 sm:$0xff]  ;;  %v2443_v6 = vld [vmem:[#allocation3 + $0x41] ss:$2 sm:$0xff] }
 0x440   :  { %2439 = vst [vmem:[#allocation3 + $0x5a] sm:$0x7f] %v2433_v40  ;;  %v2470_v7 = vpack.c.bf16 %v2467_v41, %v2465_v2  ;;  %v2446_v8 = vpack.c.bf16 %v2443_v6, %v2441_v4  ;;  %v2683_v9 = vld [vmem:[#allocation3 + $0x43] ss:$2 sm:$0xff] }
 0x441   :  { %v2686_v14 = vpack.c.bf16 %v2683_v9, %v2681_v13  ;;  %v7669_v2 = vld [vmem:[#allocation5 + $0xb8] sm:$0xff]   ;;  %v7671_v9 = vld [vmem:[#allocation5 + $0xb0] sm:$0xff]   ;;  %v7676_v13 = vld [vmem:[#allocation5 + $0xe0] sm:$0xff]  }
 0x442   :  { %6959 = vmatprep.mubr.bf16.mxu1 %v2470_v7  ;;  %6979 = vmatprep.mubr.bf16.mxu0 %v2446_v8  ;;  %v7670_v41 = vld [vmem:[#allocation5 + $0xf8] sm:$0xff]  }
 0x447   :  { %v2469_v0 = vld [vmem:[#allocation3 + $0x52] ss:$2 sm:$0xff]  ;;  %v2445_v10 = vld [vmem:[#allocation3 + $0x51] ss:$2 sm:$0xff] }
 0x448   :  { %v2471_v11 = vpack.c.bf16 %v2469_v0, %v2469_v0  ;;  %v2447_v12 = vpack.c.bf16 %v2445_v10, %v2445_v10  ;;  %v2685_v20 = vld [vmem:[#allocation3 + $0x53] ss:$2 sm:$0xff]  ;;  %v7672_v0 = vld [vmem:[#allocation5 + $0xf0] sm:$0xff]  }
 0x449   :  { %v2687_v21 = vpack.c.bf16 %v2685_v20, %v2685_v20  ;;  %v7673_v10 = vld [vmem:[#allocation5 + $0xa8] sm:$0xff]  }
 0x44a   :  { %6960 = vmatmul.mubr.bf16.vlgmr.msra.gmra.mxu1 %v2471_v11  ;;  %6980 = vmatmul.mubr.bf16.vlgmr.msra.gmra.mxu0 %v2447_v12  ;;  %v7674_v11 = vld [vmem:[#allocation5 + $0xe8] sm:$0xff]   ;;  %v7675_v12 = vld [vmem:[#allocation5 + $0xa0] sm:$0xff]  }
 0x44b   :  { %6984 = vmatpush3.bf16.msra.mxu1 %v8777_v3  ;;  %6999 = vmatprep.mubr.bf16.mxu1 %v2686_v14  ;;  %v7649_v3 = vld [vmem:[%s9099_s5 + $0x98] sm:$0xff]   ;;  %v7678_v14 = vld [vmem:[#allocation5 + $0xd8] sm:$0xff]  }
 0x44c   :  { %6985 = vmatprep.subr.bf16.mxu1 %v7646_v52  ;;  %7019 = vmatprep.mubr.msk.bf16.mxu0 %vm7903_vm0, %v8685_v19 }
 0x44d   :  { %7004 = vmatpush3.bf16.msra.mxu0 %v7653_v22  ;;  %v7685_v22 = vld [vmem:[#allocation5 + $0x138] sm:$0xff]  }
 0x44e   :  { %7005 = vmatprep.subr.bf16.mxu0 %v8685_v19 }
 0x44f   :  { %6986 = vmatpush3.bf16.msra.mxu1 %v7646_v52  ;;  %v7677_v52 = vld [vmem:[#allocation5 + $0x98] sm:$0xff]  }
 0x450   :  { %6987 = vmatprep.subr.bf16.mxu1 %v7647_v15 }
 0x451   :  { %7006 = vmatpush3.bf16.msra.mxu0 %v7655_v23 }
 0x452   :  { %7007 = vmatprep.subr.bf16.mxu0 %v8685_v19 }
 0x453   :  { %6988 = vmatpush3.bf16.msra.mxu1 %v7647_v15  ;;  %v7679_v15 = vld [vmem:[#allocation5 + $0x90] sm:$0xff]  }
 0x454   :  { %6989 = vmatprep.subr.bf16.mxu1 %v7648_v16 }
 0x455   :  { %7008 = vmatpush3.bf16.msra.mxu0 %v7657_v25  ;;  %v7687_v25 = vld [vmem:[#allocation5 + $0x130] sm:$0xff]  }
 0x456   :  { %7009 = vmatprep.subr.bf16.mxu0 %v8685_v19 }
 0x457   :  { %6990 = vmatpush3.bf16.msra.mxu1 %v7648_v16  ;;  %v7680_v16 = vld [vmem:[#allocation5 + $0xd0] sm:$0xff]  }
 0x458   :  { %6991 = vmatprep.subr.bf16.mxu1 %v7649_v3 }
 0x459   :  { %7010 = vmatpush3.bf16.msra.mxu0 %v7659_v27  ;;  %v7689_v27 = vld [vmem:[#allocation5 + $0x128] sm:$0xff]  }
 0x45a   :  { %7011 = vmatprep.subr.bf16.mxu0 %v8685_v19 }
 0x45b   :  { %6992 = vmatpush3.bf16.msra.mxu1 %v7649_v3  ;;  %v7681_v3 = vld [vmem:[#allocation5 + $0x88] sm:$0xff]  }
 0x45c   :  { %6993 = vmatprep.subr.bf16.mxu1 %v7650_v17 }
 0x45d   :  { %7012 = vmatpush3.bf16.msra.mxu0 %v7661_v29  ;;  %v7691_v29 = vld [vmem:[#allocation5 + $0x120] sm:$0xff]  }
 0x45e   :  { %7013 = vmatprep.subr.bf16.mxu0 %v8685_v19 }
 0x45f   :  { %6994 = vmatpush3.bf16.msra.mxu1 %v7650_v17  ;;  %v7682_v17 = vld [vmem:[#allocation5 + $0xc8] sm:$0xff]  }
 0x460   :  { %6995 = vmatprep.subr.bf16.mxu1 %v7651_v18 }
 0x461   :  { %7014 = vmatpush3.bf16.msra.mxu0 %v7663_v31  ;;  %v7693_v31 = vld [vmem:[#allocation5 + $0x118] sm:$0xff]  }
 0x462   :  { %7015 = vmatprep.subr.bf16.mxu0 %v8685_v19 }
 0x463   :  { %6996 = vmatpush3.bf16.msra.mxu1 %v7651_v18  ;;  %v7683_v18 = vld [vmem:[#allocation5 + $0x80] sm:$0xff]  }
 0x464   :  { %6997 = vmatprep.subr.bf16.mxu1 %v7652_v1 }
 0x465   :  { %7016 = vmatpush3.bf16.msra.mxu0 %v7665_v33  ;;  %v7695_v33 = vld [vmem:[#allocation5 + $0x110] sm:$0xff]  }
 0x466   :  { %7017 = vmatprep.subr.bf16.mxu0 %v8685_v19 }
 0x467   :  { %6998 = vmatpush3.bf16.msra.mxu1 %v7652_v1  ;;  %v7684_v1 = vld [vmem:[#allocation5 + $0xc0] sm:$0xff]  }
 0x468   :  { %7023 = vmatprep.subr.bf16.mxu1 %v8685_v19 }
 0x469   :  { %7018 = vmatpush3.bf16.msra.mxu0 %v7667_v35  ;;  %v7697_v35 = vld [vmem:[#allocation5 + $0x108] sm:$0xff]  }
 0x46a   :  { %7000 = vmatmul.mubr.bf16.vlgmr.msra.gmra.mxu1 %v2687_v21  ;;  %7043 = vmatprep.subr.bf16.mxu0 %v8685_v19 }
 0x46b   :  { %7039 = vmatprep.mubr.msk.bf16.mxu1 %vm7903_vm0, %v8685_v19  ;;  %7024 = vmatpush3.bf16.msra.mxu1 %v7654_v5  ;;  %v7686_v5 = vld [vmem:[#allocation5 + $0x178] sm:$0xff]  }
 0x46c   :  { %7025 = vmatprep.subr.bf16.mxu1 %v8685_v19 }
 0x46f   :  { %7026 = vmatpush3.bf16.msra.mxu1 %v7656_v24 }
 0x470   :  { %7027 = vmatprep.subr.bf16.mxu1 %v8685_v19 }
 0x473   :  { %7028 = vmatpush3.bf16.msra.mxu1 %v7658_v26  ;;  %v7688_v26 = vld [vmem:[#allocation5 + $0x170] sm:$0xff]  }
 0x474   :  { %7029 = vmatprep.subr.bf16.mxu1 %v8685_v19 }
 0x477   :  { %7030 = vmatpush3.bf16.msra.mxu1 %v7660_v28  ;;  %v7690_v28 = vld [vmem:[#allocation5 + $0x168] sm:$0xff]  }
 0x478   :  { %7031 = vmatprep.subr.bf16.mxu1 %v8685_v19 }
 0x47b   :  { %7032 = vmatpush3.bf16.msra.mxu1 %v7662_v30  ;;  %v7692_v30 = vld [vmem:[#allocation5 + $0x160] sm:$0xff]  }
 0x47c   :  { %7033 = vmatprep.subr.bf16.mxu1 %v8685_v19 }
 0x47f   :  { %7034 = vmatpush3.bf16.msra.mxu1 %v7664_v32  ;;  %v7694_v32 = vld [vmem:[#allocation5 + $0x158] sm:$0xff]  }
 0x480   :  { %7035 = vmatprep.subr.bf16.mxu1 %v8685_v19 }
 0x483   :  { %7036 = vmatpush3.bf16.msra.mxu1 %v7666_v34  ;;  %v7696_v34 = vld [vmem:[#allocation5 + $0x150] sm:$0xff]  }
 0x484   :  { %7037 = vmatprep.subr.bf16.mxu1 %v8685_v19 }
 0x487   :  { %7038 = vmatpush3.bf16.msra.mxu1 %v7668_v36  ;;  %v7698_v36 = vld [vmem:[#allocation5 + $0x148] sm:$0xff]  }
 0x488   :  { %7063 = vmatprep.subr.bf16.mxu1 %v8685_v19 }
 0x50a   :  { %v6961_v37 = vpop.f32.mrf.mxu1  ;;  %v6981_v38 = vpop.f32.mrf.mxu0 }
 0x50b   :  { %v2675_v46 = vadd.f32 %v6981_v38, %v6961_v37  ;;  %v7699_v37 = vld [vmem:[#allocation5 + $0x100] sm:$0xff]  }
 0x50c   :  { %v2570_v39 = vpop.f32.mrf.mxu1  ;;  %v2666_v42 = vpop.f32.mrf.mxu0  ;;  %v7700_v38 = vld [vmem:[#allocation5 + $0x140] sm:$0xff]  }
 0x50d   :  { %v2667_v47 = vadd.f32 %v2666_v42, %v2570_v39 }
 0x50e   :  { %v6962_v43 = vpop.f32.mrf.mxu1  ;;  %v6982_v44 = vpop.f32.mrf.mxu0 }
 0x50f   :  { %v7701_v43 = vld [vmem:[#allocation5 + $0x1b8] sm:$0xff]  }
 0x510   :  { %v2573_v45 = vpop.f32.mrf.mxu1  ;;  %v2669_v51 = vpop.f32.mrf.mxu0  ;;  %v7702_v44 = vld [vmem:[#allocation5 + $0x1f8] sm:$0xff]  }
 0x511   :  { %v2670_v57 = vadd.f32 %v2669_v51, %v2573_v45  ;;  %v7707_v51 = vld [vmem:[#allocation5 + $0x1a0] sm:$0xff]  }
 0x52a   :  { %v7001_v60 = vpop.f32.mrf.mxu1 }
 0x52b   :  { %v2802_v50 = vadd.f32 %v7001_v60, %v2675_v46  ;;  %v7703_v60 = vld [vmem:[#allocation5 + $0x1b0] sm:$0xff]  }
 0x52c   :  { %v2786_v53 = vpop.f32.mrf.mxu1 }
 0x52d   :  { %v2812_v54 = vadd.f32 %v5909_v48, %v2802_v50  ;;  %v2800_v55 = vadd.f32 %v2786_v53, %v2667_v47  ;;  %v7705_v47 = vld [vmem:[#allocation5 + $0x1a8] sm:$0xff]   ;;  %v7708_v53 = vld [vmem:[#allocation5 + $0x1e0] sm:$0xff]  }
 0x52e   :  { %v7002_v56 = vpop.f32.mrf.mxu1  ;;  %v7706_v50 = vld [vmem:[#allocation5 + $0x1e8] sm:$0xff]  }
 0x52f   :  { %v2815_v49 = vmax.f32 %v2812_v54, 0.0  ;;  %v2810_v58 = vadd.f32 %v5909_v48, %v2800_v55  ;;  %v7709_v54 = vld [vmem:[#allocation5 + $0x198] sm:$0xff]   ;;  %v7711_v56 = vld [vmem:[#allocation5 + $0x190] sm:$0xff]  }
 0x530   :  { %v2789_v59 = vpop.f32.mrf.mxu1  ;;  %v7710_v55 = vld [vmem:[#allocation5 + $0x1d8] sm:$0xff]  }
 0x531   :  { %2818 = vst [vmem:[#allocation4 + $0x28] sm:$0xff] %v2815_v49  ;;  %v2813_v61 = vmax.f32 %v2810_v58, 0.0  ;;  %v2801_v62 = vadd.f32 %v2789_v59, %v2670_v57  ;;  %v7712_v57 = vld [vmem:[#allocation5 + $0x1d0] sm:$0xff]   ;;  %v7713_v49 = vld [vmem:[#allocation5 + $0x188] sm:$0xff]   ;;  %v7715_v59 = vld [vmem:[#allocation5 + $0x180] sm:$0xff]  }
 0x532   :  { %v7714_v58 = vld [vmem:[#allocation5 + $0x1c8] sm:$0xff]  }
 0x533   :  { %2816 = vst [vmem:[#allocation4 + $0x18] sm:$0xff] %v2813_v61  ;;  %v2811_v63 = vadd.f32 %v5909_v48, %v2801_v62  ;;  %v7704_v48 = vld [vmem:[#allocation5 + $0x1f0] sm:$0xff]   ;;  %v7716_v61 = vld [vmem:[#allocation5 + $0x1c0] sm:$0xff]  }
 0x535   :  { %v2814_v40 = vmax.f32 %v2811_v63, 0.0 }
 0x537   :  { %2817 = vst [vmem:[#allocation4 + $0x20] sm:$0xff] %v2814_v40  ;;  %v7717_v40 = vld [vmem:[#allocation5 + $0x238] sm:$0xff]  }
 0x53a   :  { %v2838_v4 = vld [vmem:[#allocation4 + $0x1] ss:$24 sm:$0x3]  ;;  %v2819_v6 = vld [vmem:[#allocation4] ss:$24 sm:$0x3] }
 0x53b   :  { %v2839_v7 = vpack.c.bf16 %v2838_v4, %v2838_v4  ;;  %v2820_v8 = vpack.c.bf16 %v2819_v6, %v2819_v6  ;;  %v3034_v20 = vld [vmem:[#allocation4 + $0x2] ss:$24 sm:$0x3]  ;;  %v3143_v21 = vld [vmem:[#allocation4 + $0x3] ss:$24 sm:$0x3] }
 0x53c   :  { %v3035_v23 = vpack.c.bf16 %v3034_v20, %v3034_v20  ;;  %v3144_v24 = vpack.c.bf16 %v3143_v21, %v3143_v21  ;;  %v3252_v39 = vld [vmem:[#allocation4 + $0x4] ss:$24 sm:$0x3]  ;;  %v3361_v42 = vld [vmem:[#allocation4 + $0x5] ss:$24 sm:$0x3] }
 0x53d   :  { %7020 = vmatmul.mubr.bf16.vlgmr.msra.gmra.mxu0 %v2839_v7  ;;  %7040 = vmatmul.mubr.bf16.vlgmr.msra.gmra.mxu1 %v2820_v8  ;;  %v3253_v45 = vpack.c.bf16 %v3252_v39, %v3252_v39  ;;  %v3362_v46 = vpack.c.bf16 %v3361_v42, %v3361_v42  ;;  %v3470_v62 = vld [vmem:[#allocation4 + $0x6] ss:$24 sm:$0x3]  ;;  %v3579_v63 = vld [vmem:[#allocation4 + $0x7] ss:$24 sm:$0x3] }
 0x53e   :  { %7044 = vmatpush3.bf16.msra.mxu0 %v7669_v2  ;;  %7064 = vmatpush3.bf16.msra.mxu1 %v7670_v41  ;;  %v7718_v2 = vld [vmem:[#allocation5 + $0x278] sm:$0xff]   ;;  %v3471_v41 = vpack.c.bf16 %v3470_v62, %v3470_v62  ;;  %v3580_v4 = vpack.c.bf16 %v3579_v63, %v3579_v63  ;;  %v7719_v6 = vld [vmem:[#allocation5 + $0x230] sm:$0xff]   ;;  %v7721_v8 = vld [vmem:[#allocation5 + $0x228] sm:$0xff]  }
 0x53f   :  { %7045 = vmatprep.subr.bf16.mxu0 %v8685_v19  ;;  %7065 = vmatprep.subr.bf16.mxu1 %v8685_v19  ;;  %v7720_v7 = vld [vmem:[#allocation5 + $0x270] sm:$0xff]   ;;  %v7734_v20 = vld [vmem:[#allocation5 + $0x2f8] sm:$0xff]  }
 0x540   :  { %7059 = vmatprep.mubr.msk.bf16.mxu0 %vm7903_vm0, %v8685_v19  ;;  %7079 = vmatprep.mubr.msk.bf16.mxu1 %vm7903_vm0, %v8685_v19  ;;  %v7750_v39 = vld [vmem:[#allocation5 + $0x378] sm:$0xff]  }
 0x541   :  { %v7766_v62 = vld [vmem:[#allocation5 + $0x3f8] sm:$0xff]  }
 0x542   :  { %7046 = vmatpush3.bf16.msra.mxu0 %v7671_v9  ;;  %7066 = vmatpush3.bf16.msra.mxu1 %v7672_v0  ;;  %v7722_v9 = vld [vmem:[#allocation5 + $0x268] sm:$0xff]   ;;  %v7723_v0 = vld [vmem:[#allocation5 + $0x220] sm:$0xff]  }
 0x543   :  { %7047 = vmatprep.subr.bf16.mxu0 %v8685_v19  ;;  %7067 = vmatprep.subr.bf16.mxu1 %v8685_v19 }
 0x546   :  { %7048 = vmatpush3.bf16.msra.mxu0 %v7673_v10  ;;  %7068 = vmatpush3.bf16.msra.mxu1 %v7674_v11  ;;  %v7724_v10 = vld [vmem:[#allocation5 + $0x260] sm:$0xff]   ;;  %v7725_v11 = vld [vmem:[#allocation5 + $0x218] sm:$0xff]  }
 0x547   :  { %7049 = vmatprep.subr.bf16.mxu0 %v8685_v19  ;;  %7069 = vmatprep.subr.bf16.mxu1 %v8685_v19 }
 0x54a   :  { %7050 = vmatpush3.bf16.msra.mxu0 %v7675_v12  ;;  %7070 = vmatpush3.bf16.msra.mxu1 %v7676_v13  ;;  %v7726_v12 = vld [vmem:[#allocation5 + $0x258] sm:$0xff]   ;;  %v7727_v13 = vld [vmem:[#allocation5 + $0x210] sm:$0xff]  }
 0x54b   :  { %7051 = vmatprep.subr.bf16.mxu0 %v8685_v19  ;;  %7071 = vmatprep.subr.bf16.mxu1 %v8685_v19 }
 0x54e   :  { %7052 = vmatpush3.bf16.msra.mxu0 %v7677_v52  ;;  %7072 = vmatpush3.bf16.msra.mxu1 %v7678_v14  ;;  %v7728_v52 = vld [vmem:[#allocation5 + $0x250] sm:$0xff]   ;;  %v7729_v14 = vld [vmem:[#allocation5 + $0x208] sm:$0xff]  }
 0x54f   :  { %7053 = vmatprep.subr.bf16.mxu0 %v8685_v19  ;;  %7073 = vmatprep.subr.bf16.mxu1 %v8685_v19 }
 0x552   :  { %7054 = vmatpush3.bf16.msra.mxu0 %v7679_v15  ;;  %7074 = vmatpush3.bf16.msra.mxu1 %v7680_v16  ;;  %v7730_v15 = vld [vmem:[#allocation5 + $0x248] sm:$0xff]   ;;  %v7731_v16 = vld [vmem:[#allocation5 + $0x200] sm:$0xff]  }
 0x553   :  { %7055 = vmatprep.subr.bf16.mxu0 %v8685_v19  ;;  %7075 = vmatprep.subr.bf16.mxu1 %v8685_v19 }
 0x556   :  { %7056 = vmatpush3.bf16.msra.mxu0 %v7681_v3  ;;  %7076 = vmatpush3.bf16.msra.mxu1 %v7682_v17  ;;  %v7732_v3 = vld [vmem:[#allocation5 + $0x240] sm:$0xff]   ;;  %v3688_v17 = vld [vmem:[#allocation4 + $0x8] ss:$24 sm:$0x3] }
 0x557   :  { %7057 = vmatprep.subr.bf16.mxu0 %v8685_v19  ;;  %7077 = vmatprep.subr.bf16.mxu1 %v8685_v19  ;;  %v3689_v21 = vpack.c.bf16 %v3688_v17, %v3688_v17  ;;  %v7775_v17 = vld [vmem:[#allocation5 + $0x390] sm:$0xff]  }
 0x55a   :  { %7058 = vmatpush3.bf16.msra.mxu0 %v7683_v18  ;;  %7078 = vmatpush3.bf16.msra.mxu1 %v7684_v1  ;;  %v3797_v18 = vld [vmem:[#allocation4 + $0x9] ss:$24 sm:$0x3] }
 0x55b   :  { %7083 = vmatprep.subr.bf16.mxu0 %v8685_v19  ;;  %7103 = vmatprep.subr.bf16.mxu1 %v8685_v19  ;;  %v7733_v1 = vld [vmem:[#allocation5 + $0x2b8] sm:$0xff]  }
 0x55d   :  { %7060 = vmatmul.mubr.bf16.vlgmr.msra.gmra.mxu0 %v3035_v23  ;;  %7080 = vmatmul.mubr.bf16.vlgmr.msra.gmra.mxu1 %v3144_v24  ;;  %v7736_v23 = vld [vmem:[#allocation5 + $0x2f0] sm:$0xff]   ;;  %v7737_v24 = vld [vmem:[#allocation5 + $0x2a8] sm:$0xff]  }
 0x55e   :  { %7084 = vmatpush3.bf16.msra.mxu0 %v7685_v22  ;;  %7104 = vmatpush3.bf16.msra.mxu1 %v7686_v5  ;;  %v3798_v22 = vpack.c.bf16 %v3797_v18, %v3797_v18  ;;  %v7735_v5 = vld [vmem:[#allocation5 + $0x2b0] sm:$0xff]  }
 0x55f   :  { %7085 = vmatprep.subr.bf16.mxu0 %v8685_v19  ;;  %7105 = vmatprep.subr.bf16.mxu1 %v8685_v19  ;;  %v7776_v18 = vld [vmem:[#allocation5 + $0x3d0] sm:$0xff]  }
 0x560   :  { %7099 = vmatprep.mubr.msk.bf16.mxu0 %vm7903_vm0, %v8685_v19  ;;  %7119 = vmatprep.mubr.msk.bf16.mxu1 %vm7903_vm0, %v8685_v19 }
 0x562   :  { %7086 = vmatpush3.bf16.msra.mxu0 %v7687_v25  ;;  %7106 = vmatpush3.bf16.msra.mxu1 %v7688_v26  ;;  %v7738_v25 = vld [vmem:[#allocation5 + $0x2e8] sm:$0xff]   ;;  %v7739_v26 = vld [vmem:[#allocation5 + $0x2a0] sm:$0xff]  }
 0x563   :  { %7087 = vmatprep.subr.bf16.mxu0 %v8685_v19  ;;  %7107 = vmatprep.subr.bf16.mxu1 %v8685_v19 }
 0x566   :  { %7088 = vmatpush3.bf16.msra.mxu0 %v7689_v27  ;;  %7108 = vmatpush3.bf16.msra.mxu1 %v7690_v28  ;;  %v7740_v27 = vld [vmem:[#allocation5 + $0x2e0] sm:$0xff]   ;;  %v7741_v28 = vld [vmem:[#allocation5 + $0x298] sm:$0xff]  }
 0x567   :  { %7089 = vmatprep.subr.bf16.mxu0 %v8685_v19  ;;  %7109 = vmatprep.subr.bf16.mxu1 %v8685_v19 }
 0x56a   :  { %7090 = vmatpush3.bf16.msra.mxu0 %v7691_v29  ;;  %7110 = vmatpush3.bf16.msra.mxu1 %v7692_v30  ;;  %v7742_v29 = vld [vmem:[#allocation5 + $0x2d8] sm:$0xff]   ;;  %v7743_v30 = vld [vmem:[#allocation5 + $0x290] sm:$0xff]  }
 0x56b   :  { %7091 = vmatprep.subr.bf16.mxu0 %v8685_v19  ;;  %7111 = vmatprep.subr.bf16.mxu1 %v8685_v19 }
 0x56e   :  { %7092 = vmatpush3.bf16.msra.mxu0 %v7693_v31  ;;  %7112 = vmatpush3.bf16.msra.mxu1 %v7694_v32  ;;  %v7744_v31 = vld [vmem:[#allocation5 + $0x2d0] sm:$0xff]   ;;  %v7745_v32 = vld [vmem:[#allocation5 + $0x288] sm:$0xff]  }
 0x56f   :  { %7093 = vmatprep.subr.bf16.mxu0 %v8685_v19  ;;  %7113 = vmatprep.subr.bf16.mxu1 %v8685_v19 }
 0x572   :  { %7094 = vmatpush3.bf16.msra.mxu0 %v7695_v33  ;;  %7114 = vmatpush3.bf16.msra.mxu1 %v7696_v34  ;;  %v7746_v33 = vld [vmem:[#allocation5 + $0x2c8] sm:$0xff]   ;;  %v7747_v34 = vld [vmem:[#allocation5 + $0x280] sm:$0xff]  }
 0x573   :  { %7095 = vmatprep.subr.bf16.mxu0 %v8685_v19  ;;  %7115 = vmatprep.subr.bf16.mxu1 %v8685_v19 }
 0x576   :  { %7096 = vmatpush3.bf16.msra.mxu0 %v7697_v35  ;;  %7116 = vmatpush3.bf16.msra.mxu1 %v7698_v36  ;;  %v7748_v35 = vld [vmem:[#allocation5 + $0x2c0] sm:$0xff]   ;;  %v3906_v36 = vld [vmem:[#allocation4 + $0xa] ss:$24 sm:$0x3] }
 0x577   :  { %7097 = vmatprep.subr.bf16.mxu0 %v8685_v19  ;;  %7117 = vmatprep.subr.bf16.mxu1 %v8685_v19  ;;  %v3907_v42 = vpack.c.bf16 %v3906_v36, %v3906_v36 }
 0x57a   :  { %7098 = vmatpush3.bf16.msra.mxu0 %v7699_v37  ;;  %7118 = vmatpush3.bf16.msra.mxu1 %v7700_v38  ;;  %v4015_v37 = vld [vmem:[#allocation4 + $0xb] ss:$24 sm:$0x3] }
 0x57b   :  { %7123 = vmatprep.subr.bf16.mxu0 %v8685_v19  ;;  %7143 = vmatprep.subr.bf16.mxu1 %v8685_v19  ;;  %v7749_v38 = vld [vmem:[#allocation5 + $0x338] sm:$0xff]  }
 0x57d   :  { %7100 = vmatmul.mubr.bf16.vlgmr.msra.gmra.mxu0 %v3253_v45  ;;  %7120 = vmatmul.mubr.bf16.vlgmr.msra.gmra.mxu1 %v3362_v46  ;;  %v7752_v45 = vld [vmem:[#allocation5 + $0x370] sm:$0xff]   ;;  %v7753_v46 = vld [vmem:[#allocation5 + $0x328] sm:$0xff]  }
 0x57e   :  { %7124 = vmatpush3.bf16.msra.mxu0 %v7701_v43  ;;  %7144 = vmatpush3.bf16.msra.mxu1 %v7702_v44  ;;  %v4016_v43 = vpack.c.bf16 %v4015_v37, %v4015_v37  ;;  %v7751_v44 = vld [vmem:[#allocation5 + $0x330] sm:$0xff]  }
 0x57f   :  { %7125 = vmatprep.subr.bf16.mxu0 %v8685_v19  ;;  %7145 = vmatprep.subr.bf16.mxu1 %v8685_v19 }
 0x580   :  { %7139 = vmatprep.mubr.msk.bf16.mxu0 %vm7903_vm0, %v8685_v19  ;;  %7159 = vmatprep.mubr.msk.bf16.mxu1 %vm7903_vm0, %v8685_v19 }
 0x582   :  { %7126 = vmatpush3.bf16.msra.mxu0 %v7703_v60  ;;  %7146 = vmatpush3.bf16.msra.mxu1 %v7704_v48  ;;  %v7754_v60 = vld [vmem:[#allocation5 + $0x368] sm:$0xff]   ;;  %v7755_v48 = vld [vmem:[#allocation5 + $0x320] sm:$0xff]  }
 0x583   :  { %7127 = vmatprep.subr.bf16.mxu0 %v8685_v19  ;;  %7147 = vmatprep.subr.bf16.mxu1 %v8685_v19 }
 0x586   :  { %7128 = vmatpush3.bf16.msra.mxu0 %v7705_v47  ;;  %7148 = vmatpush3.bf16.msra.mxu1 %v7706_v50  ;;  %v7756_v47 = vld [vmem:[#allocation5 + $0x360] sm:$0xff]   ;;  %v7757_v50 = vld [vmem:[#allocation5 + $0x318] sm:$0xff]  }
 0x587   :  { %7129 = vmatprep.subr.bf16.mxu0 %v8685_v19  ;;  %7149 = vmatprep.subr.bf16.mxu1 %v8685_v19 }
 0x58a   :  { %7130 = vmatpush3.bf16.msra.mxu0 %v7707_v51  ;;  %7150 = vmatpush3.bf16.msra.mxu1 %v7708_v53  ;;  %v7758_v51 = vld [vmem:[#allocation5 + $0x358] sm:$0xff]   ;;  %v7759_v53 = vld [vmem:[#allocation5 + $0x310] sm:$0xff]  }
 0x58b   :  { %7131 = vmatprep.subr.bf16.mxu0 %v8685_v19  ;;  %7151 = vmatprep.subr.bf16.mxu1 %v8685_v19 }
 0x58e   :  { %7132 = vmatpush3.bf16.msra.mxu0 %v7709_v54  ;;  %7152 = vmatpush3.bf16.msra.mxu1 %v7710_v55  ;;  %v7760_v54 = vld [vmem:[#allocation5 + $0x350] sm:$0xff]   ;;  %v7761_v55 = vld [vmem:[#allocation5 + $0x308] sm:$0xff]  }
 0x58f   :  { %7133 = vmatprep.subr.bf16.mxu0 %v8685_v19  ;;  %7153 = vmatprep.subr.bf16.mxu1 %v8685_v19 }
 0x592   :  { %7134 = vmatpush3.bf16.msra.mxu0 %v7711_v56  ;;  %7154 = vmatpush3.bf16.msra.mxu1 %v7712_v57  ;;  %v7762_v56 = vld [vmem:[#allocation5 + $0x348] sm:$0xff]   ;;  %v7763_v57 = vld [vmem:[#allocation5 + $0x300] sm:$0xff]  }
 0x593   :  { %7135 = vmatprep.subr.bf16.mxu0 %v8685_v19  ;;  %7155 = vmatprep.subr.bf16.mxu1 %v8685_v19 }
 0x596   :  { %7136 = vmatpush3.bf16.msra.mxu0 %v7713_v49  ;;  %7156 = vmatpush3.bf16.msra.mxu1 %v7714_v58  ;;  %v7764_v49 = vld [vmem:[#allocation5 + $0x340] sm:$0xff]   ;;  %v4124_v58 = vld [vmem:[#allocation4 + $0xc] ss:$24 sm:$0x3] }
 0x597   :  { %7137 = vmatprep.subr.bf16.mxu0 %v8685_v19  ;;  %7157 = vmatprep.subr.bf16.mxu1 %v8685_v19  ;;  %v4125_v63 = vpack.c.bf16 %v4124_v58, %v4124_v58 }
 0x59a   :  { %7138 = vmatpush3.bf16.msra.mxu0 %v7715_v59  ;;  %7158 = vmatpush3.bf16.msra.mxu1 %v7716_v61  ;;  %v4233_v59 = vld [vmem:[#allocation4 + $0xd] ss:$24 sm:$0x3] }
 0x59b   :  { %7163 = vmatprep.subr.bf16.mxu0 %v8685_v19  ;;  %7183 = vmatprep.subr.bf16.mxu1 %v8685_v19  ;;  %v7765_v61 = vld [vmem:[#allocation5 + $0x3b8] sm:$0xff]  }
 0x59d   :  { %7140 = vmatmul.mubr.bf16.vlgmr.msra.gmra.mxu0 %v3471_v41  ;;  %7160 = vmatmul.mubr.bf16.vlgmr.msra.gmra.mxu1 %v3580_v4 }
 0x59e   :  { %7164 = vmatpush3.bf16.msra.mxu0 %v7717_v40  ;;  %7184 = vmatpush3.bf16.msra.mxu1 %v7718_v2  ;;  %v4234_v40 = vpack.c.bf16 %v4233_v59, %v4233_v59 }
 0x59f   :  { %7165 = vmatprep.subr.bf16.mxu0 %v8685_v19  ;;  %7185 = vmatprep.subr.bf16.mxu1 %v8685_v19 }
 0x5a0   :  { %7179 = vmatprep.mubr.msk.bf16.mxu0 %vm7903_vm0, %v8685_v19  ;;  %7199 = vmatprep.mubr.msk.bf16.mxu1 %vm7903_vm0, %v8685_v19 }
 0x5a2   :  { %7166 = vmatpush3.bf16.msra.mxu0 %v7719_v6  ;;  %7186 = vmatpush3.bf16.msra.mxu1 %v7720_v7  ;;  %v7767_v6 = vld [vmem:[#allocation5 + $0x3b0] sm:$0xff]  }
 0x5a3   :  { %7167 = vmatprep.subr.bf16.mxu0 %v8685_v19  ;;  %7187 = vmatprep.subr.bf16.mxu1 %v8685_v19  ;;  %v7768_v7 = vld [vmem:[#allocation5 + $0x3f0] sm:$0xff]  }
 0x5a6   :  { %7168 = vmatpush3.bf16.msra.mxu0 %v7721_v8  ;;  %7188 = vmatpush3.bf16.msra.mxu1 %v7722_v9 }
 0x5a7   :  { %7169 = vmatprep.subr.bf16.mxu0 %v8685_v19  ;;  %7189 = vmatprep.subr.bf16.mxu1 %v8685_v19 }
 0x5aa   :  { %7170 = vmatpush3.bf16.msra.mxu0 %v7723_v0  ;;  %7190 = vmatpush3.bf16.msra.mxu1 %v7724_v10 }
 0x5ab   :  { %7171 = vmatprep.subr.bf16.mxu0 %v8685_v19  ;;  %7191 = vmatprep.subr.bf16.mxu1 %v8685_v19 }
 0x5ae   :  { %7172 = vmatpush3.bf16.msra.mxu0 %v7725_v11  ;;  %7192 = vmatpush3.bf16.msra.mxu1 %v7726_v12  ;;  %v7769_v11 = vld [vmem:[#allocation5 + $0x3a8] sm:$0xff]  }
 0x5af   :  { %7173 = vmatprep.subr.bf16.mxu0 %v8685_v19  ;;  %7193 = vmatprep.subr.bf16.mxu1 %v8685_v19  ;;  %v7770_v12 = vld [vmem:[#allocation5 + $0x3e8] sm:$0xff]  }
 0x5b2   :  { %7174 = vmatpush3.bf16.msra.mxu0 %v7727_v13  ;;  %7194 = vmatpush3.bf16.msra.mxu1 %v7728_v52 }
 0x5b3   :  { %7175 = vmatprep.subr.bf16.mxu0 %v8685_v19  ;;  %7195 = vmatprep.subr.bf16.mxu1 %v8685_v19 }
 0x5b6   :  { %7176 = vmatpush3.bf16.msra.mxu0 %v7729_v14  ;;  %7196 = vmatpush3.bf16.msra.mxu1 %v7730_v15  ;;  %v7771_v14 = vld [vmem:[#allocation5 + $0x3a0] sm:$0xff]  }
 0x5b7   :  { %7177 = vmatprep.subr.bf16.mxu0 %v8685_v19  ;;  %7197 = vmatprep.subr.bf16.mxu1 %v8685_v19  ;;  %v7772_v15 = vld [vmem:[#allocation5 + $0x3e0] sm:$0xff]  }
 0x5ba   :  { %7178 = vmatpush3.bf16.msra.mxu0 %v7731_v16  ;;  %7198 = vmatpush3.bf16.msra.mxu1 %v7732_v3  ;;  %v7773_v16 = vld [vmem:[#allocation5 + $0x398] sm:$0xff]  }
 0x5bb   :  { %7203 = vmatprep.subr.bf16.mxu0 %v8685_v19  ;;  %7223 = vmatprep.subr.bf16.mxu1 %v8685_v19  ;;  %v7774_v3 = vld [vmem:[#allocation5 + $0x3d8] sm:$0xff]  }
 0x5bd   :  { %7180 = vmatmul.mubr.bf16.vlgmr.msra.gmra.mxu0 %v3689_v21  ;;  %7200 = vmatmul.mubr.bf16.vlgmr.msra.gmra.mxu1 %v3798_v22  ;;  %v7779_v21 = vld [vmem:[#allocation5 + $0x380] sm:$0xff]  }
 0x5be   :  { %7204 = vmatpush3.bf16.msra.mxu0 %v7733_v1  ;;  %7224 = vmatpush3.bf16.msra.mxu1 %v7734_v20  ;;  %v7777_v1 = vld [vmem:[#allocation5 + $0x388] sm:$0xff]   ;;  %v7780_v22 = vld [vmem:[#allocation5 + $0x3c0] sm:$0xff]  }
 0x5bf   :  { %7205 = vmatprep.subr.bf16.mxu0 %v8685_v19  ;;  %7225 = vmatprep.subr.bf16.mxu1 %v8685_v19  ;;  %v7778_v20 = vld [vmem:[#allocation5 + $0x3c8] sm:$0xff]  }
 0x5c0   :  { %7219 = vmatprep.mubr.msk.bf16.mxu0 %vm7903_vm0, %v8685_v19  ;;  %7239 = vmatprep.mubr.msk.bf16.mxu1 %vm7903_vm0, %v8685_v19 }
 0x5c2   :  { %7206 = vmatpush3.bf16.msra.mxu0 %v7735_v5  ;;  %7226 = vmatpush3.bf16.msra.mxu1 %v7736_v23  ;;  %v4342_v5 = vld [vmem:[#allocation4 + $0xe] ss:$24 sm:$0x3]  ;;  %v4451_v23 = vld [vmem:[#allocation4 + $0xf] ss:$24 sm:$0x3] }
 0x5c3   :  { %7207 = vmatprep.subr.bf16.mxu0 %v8685_v19  ;;  %7227 = vmatprep.subr.bf16.mxu1 %v8685_v19 }
 0x5c6   :  { %7208 = vmatpush3.bf16.msra.mxu0 %v7737_v24  ;;  %7228 = vmatpush3.bf16.msra.mxu1 %v7738_v25  ;;  %v7781_v24 = vld [vmem:[#allocation5 + $0x438] sm:$0xff]  }
 0x5c7   :  { %7209 = vmatprep.subr.bf16.mxu0 %v8685_v19  ;;  %7229 = vmatprep.subr.bf16.mxu1 %v8685_v19  ;;  %v7782_v25 = vld [vmem:[#allocation5 + $0x478] sm:$0xff]  }
 0x5ca   :  { %7210 = vmatpush3.bf16.msra.mxu0 %v7739_v26  ;;  %7230 = vmatpush3.bf16.msra.mxu1 %v7740_v27  ;;  %v4343_v26 = vpack.c.bf16 %v4342_v5, %v4342_v5  ;;  %v4452_v27 = vpack.c.bf16 %v4451_v23, %v4451_v23  ;;  %v7814_v5 = vld [vmem:[#allocation5 + $0x578] sm:$0xff]  }
 0x5cb   :  { %7211 = vmatprep.subr.bf16.mxu0 %v8685_v19  ;;  %7231 = vmatprep.subr.bf16.mxu1 %v8685_v19 }
 0x5ce   :  { %7212 = vmatpush3.bf16.msra.mxu0 %v7741_v28  ;;  %7232 = vmatpush3.bf16.msra.mxu1 %v7742_v29 }
 0x5cf   :  { %7213 = vmatprep.subr.bf16.mxu0 %v8685_v19  ;;  %7233 = vmatprep.subr.bf16.mxu1 %v8685_v19 }
 0x5d2   :  { %7214 = vmatpush3.bf16.msra.mxu0 %v7743_v30  ;;  %7234 = vmatpush3.bf16.msra.mxu1 %v7744_v31  ;;  %v7783_v31 = vld [vmem:[#allocation5 + $0x430] sm:$0xff]  }
 0x5d3   :  { %7215 = vmatprep.subr.bf16.mxu0 %v8685_v19  ;;  %7235 = vmatprep.subr.bf16.mxu1 %v8685_v19 }
 0x5d6   :  { %7216 = vmatpush3.bf16.msra.mxu0 %v7745_v32  ;;  %7236 = vmatpush3.bf16.msra.mxu1 %v7746_v33  ;;  %v7784_v32 = vld [vmem:[#allocation5 + $0x470] sm:$0xff]  }
 0x5d7   :  { %7217 = vmatprep.subr.bf16.mxu0 %v8685_v19  ;;  %7237 = vmatprep.subr.bf16.mxu1 %v8685_v19 }
 0x5da   :  { %7218 = vmatpush3.bf16.msra.mxu0 %v7747_v34  ;;  %7238 = vmatpush3.bf16.msra.mxu1 %v7748_v35 }
 0x5db   :  { %7243 = vmatprep.subr.bf16.mxu0 %v8685_v19  ;;  %7263 = vmatprep.subr.bf16.mxu1 %v8685_v19 }
 0x5dd   :  { %7220 = vmatmul.mubr.bf16.vlgmr.msra.gmra.mxu0 %v3907_v42  ;;  %7240 = vmatmul.mubr.bf16.vlgmr.msra.gmra.mxu1 %v4016_v43 }
 0x5de   :  { %7244 = vmatpush3.bf16.msra.mxu0 %v7749_v38  ;;  %7264 = vmatpush3.bf16.msra.mxu1 %v7750_v39  ;;  %v7785_v38 = vld [vmem:[#allocation5 + $0x428] sm:$0xff]  }
 0x5df   :  { %7245 = vmatprep.subr.bf16.mxu0 %v8685_v19  ;;  %7265 = vmatprep.subr.bf16.mxu1 %v8685_v19  ;;  %v7786_v39 = vld [vmem:[#allocation5 + $0x468] sm:$0xff]  }
 0x5e0   :  { %7259 = vmatprep.mubr.msk.bf16.mxu0 %vm7903_vm0, %v8685_v19  ;;  %7279 = vmatprep.mubr.msk.bf16.mxu1 %vm7903_vm0, %v8685_v19 }
 0x5e2   :  { %7246 = vmatpush3.bf16.msra.mxu0 %v7751_v44  ;;  %7266 = vmatpush3.bf16.msra.mxu1 %v7752_v45  ;;  %v7787_v44 = vld [vmem:[#allocation5 + $0x420] sm:$0xff]  }
 0x5e3   :  { %7247 = vmatprep.subr.bf16.mxu0 %v8685_v19  ;;  %7267 = vmatprep.subr.bf16.mxu1 %v8685_v19  ;;  %v7788_v45 = vld [vmem:[#allocation5 + $0x460] sm:$0xff]  }
 0x5e6   :  { %7248 = vmatpush3.bf16.msra.mxu0 %v7753_v46  ;;  %7268 = vmatpush3.bf16.msra.mxu1 %v7754_v60  ;;  %v7789_v46 = vld [vmem:[#allocation5 + $0x418] sm:$0xff]  }
 0x5e7   :  { %7249 = vmatprep.subr.bf16.mxu0 %v8685_v19  ;;  %7269 = vmatprep.subr.bf16.mxu1 %v8685_v19  ;;  %v7790_v60 = vld [vmem:[#allocation5 + $0x458] sm:$0xff]  }
 0x5ea   :  { %7250 = vmatpush3.bf16.msra.mxu0 %v7755_v48  ;;  %7270 = vmatpush3.bf16.msra.mxu1 %v7756_v47  ;;  %v7791_v48 = vld [vmem:[#allocation5 + $0x410] sm:$0xff]  }
 0x5eb   :  { %7251 = vmatprep.subr.bf16.mxu0 %v8685_v19  ;;  %7271 = vmatprep.subr.bf16.mxu1 %v8685_v19  ;;  %v7792_v47 = vld [vmem:[#allocation5 + $0x450] sm:$0xff]  }
 0x5ee   :  { %7252 = vmatpush3.bf16.msra.mxu0 %v7757_v50  ;;  %7272 = vmatpush3.bf16.msra.mxu1 %v7758_v51  ;;  %v7793_v50 = vld [vmem:[#allocation5 + $0x408] sm:$0xff]  }
 0x5ef   :  { %7253 = vmatprep.subr.bf16.mxu0 %v8685_v19  ;;  %7273 = vmatprep.subr.bf16.mxu1 %v8685_v19  ;;  %v7794_v51 = vld [vmem:[#allocation5 + $0x448] sm:$0xff]  }
 0x5f2   :  { %7254 = vmatpush3.bf16.msra.mxu0 %v7759_v53  ;;  %7274 = vmatpush3.bf16.msra.mxu1 %v7760_v54  ;;  %v7795_v53 = vld [vmem:[#allocation5 + $0x400] sm:$0xff]  }
 0x5f3   :  { %7255 = vmatprep.subr.bf16.mxu0 %v8685_v19  ;;  %7275 = vmatprep.subr.bf16.mxu1 %v8685_v19  ;;  %v7796_v54 = vld [vmem:[#allocation5 + $0x440] sm:$0xff]  }
 0x5f6   :  { %7256 = vmatpush3.bf16.msra.mxu0 %v7761_v55  ;;  %7276 = vmatpush3.bf16.msra.mxu1 %v7762_v56  ;;  %v4560_v55 = vld [vmem:[#allocation4 + $0x10] ss:$24 sm:$0x3]  ;;  %v4669_v56 = vld [vmem:[#allocation4 + $0x11] ss:$24 sm:$0x3] }
 0x5f7   :  { %7257 = vmatprep.subr.bf16.mxu0 %v8685_v19  ;;  %7277 = vmatprep.subr.bf16.mxu1 %v8685_v19  ;;  %v4561_v58 = vpack.c.bf16 %v4560_v55, %v4560_v55  ;;  %v4670_v59 = vpack.c.bf16 %v4669_v56, %v4669_v56  ;;  %v7830_v55 = vld [vmem:[#allocation5 + $0x5f8] sm:$0xff]  }
 0x5fa   :  { %7258 = vmatpush3.bf16.msra.mxu0 %v7763_v57  ;;  %7278 = vmatpush3.bf16.msra.mxu1 %v7764_v49  ;;  %v7797_v57 = vld [vmem:[#allocation5 + $0x4b8] sm:$0xff]  }
 0x5fb   :  { %7283 = vmatprep.subr.bf16.mxu0 %v8685_v19  ;;  %7303 = vmatprep.subr.bf16.mxu1 %v8685_v19  ;;  %v7798_v49 = vld [vmem:[#allocation5 + $0x4f8] sm:$0xff]  }
 0x5fd   :  { %7260 = vmatmul.mubr.bf16.vlgmr.msra.gmra.mxu0 %v4125_v63  ;;  %7280 = vmatmul.mubr.bf16.vlgmr.msra.gmra.mxu1 %v4234_v40  ;;  %v2939_v2 = vpop.f32.mrf.mxu0  ;;  %v3027_v41 = vpop.f32.mrf.mxu1  ;;  %v7799_v40 = vld [vmem:[#allocation5 + $0x4b0] sm:$0xff]  }
 0x5fe   :  { %v8950_v4 = vadd.f32 %v3027_v41, %v2939_v2  ;;  %7284 = vmatpush3.bf16.msra.mxu0 %v7765_v61  ;;  %7304 = vmatpush3.bf16.msra.mxu1 %v7766_v62  ;;  %v7800_v2 = vld [vmem:[#allocation5 + $0x4f0] sm:$0xff]  }
 0x5ff   :  { %v7021_v8 = vpop.f32.mrf.mxu0  ;;  %v7041_v9 = vpop.f32.mrf.mxu1  ;;  %7285 = vmatprep.subr.bf16.mxu0 %v8685_v19  ;;  %7305 = vmatprep.subr.bf16.mxu1 %v8685_v19 }
 0x600   :  { %7299 = vmatprep.mubr.msk.bf16.mxu0 %vm7903_vm0, %v8685_v19  ;;  %7319 = vmatprep.mubr.msk.bf16.mxu1 %vm7903_vm0, %v8685_v19  ;;  %v7801_v9 = vld [vmem:[#allocation5 + $0x4a8] sm:$0xff]  }
 0x601   :  { %v2942_v0 = vpop.f32.mrf.mxu0  ;;  %v3030_v10 = vpop.f32.mrf.mxu1 }
 0x602   :  { %7286 = vmatpush3.bf16.msra.mxu0 %v7767_v6  ;;  %7306 = vmatpush3.bf16.msra.mxu1 %v7768_v7  ;;  %v7802_v0 = vld [vmem:[#allocation5 + $0x4e8] sm:$0xff]  }
 0x603   :  { %v7022_v13 = vpop.f32.mrf.mxu0  ;;  %v7042_v52 = vpop.f32.mrf.mxu1  ;;  %7287 = vmatprep.subr.bf16.mxu0 %v8685_v19  ;;  %7307 = vmatprep.subr.bf16.mxu1 %v8685_v19 }
 0x604   :  { %v7804_v13 = vld [vmem:[#allocation5 + $0x4e0] sm:$0xff]   ;;  %v7805_v52 = vld [vmem:[#allocation5 + $0x498] sm:$0xff]  }
 0x606   :  { %7288 = vmatpush3.bf16.msra.mxu0 %v7769_v11  ;;  %7308 = vmatpush3.bf16.msra.mxu1 %v7770_v12  ;;  %v7803_v12 = vld [vmem:[#allocation5 + $0x4a0] sm:$0xff]  }
 0x607   :  { %7289 = vmatprep.subr.bf16.mxu0 %v8685_v19  ;;  %7309 = vmatprep.subr.bf16.mxu1 %v8685_v19 }
 0x60a   :  { %7290 = vmatpush3.bf16.msra.mxu0 %v7771_v14  ;;  %7310 = vmatpush3.bf16.msra.mxu1 %v7772_v15  ;;  %v7806_v14 = vld [vmem:[#allocation5 + $0x4d8] sm:$0xff]   ;;  %v7807_v15 = vld [vmem:[#allocation5 + $0x490] sm:$0xff]  }
 0x60b   :  { %7291 = vmatprep.subr.bf16.mxu0 %v8685_v19  ;;  %7311 = vmatprep.subr.bf16.mxu1 %v8685_v19 }
 0x60e   :  { %7292 = vmatpush3.bf16.msra.mxu0 %v7773_v16  ;;  %7312 = vmatpush3.bf16.msra.mxu1 %v7774_v3  ;;  %v7808_v16 = vld [vmem:[#allocation5 + $0x4d0] sm:$0xff]   ;;  %v7809_v3 = vld [vmem:[#allocation5 + $0x488] sm:$0xff]  }
 0x60f   :  { %7293 = vmatprep.subr.bf16.mxu0 %v8685_v19  ;;  %7313 = vmatprep.subr.bf16.mxu1 %v8685_v19 }
 0x612   :  { %7294 = vmatpush3.bf16.msra.mxu0 %v7775_v17  ;;  %7314 = vmatpush3.bf16.msra.mxu1 %v7776_v18  ;;  %v7810_v17 = vld [vmem:[#allocation5 + $0x4c8] sm:$0xff]   ;;  %v7811_v18 = vld [vmem:[#allocation5 + $0x480] sm:$0xff]  }
 0x613   :  { %7295 = vmatprep.subr.bf16.mxu0 %v8685_v19  ;;  %7315 = vmatprep.subr.bf16.mxu1 %v8685_v19 }
 0x616   :  { %7296 = vmatpush3.bf16.msra.mxu0 %v7777_v1  ;;  %7316 = vmatpush3.bf16.msra.mxu1 %v7778_v20  ;;  %v7812_v1 = vld [vmem:[#allocation5 + $0x4c0] sm:$0xff]  }
 0x617   :  { %7297 = vmatprep.subr.bf16.mxu0 %v8685_v19  ;;  %7317 = vmatprep.subr.bf16.mxu1 %v8685_v19  ;;  %v4778_v20 = vld [vmem:[#allocation4 + $0x12] ss:$24 sm:$0x3] }
 0x618   :  { %v4779_v23 = vpack.c.bf16 %v4778_v20, %v4778_v20 }
 0x61a   :  { %7298 = vmatpush3.bf16.msra.mxu0 %v7779_v21  ;;  %7318 = vmatpush3.bf16.msra.mxu1 %v7780_v22  ;;  %v4887_v21 = vld [vmem:[#allocation4 + $0x13] ss:$24 sm:$0x3] }
 0x61b   :  { %7323 = vmatprep.subr.bf16.mxu0 %v8685_v19  ;;  %7343 = vmatprep.subr.bf16.mxu1 %v8685_v19  ;;  %v7813_v22 = vld [vmem:[#allocation5 + $0x538] sm:$0xff]  }
 0x61d   :  { %v3135_v28 = vpop.f32.mrf.mxu0  ;;  %v3244_v29 = vpop.f32.mrf.mxu1  ;;  %7300 = vmatmul.mubr.bf16.vlgmr.msra.gmra.mxu0 %v4343_v26  ;;  %7320 = vmatmul.mubr.bf16.vlgmr.msra.gmra.mxu1 %v4452_v27 }
 0x61e   :  { %v3141_v30 = vadd.f32 %v3135_v28, %v8950_v4  ;;  %7324 = vmatpush3.bf16.msra.mxu0 %v7781_v24  ;;  %7344 = vmatpush3.bf16.msra.mxu1 %v7782_v25  ;;  %v4888_v24 = vpack.c.bf16 %v4887_v21, %v4887_v21  ;;  %v7815_v28 = vld [vmem:[#allocation5 + $0x530] sm:$0xff]  }
 0x61f   :  { %v7061_v33 = vpop.f32.mrf.mxu0  ;;  %v7081_v34 = vpop.f32.mrf.mxu1  ;;  %7325 = vmatprep.subr.bf16.mxu0 %v8685_v19  ;;  %7345 = vmatprep.subr.bf16.mxu1 %v8685_v19 }
 0x620   :  { %v3250_v35 = vadd.f32 %v3244_v29, %v3141_v30  ;;  %7339 = vmatprep.mubr.msk.bf16.mxu0 %vm7903_vm0, %v8685_v19  ;;  %7359 = vmatprep.mubr.msk.bf16.mxu1 %vm7903_vm0, %v8685_v19  ;;  %v7816_v29 = vld [vmem:[#allocation5 + $0x570] sm:$0xff]  }
 0x621   :  { %v3138_v36 = vpop.f32.mrf.mxu0  ;;  %v3247_v37 = vpop.f32.mrf.mxu1 }
 0x622   :  { %7326 = vmatpush3.bf16.msra.mxu0 %v7783_v31  ;;  %7346 = vmatpush3.bf16.msra.mxu1 %v7784_v32  ;;  %v7818_v36 = vld [vmem:[#allocation5 + $0x568] sm:$0xff]  }
 0x623   :  { %v7062_v42 = vpop.f32.mrf.mxu0  ;;  %v7082_v43 = vpop.f32.mrf.mxu1  ;;  %7327 = vmatprep.subr.bf16.mxu0 %v8685_v19  ;;  %7347 = vmatprep.subr.bf16.mxu1 %v8685_v19 }
 0x624   :  { %v7820_v42 = vld [vmem:[#allocation5 + $0x560] sm:$0xff]   ;;  %v7821_v43 = vld [vmem:[#allocation5 + $0x518] sm:$0xff]  }
 0x626   :  { %7328 = vmatpush3.bf16.msra.mxu0 %v7785_v38  ;;  %7348 = vmatpush3.bf16.msra.mxu1 %v7786_v39  ;;  %v7819_v39 = vld [vmem:[#allocation5 + $0x520] sm:$0xff]  }
 0x627   :  { %7329 = vmatprep.subr.bf16.mxu0 %v8685_v19  ;;  %7349 = vmatprep.subr.bf16.mxu1 %v8685_v19 }
 0x62a   :  { %7330 = vmatpush3.bf16.msra.mxu0 %v7787_v44  ;;  %7350 = vmatpush3.bf16.msra.mxu1 %v7788_v45  ;;  %v7822_v44 = vld [vmem:[#allocation5 + $0x558] sm:$0xff]   ;;  %v7823_v45 = vld [vmem:[#allocation5 + $0x510] sm:$0xff]  }
 0x62b   :  { %7331 = vmatprep.subr.bf16.mxu0 %v8685_v19  ;;  %7351 = vmatprep.subr.bf16.mxu1 %v8685_v19 }
 0x62e   :  { %7332 = vmatpush3.bf16.msra.mxu0 %v7789_v46  ;;  %7352 = vmatpush3.bf16.msra.mxu1 %v7790_v60  ;;  %v7824_v46 = vld [vmem:[#allocation5 + $0x550] sm:$0xff]   ;;  %v7825_v60 = vld [vmem:[#allocation5 + $0x508] sm:$0xff]  }
 0x62f   :  { %7333 = vmatprep.subr.bf16.mxu0 %v8685_v19  ;;  %7353 = vmatprep.subr.bf16.mxu1 %v8685_v19 }
 0x632   :  { %7334 = vmatpush3.bf16.msra.mxu0 %v7791_v48  ;;  %7354 = vmatpush3.bf16.msra.mxu1 %v7792_v47  ;;  %v7826_v48 = vld [vmem:[#allocation5 + $0x548] sm:$0xff]   ;;  %v7827_v47 = vld [vmem:[#allocation5 + $0x500] sm:$0xff]  }
 0x633   :  { %7335 = vmatprep.subr.bf16.mxu0 %v8685_v19  ;;  %7355 = vmatprep.subr.bf16.mxu1 %v8685_v19 }
 0x636   :  { %7336 = vmatpush3.bf16.msra.mxu0 %v7793_v50  ;;  %7356 = vmatpush3.bf16.msra.mxu1 %v7794_v51  ;;  %v7828_v50 = vld [vmem:[#allocation5 + $0x540] sm:$0xff]  }
 0x637   :  { %7337 = vmatprep.subr.bf16.mxu0 %v8685_v19  ;;  %7357 = vmatprep.subr.bf16.mxu1 %v8685_v19  ;;  %v4996_v51 = vld [vmem:[#allocation4 + $0x14] ss:$24 sm:$0x3] }
 0x638   :  { %v4997_v56 = vpack.c.bf16 %v4996_v51, %v4996_v51 }
 0x63a   :  { %7338 = vmatpush3.bf16.msra.mxu0 %v7795_v53  ;;  %7358 = vmatpush3.bf16.msra.mxu1 %v7796_v54  ;;  %v5105_v53 = vld [vmem:[#allocation4 + $0x15] ss:$24 sm:$0x3] }
 0x63b   :  { %7363 = vmatprep.subr.bf16.mxu0 %v8685_v19  ;;  %7383 = vmatprep.subr.bf16.mxu1 %v8685_v19  ;;  %v7829_v54 = vld [vmem:[#allocation5 + $0x5b8] sm:$0xff]  }
 0x63d   :  { %v3353_v61 = vpop.f32.mrf.mxu0  ;;  %v3462_v62 = vpop.f32.mrf.mxu1  ;;  %7340 = vmatmul.mubr.bf16.vlgmr.msra.gmra.mxu0 %v4561_v58  ;;  %7360 = vmatmul.mubr.bf16.vlgmr.msra.gmra.mxu1 %v4670_v59 }
 0x63e   :  { %v3359_v63 = vadd.f32 %v3353_v61, %v3250_v35  ;;  %7364 = vmatpush3.bf16.msra.mxu0 %v7797_v57  ;;  %7384 = vmatpush3.bf16.msra.mxu1 %v7798_v49  ;;  %v7817_v35 = vld [vmem:[#allocation5 + $0x528] sm:$0xff]   ;;  %v5106_v57 = vpack.c.bf16 %v5105_v53, %v5105_v53  ;;  %v7831_v61 = vld [vmem:[#allocation5 + $0x5b0] sm:$0xff]  }
 0x63f   :  { %v7101_v41 = vpop.f32.mrf.mxu0  ;;  %v7121_v4 = vpop.f32.mrf.mxu1  ;;  %7365 = vmatprep.subr.bf16.mxu0 %v8685_v19  ;;  %7385 = vmatprep.subr.bf16.mxu1 %v8685_v19 }
 0x640   :  { %v3468_v6 = vadd.f32 %v3462_v62, %v3359_v63  ;;  %7379 = vmatprep.mubr.msk.bf16.mxu0 %vm7903_vm0, %v8685_v19  ;;  %7399 = vmatprep.mubr.msk.bf16.mxu1 %vm7903_vm0, %v8685_v19  ;;  %v7832_v62 = vld [vmem:[#allocation5 + $0x5f0] sm:$0xff]  }
 0x641   :  { %v3356_v7 = vpop.f32.mrf.mxu0  ;;  %v3465_v8 = vpop.f32.mrf.mxu1 }
 0x642   :  { %7366 = vmatpush3.bf16.msra.mxu0 %v7799_v40  ;;  %7386 = vmatpush3.bf16.msra.mxu1 %v7800_v2  ;;  %v7834_v7 = vld [vmem:[#allocation5 + $0x5e8] sm:$0xff]  }
 0x643   :  { %v7102_v10 = vpop.f32.mrf.mxu0  ;;  %v7122_v11 = vpop.f32.mrf.mxu1  ;;  %7367 = vmatprep.subr.bf16.mxu0 %v8685_v19  ;;  %7387 = vmatprep.subr.bf16.mxu1 %v8685_v19 }
 0x644   :  { %v7836_v10 = vld [vmem:[#allocation5 + $0x5e0] sm:$0xff]   ;;  %v7837_v11 = vld [vmem:[#allocation5 + $0x598] sm:$0xff]  }
 0x646   :  { %7368 = vmatpush3.bf16.msra.mxu0 %v7801_v9  ;;  %7388 = vmatpush3.bf16.msra.mxu1 %v7802_v0  ;;  %v7835_v0 = vld [vmem:[#allocation5 + $0x5a0] sm:$0xff]  }
 0x647   :  { %7369 = vmatprep.subr.bf16.mxu0 %v8685_v19  ;;  %7389 = vmatprep.subr.bf16.mxu1 %v8685_v19 }
 0x64a   :  { %7370 = vmatpush3.bf16.msra.mxu0 %v7803_v12  ;;  %7390 = vmatpush3.bf16.msra.mxu1 %v7804_v13  ;;  %v7838_v12 = vld [vmem:[#allocation5 + $0x5d8] sm:$0xff]   ;;  %v7839_v13 = vld [vmem:[#allocation5 + $0x590] sm:$0xff]  }
 0x64b   :  { %7371 = vmatprep.subr.bf16.mxu0 %v8685_v19  ;;  %7391 = vmatprep.subr.bf16.mxu1 %v8685_v19 }
 0x64e   :  { %7372 = vmatpush3.bf16.msra.mxu0 %v7805_v52  ;;  %7392 = vmatpush3.bf16.msra.mxu1 %v7806_v14  ;;  %v7840_v52 = vld [vmem:[#allocation5 + $0x5d0] sm:$0xff]   ;;  %v7841_v14 = vld [vmem:[#allocation5 + $0x588] sm:$0xff]  }
 0x64f   :  { %7373 = vmatprep.subr.bf16.mxu0 %v8685_v19  ;;  %7393 = vmatprep.subr.bf16.mxu1 %v8685_v19 }
 0x652   :  { %7374 = vmatpush3.bf16.msra.mxu0 %v7807_v15  ;;  %7394 = vmatpush3.bf16.msra.mxu1 %v7808_v16  ;;  %v7842_v15 = vld [vmem:[#allocation5 + $0x5c8] sm:$0xff]   ;;  %v7843_v16 = vld [vmem:[#allocation5 + $0x580] sm:$0xff]  }
 0x653   :  { %7375 = vmatprep.subr.bf16.mxu0 %v8685_v19  ;;  %7395 = vmatprep.subr.bf16.mxu1 %v8685_v19 }
 0x656   :  { %7376 = vmatpush3.bf16.msra.mxu0 %v7809_v3  ;;  %7396 = vmatpush3.bf16.msra.mxu1 %v7810_v17  ;;  %v7844_v3 = vld [vmem:[#allocation5 + $0x5c0] sm:$0xff]  }
 0x657   :  { %7377 = vmatprep.subr.bf16.mxu0 %v8685_v19  ;;  %7397 = vmatprep.subr.bf16.mxu1 %v8685_v19  ;;  %v5214_v17 = vld [vmem:[#allocation4 + $0x16] ss:$24 sm:$0x3] }
 0x65a   :  { %7378 = vmatpush3.bf16.msra.mxu0 %v7811_v18  ;;  %7398 = vmatpush3.bf16.msra.mxu1 %v7812_v1  ;;  %v5323_v18 = vld [vmem:[#allocation4 + $0x17] ss:$24 sm:$0x3]  ;;  %v5215_v1 = vpack.c.bf16 %v5214_v17, %v5214_v17 }
 0x65b   :  { %7403 = vmatprep.subr.bf16.mxu0 %v8685_v19  ;;  %7423 = vmatprep.subr.bf16.mxu1 %v8685_v19  ;;  %v5324_v20 = vpack.c.bf16 %v5323_v18, %v5323_v18 }
 0x65d   :  { %v3571_v25 = vpop.f32.mrf.mxu0  ;;  %v3680_v26 = vpop.f32.mrf.mxu1  ;;  %7380 = vmatmul.mubr.bf16.vlgmr.msra.gmra.mxu0 %v4779_v23  ;;  %7400 = vmatmul.mubr.bf16.vlgmr.msra.gmra.mxu1 %v4888_v24 }
 0x65e   :  { %v3577_v27 = vadd.f32 %v3571_v25, %v3468_v6  ;;  %7404 = vmatpush3.bf16.msra.mxu0 %v7813_v22  ;;  %7424 = vmatpush3.bf16.msra.mxu1 %v7814_v5  ;;  %v7833_v6 = vld [vmem:[#allocation5 + $0x5a8] sm:$0xff]  }
 0x65f   :  { %v7141_v30 = vpop.f32.mrf.mxu0  ;;  %v7161_v31 = vpop.f32.mrf.mxu1  ;;  %7405 = vmatprep.subr.bf16.mxu0 %v8685_v19  ;;  %7425 = vmatprep.subr.bf16.mxu1 %v8685_v19 }
 0x660   :  { %v3686_v32 = vadd.f32 %v3680_v26, %v3577_v27  ;;  %7419 = vmatprep.mubr.msk.bf16.mxu0 %vm7903_vm0, %v8685_v19  ;;  %7439 = vmatprep.mubr.msk.bf16.mxu1 %vm7903_vm0, %v8685_v19 }
 0x661   :  { %v3574_v33 = vpop.f32.mrf.mxu0  ;;  %v3683_v34 = vpop.f32.mrf.mxu1 }
 0x662   :  { %7406 = vmatpush3.bf16.msra.mxu0 %v7815_v28  ;;  %7426 = vmatpush3.bf16.msra.mxu1 %v7816_v29 }
 0x663   :  { %v7142_v37 = vpop.f32.mrf.mxu0  ;;  %v7162_v38 = vpop.f32.mrf.mxu1  ;;  %7407 = vmatprep.subr.bf16.mxu0 %v8685_v19  ;;  %7427 = vmatprep.subr.bf16.mxu1 %v8685_v19 }
 0x666   :  { %7408 = vmatpush3.bf16.msra.mxu0 %v7817_v35  ;;  %7428 = vmatpush3.bf16.msra.mxu1 %v7818_v36 }
 0x667   :  { %7409 = vmatprep.subr.bf16.mxu0 %v8685_v19  ;;  %7429 = vmatprep.subr.bf16.mxu1 %v8685_v19 }
 0x66a   :  { %7410 = vmatpush3.bf16.msra.mxu0 %v7819_v39  ;;  %7430 = vmatpush3.bf16.msra.mxu1 %v7820_v42  ;;  %v7845_v42 = vld [vmem:[%s9103_s9 + $0x38] sm:$0xff]  }
 0x66b   :  { %7411 = vmatprep.subr.bf16.mxu0 %v8685_v19  ;;  %7431 = vmatprep.subr.bf16.mxu1 %v8685_v19 }
 0x66e   :  { %7412 = vmatpush3.bf16.msra.mxu0 %v7821_v43  ;;  %7432 = vmatpush3.bf16.msra.mxu1 %v7822_v44  ;;  %v7846_v43 = vld [vmem:[%s9103_s9 + $0x30] sm:$0xff]   ;;  %v7847_v44 = vld [vmem:[%s9103_s9 + $0x28] sm:$0xff]  }
 0x66f   :  { %7413 = vmatprep.subr.bf16.mxu0 %v8685_v19  ;;  %7433 = vmatprep.subr.bf16.mxu1 %v8685_v19 }
 0x672   :  { %7414 = vmatpush3.bf16.msra.mxu0 %v7823_v45  ;;  %7434 = vmatpush3.bf16.msra.mxu1 %v7824_v46  ;;  %v7848_v45 = vld [vmem:[%s9103_s9 + $0x20] sm:$0xff]   ;;  %v7849_v46 = vld [vmem:[%s9103_s9 + $0x18] sm:$0xff]  }
 0x673   :  { %7415 = vmatprep.subr.bf16.mxu0 %v8685_v19  ;;  %7435 = vmatprep.subr.bf16.mxu1 %v8685_v19 }
 0x676   :  { %7416 = vmatpush3.bf16.msra.mxu0 %v7825_v60  ;;  %7436 = vmatpush3.bf16.msra.mxu1 %v7826_v48 }
 0x677   :  { %7417 = vmatprep.subr.bf16.mxu0 %v8685_v19  ;;  %7437 = vmatprep.subr.bf16.mxu1 %v8685_v19 }
 0x67a   :  { %7418 = vmatpush3.bf16.msra.mxu0 %v7827_v47  ;;  %7438 = vmatpush3.bf16.msra.mxu1 %v7828_v50 }
 0x67b   :  { %7443 = vmatprep.subr.bf16.mxu0 %v8685_v19  ;;  %7463 = vmatprep.subr.bf16.mxu1 %v8685_v19 }
 0x67d   :  { %v3789_v49 = vpop.f32.mrf.mxu0  ;;  %v3898_v58 = vpop.f32.mrf.mxu1  ;;  %7420 = vmatmul.mubr.bf16.vlgmr.msra.gmra.mxu0 %v4997_v56  ;;  %7440 = vmatmul.mubr.bf16.vlgmr.msra.gmra.mxu1 %v5106_v57 }
 0x67e   :  { %v3795_v59 = vadd.f32 %v3789_v49, %v3686_v32  ;;  %7444 = vmatpush3.bf16.msra.mxu0 %v7829_v54  ;;  %7464 = vmatpush3.bf16.msra.mxu1 %v7830_v55  ;;  %v7850_v49 = vld [vmem:[%s9103_s9 + $0x10] sm:$0xff]  }
 0x67f   :  { %v7181_v63 = vpop.f32.mrf.mxu0  ;;  %v7201_v40 = vpop.f32.mrf.mxu1  ;;  %7445 = vmatprep.subr.bf16.mxu0 %v8685_v19  ;;  %7465 = vmatprep.subr.bf16.mxu1 %v8685_v19 }
 0x680   :  { %v3904_v2 = vadd.f32 %v3898_v58, %v3795_v59  ;;  %7459 = vmatprep.mubr.msk.bf16.mxu0 %vm7903_vm0, %v8685_v19  ;;  %7479 = vmatprep.mubr.msk.bf16.mxu1 %vm7903_vm0, %v8685_v19  ;;  %v7851_v58 = vld [vmem:[%s9103_s9 + $0x8] sm:$0xff]   ;;  %v7852_v59 = vld [vmem:[%s9103_s9] sm:$0xff]  }
 0x681   :  { %v3792_v41 = vpop.f32.mrf.mxu0  ;;  %v3901_v4 = vpop.f32.mrf.mxu1 }
 0x682   :  { %7446 = vmatpush3.bf16.msra.mxu0 %v7831_v61  ;;  %7466 = vmatpush3.bf16.msra.mxu1 %v7832_v62 }
 0x683   :  { %v7182_v8 = vpop.f32.mrf.mxu0  ;;  %v7202_v9 = vpop.f32.mrf.mxu1  ;;  %7447 = vmatprep.subr.bf16.mxu0 %v8685_v19  ;;  %7467 = vmatprep.subr.bf16.mxu1 %v8685_v19 }
 0x686   :  { %7448 = vmatpush3.bf16.msra.mxu0 %v7833_v6  ;;  %7468 = vmatpush3.bf16.msra.mxu1 %v7834_v7 }
 0x687   :  { %7449 = vmatprep.subr.bf16.mxu0 %v8685_v19  ;;  %7469 = vmatprep.subr.bf16.mxu1 %v8685_v19 }
 0x68a   :  { %7450 = vmatpush3.bf16.msra.mxu0 %v7835_v0  ;;  %7470 = vmatpush3.bf16.msra.mxu1 %v7836_v10 }
 0x68b   :  { %7451 = vmatprep.subr.bf16.mxu0 %v8685_v19  ;;  %7471 = vmatprep.subr.bf16.mxu1 %v8685_v19 }
 0x68e   :  { %7452 = vmatpush3.bf16.msra.mxu0 %v7837_v11  ;;  %7472 = vmatpush3.bf16.msra.mxu1 %v7838_v12 }
 0x68f   :  { %7453 = vmatprep.subr.bf16.mxu0 %v8685_v19  ;;  %7473 = vmatprep.subr.bf16.mxu1 %v8685_v19 }
 0x692   :  { %7454 = vmatpush3.bf16.msra.mxu0 %v7839_v13  ;;  %7474 = vmatpush3.bf16.msra.mxu1 %v7840_v52 }
 0x693   :  { %7455 = vmatprep.subr.bf16.mxu0 %v8685_v19  ;;  %7475 = vmatprep.subr.bf16.mxu1 %v8685_v19 }
 0x696   :  { %7456 = vmatpush3.bf16.msra.mxu0 %v7841_v14  ;;  %7476 = vmatpush3.bf16.msra.mxu1 %v7842_v15 }
 0x697   :  { %7457 = vmatprep.subr.bf16.mxu0 %v8685_v19  ;;  %7477 = vmatprep.subr.bf16.mxu1 %v8685_v19 }
 0x69a   :  { %7458 = vmatpush3.bf16.msra.mxu0 %v7843_v16  ;;  %7478 = vmatpush3.bf16.msra.mxu1 %v7844_v3 }
 0x69b   :  { %7483 = vmatprep.subr.bf16.mxu0 %v8685_v19 }
 0x69d   :  { %v4007_v21 = vpop.f32.mrf.mxu0  ;;  %v4116_v22 = vpop.f32.mrf.mxu1  ;;  %7460 = vmatmul.mubr.bf16.vlgmr.msra.gmra.mxu0 %v5215_v1  ;;  %7480 = vmatmul.mubr.bf16.vlgmr.msra.gmra.mxu1 %v5324_v20 }
 0x69e   :  { %v4013_v5 = vadd.f32 %v4007_v21, %v3904_v2  ;;  %7499 = vmatprep.mubr.msk.bf16.mxu0 %vm7903_vm0, %v8685_v19  ;;  %7484 = vmatpush3.bf16.msra.mxu0 %v7845_v42 }
 0x69f   :  { %v7221_v23 = vpop.f32.mrf.mxu0  ;;  %v7241_v24 = vpop.f32.mrf.mxu1  ;;  %7485 = vmatprep.subr.bf16.mxu0 %v8685_v19 }
 0x6a0   :  { %v4122_v25 = vadd.f32 %v4116_v22, %v4013_v5 }
 0x6a1   :  { %v4010_v26 = vpop.f32.mrf.mxu0  ;;  %v4119_v27 = vpop.f32.mrf.mxu1 }
 0x6a2   :  { %7486 = vmatpush3.bf16.msra.mxu0 %v7846_v43  ;;  %v6102_v27 = vld [vmem:[%s9102_s8] ss:$0 sm:$0xff]  ;;  %s7875_s8 = scalar_lea.vmem %s5560_s25, 32 }
 0x6a3   :  { %v7222_v28 = vpop.f32.mrf.mxu0  ;;  %v7242_v29 = vpop.f32.mrf.mxu1  ;;  %7487 = vmatprep.subr.bf16.mxu0 %v8685_v19  ;;  %p7876_p5 = scmp.ne.s32.totalorder %s5560_s25, %s7875_s8  ;;  %p7881_p7 = scmp.lt.s32.totalorder %s7875_s8, %s7875_s8 }
 0x6a5   :  { %p7882_p8 = por %p7881_p7, %p7880_p6 }
 0x6a6   :  { %7488 = vmatpush3.bf16.msra.mxu0 %v7847_v44 }
 0x6a7   :  { %7489 = vmatprep.subr.bf16.mxu0 %v8685_v19  ;;  %p7883_p9 = pnand %p7882_p8, %p7876_p5 }
 0x6aa   :  { %7490 = vmatpush3.bf16.msra.mxu0 %v7848_v45 }
 0x6ab   :  { %7491 = vmatprep.subr.bf16.mxu0 %v8685_v19 }
 0x6ae   :  { %7492 = vmatpush3.bf16.msra.mxu0 %v7849_v46 }
 0x6af   :  { %7493 = vmatprep.subr.bf16.mxu0 %v8685_v19 }
 0x6b2   :  { %7494 = vmatpush3.bf16.msra.mxu0 %v7850_v49 }
 0x6b3   :  { %7495 = vmatprep.subr.bf16.mxu0 %v8685_v19 }
 0x6b6   :  { %7496 = vmatpush3.bf16.msra.mxu0 %v7851_v58 }
 0x6b7   :  { %7497 = vmatprep.subr.bf16.mxu0 %v8685_v19 }
 0x6ba   :  { %7498 = vmatpush3.bf16.msra.mxu0 %v7852_v59 }
 0x6bd   :  { %v4225_v30 = vpop.f32.mrf.mxu0  ;;  %v4334_v31 = vpop.f32.mrf.mxu1 }
 0x6be   :  { %v4231_v32 = vadd.f32 %v4225_v30, %v4122_v25 }
 0x6bf   :  { %v7261_v33 = vpop.f32.mrf.mxu0  ;;  %v7281_v34 = vpop.f32.mrf.mxu1 }
 0x6c0   :  { %v4340_v35 = vadd.f32 %v4334_v31, %v4231_v32 }
 0x6c1   :  { %v4228_v36 = vpop.f32.mrf.mxu0  ;;  %v4337_v37 = vpop.f32.mrf.mxu1 }
 0x6c3   :  { %v7262_v38 = vpop.f32.mrf.mxu0  ;;  %v7282_v39 = vpop.f32.mrf.mxu1 }
 0x6c4   :  { %v6103_v38 = vld [vmem:[%s9104_s10] ss:$0 sm:$0xff] }
 0x6dd   :  { %v4443_v60 = vpop.f32.mrf.mxu0  ;;  %v4552_v48 = vpop.f32.mrf.mxu1 }
 0x6de   :  { %v4449_v47 = vadd.f32 %v4443_v60, %v4340_v35 }
 0x6df   :  { %v7301_v50 = vpop.f32.mrf.mxu0  ;;  %v7321_v51 = vpop.f32.mrf.mxu1 }
 0x6e0   :  { %v4558_v53 = vadd.f32 %v4552_v48, %v4449_v47 }
 0x6e1   :  { %v4446_v54 = vpop.f32.mrf.mxu0  ;;  %v4555_v55 = vpop.f32.mrf.mxu1 }
 0x6e3   :  { %v7302_v56 = vpop.f32.mrf.mxu0  ;;  %v7322_v57 = vpop.f32.mrf.mxu1 }
 0x6fd   :  { %v4661_v61 = vpop.f32.mrf.mxu0  ;;  %v4770_v62 = vpop.f32.mrf.mxu1 }
 0x6fe   :  { %v4667_v63 = vadd.f32 %v4661_v61, %v4558_v53 }
 0x6ff   :  { %v7341_v40 = vpop.f32.mrf.mxu0  ;;  %v7361_v2 = vpop.f32.mrf.mxu1 }
 0x700   :  { %v4776_v41 = vadd.f32 %v4770_v62, %v4667_v63 }
 0x701   :  { %v4664_v4 = vpop.f32.mrf.mxu0  ;;  %v4773_v6 = vpop.f32.mrf.mxu1 }
 0x703   :  { %v7342_v7 = vpop.f32.mrf.mxu0  ;;  %v7362_v8 = vpop.f32.mrf.mxu1 }
 0x71d   :  { %v4879_v9 = vpop.f32.mrf.mxu0  ;;  %v4988_v0 = vpop.f32.mrf.mxu1 }
 0x71e   :  { %v4885_v21 = vadd.f32 %v4879_v9, %v4776_v41 }
 0x71f   :  { %v7381_v10 = vpop.f32.mrf.mxu0  ;;  %v7401_v11 = vpop.f32.mrf.mxu1 }
 0x720   :  { %v4994_v22 = vadd.f32 %v4988_v0, %v4885_v21 }
 0x721   :  { %v4882_v12 = vpop.f32.mrf.mxu0  ;;  %v4991_v13 = vpop.f32.mrf.mxu1 }
 0x723   :  { %v7382_v52 = vpop.f32.mrf.mxu0  ;;  %v7402_v14 = vpop.f32.mrf.mxu1 }
 0x73d   :  { %v5097_v19 = vpop.f32.mrf.mxu0  ;;  %v5206_v15 = vpop.f32.mrf.mxu1 }
 0x73e   :  { %v5103_v5 = vadd.f32 %v5097_v19, %v4994_v22 }
 0x73f   :  { %v7421_v16 = vpop.f32.mrf.mxu0  ;;  %v7441_v3 = vpop.f32.mrf.mxu1 }
 0x740   :  { %v5212_v23 = vadd.f32 %v5206_v15, %v5103_v5 }
 0x741   :  { %v5100_v17 = vpop.f32.mrf.mxu0  ;;  %v5209_v18 = vpop.f32.mrf.mxu1 }
 0x743   :  { %v7422_v1 = vpop.f32.mrf.mxu0  ;;  %v7442_v20 = vpop.f32.mrf.mxu1 }
 0x75d   :  { %v5315_v24 = vpop.f32.mrf.mxu0  ;;  %v5424_v25 = vpop.f32.mrf.mxu1 }
 0x75e   :  { %v5321_v26 = vadd.f32 %v5315_v24, %v5212_v23 }
 0x75f   :  { %v7461_v28 = vpop.f32.mrf.mxu0  ;;  %v7481_v29 = vpop.f32.mrf.mxu1 }
 0x760   :  { %v5430_v30 = vadd.f32 %v5424_v25, %v5321_v26 }
 0x761   :  { %v5318_v31 = vpop.f32.mrf.mxu0  ;;  %v5427_v32 = vpop.f32.mrf.mxu1 }
 0x762   :  { %v5438_v33 = vadd.f32 %v6102_v27, %v5430_v30 }
 0x763   :  { %v7462_v34 = vpop.f32.mrf.mxu0  ;;  %v7482_v35 = vpop.f32.mrf.mxu1 }
 0x764   :  { %v5439_v36 = vmax.f32 %v5438_v33, 0.0 }
 0x766   :  { %v5440_v37 = vpack.c.bf16 %v5439_v36, %v5439_v36 }
 0x768   :  { %7500 = vmatmul.mubr.bf16.vlgmr.msra.gmra.mxu0 %v5440_v37 }
 0x828   :  { %v5546_v39 = vpop.f32.mrf.mxu0 }
 0x829   :  { %v5547_v42 = vadd.f32 %v6103_v38, %v5546_v39 }
 0x82a   :  { %v7501_v43 = vpop.f32.mrf.mxu0 }
 0x82b   :  { %5552 = vst [vmem:[#allocation8] sm:$0x3] %v5547_v42 }
 0x82c   :  { %v5549_v44 = vpop.f32.mrf.mxu0 }
 0x82d   :  { %7886 = shalt.err (!%p7883_p9)
}
 0x82e   :  { %5562 = dma.vmem_to_hbm [thread:$0]  %s5560_s25, 32, %s9105_s11, [#allocation7]   ;;  %v7502_v45 = vpop.f32.mrf.mxu0 }
 0x82f   :  { %7897 = dma.done.wait [#allocation7], 32  }
 0x830   :  { %7898 = vsyncadd [#allocation7], 4294967264 }
 0x831   :  { %5566 = vsyncpa [#allocation6], 1 }
 0x832   :  { %5567 = vsyncpa [#allocation7], 1 }

</bundles_post_ra>
